<compile_context>
chip_gen: v6e
topology: v6e:2x2x1
jax: 0.10.0
libtpu: 0.0.40
codegen_flags: <defaults>
</compile_context>

<pallas_src>
import functools

import jax
import jax.numpy as jnp
from jax import lax
from jax.experimental import pallas as pl
from jax.experimental.pallas import tpu as pltpu


# ---------------------------------------------------------------------------
# Fused kernel: LayerNorm + QKV (prologue) -> per-head attention + proj + res.
# ---------------------------------------------------------------------------
def fused_attn_block_kernel(x_ref, gamma_ref, beta_ref, wqkv_ref, wproj_ref,
                            bproj_ref, out_ref, qkv_scr, *, eps, num_heads):
    # x_ref:     (N, C)   f32   full sequence of this batch element (resident)
    # gamma/beta:(1, C)   f32
    # wqkv_ref:  (C, 3C)  bf16  (softmax scale folded into the Q columns)
    # wproj_ref: (H, hd,C)bf16  per-head output-projection weight
    # bproj_ref: (1, C)   f32
    # out_ref:   (TQ, C)  f32   output tile (LN'd-attn + proj + residual)
    # qkv_scr:   (N, 3C)  bf16  VMEM scratch, persists across q tiles of a batch
    N, C = x_ref.shape
    tq = out_ref.shape[0]
    hd = C // num_heads
    qt = pl.program_id(1)

    # ---- prologue: once per batch element (qt == 0) --------------------------
    @pl.when(qt == 0)
    def _():
        x = x_ref[...].astype(jnp.float32)
        mu = jnp.mean(x, axis=-1, keepdims=True)
        var = jnp.mean((x - mu) ** 2, axis=-1, keepdims=True)
        xn = (x - mu) * lax.rsqrt(var + eps)
        xn = xn * gamma_ref[...] + beta_ref[...]                 # f32 elementwise
        qkv = jnp.dot(xn.astype(jnp.bfloat16), wqkv_ref[...],
                      preferred_element_type=jnp.float32)        # MXU, f32 acc
        qkv_scr[...] = qkv.astype(qkv_scr.dtype)

    # ---- attention for this q tile: static per-head loop, one f32 accumulator
    q0 = pl.multiple_of(qt * tq, tq)
    acc = jnp.zeros((tq, C), jnp.float32)
    for h in range(num_heads):  # static (fully unrolled) head loop
        # Static 32-lane column slices out of the (N, 3C) scratch.
        q_h = qkv_scr[pl.ds(q0, tq), h * hd:(h + 1) * hd]          # (tq, hd) bf16 (pre-scaled)
        k_h = qkv_scr[:, C + h * hd:C + (h + 1) * hd]              # (N, hd)  bf16
        v_h = qkv_scr[:, 2 * C + h * hd:2 * C + (h + 1) * hd]      # (N, hd)  bf16

        # Scores (tq, N): contract head_dim, no explicit k.T materialization.
        s = lax.dot_general(q_h, k_h, (((1,), (1,)), ((), ())),
                            preferred_element_type=jnp.float32)

        # f32 softmax numerator; normalize AFTER the PV matmul (exact recip).
        m = jnp.max(s, axis=-1, keepdims=True)
        p = jnp.exp(s - m)                                         # <= 1, safe in bf16
        l = jnp.sum(p, axis=-1, keepdims=True)                     # (tq, 1)

        o = jnp.dot(p.astype(jnp.bfloat16), v_h,
                    preferred_element_type=jnp.float32)            # (tq, hd) f32
        o = o * (1.0 / l)                                          # exact, only tq*hd mults

        # Per-head output projection, accumulated in f32 (== concat(heads)@Wproj).
        acc = acc + jnp.dot(o.astype(jnp.bfloat16), wproj_ref[h],
                            preferred_element_type=jnp.float32)    # (tq, C) f32

    x_tile = x_ref[pl.ds(q0, tq), :].astype(jnp.float32)           # residual
    out_ref[...] = (x_tile + acc + bproj_ref[...]).astype(out_ref.dtype)


# ---------------------------------------------------------------------------
# Wrapper
# ---------------------------------------------------------------------------
@functools.partial(jax.jit, static_argnames=("num_heads", "tq"))
def attn_block(x, gamma, beta, wqkv, wproj, bproj, *, num_heads, tq=128):
    B, N, C = x.shape
    assert C % num_heads == 0
    hd = C // num_heads
    tq = min(tq, N)
    assert N % tq == 0
    scale = hd ** (-0.5)

    # Fold softmax scale into the Q columns of Wqkv; feed the MXU bf16.
    wqkv_bf = wqkv.at[:, :C].multiply(scale).astype(jnp.bfloat16)
    # Per-head output-projection weight: (C, C) -> (H, hd, C).
    wproj_bf = wproj.reshape(num_heads, hd, C).astype(jnp.bfloat16)

    kernel = functools.partial(fused_attn_block_kernel, eps=1e-5,
                               num_heads=num_heads)

    out = pl.pallas_call(
        kernel,
        out_shape=jax.ShapeDtypeStruct((B, N, C), x.dtype),
        grid_spec=pltpu.PrefetchScalarGridSpec(
            num_scalar_prefetch=0,
            grid=(B, N // tq),
            in_specs=[
                # x: full sequence per batch element; block index is constant
                # across the qt axis, so it is DMA'd once and stays resident.
                pl.BlockSpec((None, N, C), lambda b, qt: (b, 0, 0)),
                pl.BlockSpec((1, C), lambda b, qt: (0, 0)),                 # gamma
                pl.BlockSpec((1, C), lambda b, qt: (0, 0)),                 # beta
                pl.BlockSpec((C, 3 * C), lambda b, qt: (0, 0)),             # Wqkv (Q cols scaled)
                pl.BlockSpec((num_heads, hd, C), lambda b, qt: (0, 0, 0)),  # Wproj per head
                pl.BlockSpec((1, C), lambda b, qt: (0, 0)),                 # bproj
            ],
            out_specs=pl.BlockSpec((None, tq, C), lambda b, qt: (b, qt, 0)),
            # Single-buffered VMEM scratch holding LN+QKV for the whole
            # sequence of the current batch element (bf16, 3*N*C*2 bytes).
            scratch_shapes=[pltpu.VMEM((N, 3 * C), jnp.bfloat16)],
        ),
        compiler_params=pltpu.CompilerParams(
            # B is genuinely parallel (megacore split on v7x); the qt axis is
            # "arbitrary" because the QKV scratch is reused across q tiles.
            dimension_semantics=("parallel", "arbitrary"),
            vmem_limit_bytes=32 * 1024 * 1024,
        ),
    )(x, gamma, beta, wqkv_bf, wproj_bf, bproj)
    return out


# ---------------------------------------------------------------------------
# Pure-JAX reference mirroring the PyTorch forward (bf16 MXU operands, f32
# accumulation / LayerNorm / softmax) for correctness checking.
# ---------------------------------------------------------------------------
def attn_block_ref(x, gamma, beta, wqkv, wproj, bproj, *, num_heads):
    B, N, C = x.shape
    hd = C // num_heads
    scale = hd ** (-0.5)
    wqkv_bf = wqkv.at[:, :C].multiply(scale).astype(jnp.bfloat16)
    wproj_bf = wproj.astype(jnp.bfloat16)

    mu = jnp.mean(x, axis=-1, keepdims=True)
    var = jnp.mean((x - mu) ** 2, axis=-1, keepdims=True)
    xn = (x - mu) * lax.rsqrt(var + 1e-5) * gamma.reshape(1, 1, C) + beta.reshape(1, 1, C)

    qkv = jnp.einsum('bnc,cd->bnd', xn.astype(jnp.bfloat16), wqkv_bf,
                     preferred_element_type=jnp.float32).astype(jnp.bfloat16)
    qkv = qkv.reshape(B, N, 3, num_heads, hd).transpose(2, 0, 3, 1, 4)
    q, k, v = qkv[0], qkv[1], qkv[2]                     # (B, H, N, hd) bf16

    s = jnp.einsum('bhqd,bhkd->bhqk', q, k, preferred_element_type=jnp.float32)
    s = s - jnp.max(s, axis=-1, keepdims=True)
    p = jax.nn.softmax(s, axis=-1)
    o = jnp.einsum('bhqk,bhkd->bhqd', p.astype(jnp.bfloat16), v,
                   preferred_element_type=jnp.float32)
    o = o.transpose(0, 2, 1, 3).reshape(B, N, C)
    proj = jnp.einsum('bnc,cd->bnd', o.astype(jnp.bfloat16), wproj_bf,
                      preferred_element_type=jnp.float32) + bproj.reshape(1, 1, C)
    return x + proj


if __name__ == "__main__":
    B, N, C, num_heads = 2, 128, 128, 4     # lane-dense C, head_dim = 32

    key = jax.random.PRNGKey(0)
    kx, kg, kb, kqkv, kp, kpb = jax.random.split(key, 6)

    x = jax.random.normal(kx, (B, N, C), dtype=jnp.float32)
    gamma = 1.0 + 0.1 * jax.random.normal(kg, (1, C), dtype=jnp.float32)
    beta = 0.05 * jax.random.normal(kb, (1, C), dtype=jnp.float32)
    wqkv = 0.02 * jax.random.normal(kqkv, (C, 3 * C), dtype=jnp.float32)
    wproj = 0.02 * jax.random.normal(kp, (C, C), dtype=jnp.float32)
    bproj = 0.01 * jax.random.normal(kpb, (1, C), dtype=jnp.float32)

    out = attn_block(x, gamma, beta, wqkv, wproj, bproj, num_heads=num_heads)
    out = jax.block_until_ready(out)

    ref = attn_block_ref(x, gamma, beta, wqkv, wproj, bproj, num_heads=num_heads)
    max_err = jnp.max(jnp.abs(out - ref))
    assert jnp.allclose(out, ref, rtol=2e-3, atol=2e-3), (
        f"mismatch vs reference, max abs err = {max_err}")

    print("KERNEL_OK")
</pallas_src>

<mosaic_0001>
module attributes {stable_mosaic.version = 11 : i64} {
  func.func @fused_attn_block_kernel(%arg0: i32, %arg1: i32, %arg2: memref<1x128x128xf32, #tpu.memory_space<vmem>>, %arg3: memref<1x128xf32, #tpu.memory_space<vmem>>, %arg4: memref<1x128xf32, #tpu.memory_space<vmem>>, %arg5: memref<128x384xbf16, #tpu.memory_space<vmem>>, %arg6: memref<4x32x128xbf16, #tpu.memory_space<vmem>>, %arg7: memref<1x128xf32, #tpu.memory_space<vmem>>, %arg8: memref<1x128x128xf32, #tpu.memory_space<vmem>>, %arg9: memref<128x384xbf16, #tpu.memory_space<vmem>>) attributes {dimension_semantics = [#tpu.dimension_semantics<parallel>, #tpu.dimension_semantics<arbitrary>], iteration_bounds = array<i64: 2, 1>, scalar_prefetch = 0 : i64, scratch_operands = 1 : i64, tpu.core_type = #tpu.core_type<tc>, window_params = [{transform_indices = @transform_0, window_bounds = array<i64: 1, 128, 128>}, {pipeline_mode = #tpu.pipeline_mode<synchronous>, transform_indices = @transform_1, window_bounds = array<i64: 1, 128>}, {pipeline_mode = #tpu.pipeline_mode<synchronous>, transform_indices = @transform_2, window_bounds = array<i64: 1, 128>}, {pipeline_mode = #tpu.pipeline_mode<synchronous>, transform_indices = @transform_3, window_bounds = array<i64: 128, 384>}, {pipeline_mode = #tpu.pipeline_mode<synchronous>, transform_indices = @transform_4, window_bounds = array<i64: 4, 32, 128>}, {pipeline_mode = #tpu.pipeline_mode<synchronous>, transform_indices = @transform_5, window_bounds = array<i64: 1, 128>}, {transform_indices = @transform_6, window_bounds = array<i64: 1, 128, 128>}]} {
    %c0_i32 = arith.constant 0 : i32
    %0 = arith.cmpi eq, %arg1, %c0_i32 : i32
    %1 = arith.extui %0 : i1 to i32
    %c0_i32_0 = arith.constant 0 : i32
    %2 = arith.cmpi ne, %1, %c0_i32_0 : i32
    scf.if %2 {
      %c0_49 = arith.constant 0 : index
      %c0_50 = arith.constant 0 : index
      %c0_51 = arith.constant 0 : index
      %108 = vector.load %arg2[%c0_49, %c0_50, %c0_51] : memref<1x128x128xf32, #tpu.memory_space<vmem>>, vector<1x128x128xf32>
      %109 = vector.shape_cast %108 : vector<1x128x128xf32> to vector<128x128xf32>
      %cst_52 = arith.constant dense<0.000000e+00> : vector<128xf32>
      %110 = vector.multi_reduction <add>, %109, %cst_52 [1] : vector<128x128xf32> to vector<128xf32>
      %111 = vector.shape_cast %110 : vector<128xf32> to vector<128x1xf32>
      %cst_53 = arith.constant 1.280000e+02 : f32
      %112 = vector.broadcast %cst_53 : f32 to vector<128x1xf32>
      %113 = arith.divf %111, %112 : vector<128x1xf32>
      %114 = vector.broadcast %113 : vector<128x1xf32> to vector<128x128xf32>
      %115 = arith.subf %109, %114 : vector<128x128xf32>
      %116 = arith.mulf %115, %115 : vector<128x128xf32>
      %cst_54 = arith.constant dense<0.000000e+00> : vector<128xf32>
      %117 = vector.multi_reduction <add>, %116, %cst_54 [1] : vector<128x128xf32> to vector<128xf32>
      %118 = vector.shape_cast %117 : vector<128xf32> to vector<128x1xf32>
      %cst_55 = arith.constant 1.280000e+02 : f32
      %119 = vector.broadcast %cst_55 : f32 to vector<128x1xf32>
      %120 = arith.divf %118, %119 : vector<128x1xf32>
      %121 = vector.broadcast %113 : vector<128x1xf32> to vector<128x128xf32>
      %122 = arith.subf %109, %121 : vector<128x128xf32>
      %cst_56 = arith.constant 9.99999974E-6 : f32
      %123 = vector.broadcast %cst_56 : f32 to vector<128x1xf32>
      %124 = arith.addf %120, %123 : vector<128x1xf32>
      %125 = math.rsqrt %124 : vector<128x1xf32>
      %126 = vector.broadcast %125 : vector<128x1xf32> to vector<128x128xf32>
      %127 = arith.mulf %122, %126 : vector<128x128xf32>
      %c0_57 = arith.constant 0 : index
      %c0_58 = arith.constant 0 : index
      %128 = vector.load %arg3[%c0_57, %c0_58] : memref<1x128xf32, #tpu.memory_space<vmem>>, vector<1x128xf32>
      %129 = vector.broadcast %128 : vector<1x128xf32> to vector<128x128xf32>
      %130 = arith.mulf %127, %129 : vector<128x128xf32>
      %c0_59 = arith.constant 0 : index
      %c0_60 = arith.constant 0 : index
      %131 = vector.load %arg4[%c0_59, %c0_60] : memref<1x128xf32, #tpu.memory_space<vmem>>, vector<1x128xf32>
      %132 = vector.broadcast %131 : vector<1x128xf32> to vector<128x128xf32>
      %133 = arith.addf %130, %132 : vector<128x128xf32>
      %134 = arith.truncf %133 : vector<128x128xf32> to vector<128x128xbf16>
      %c0_61 = arith.constant 0 : index
      %c0_62 = arith.constant 0 : index
      %135 = vector.load %arg5[%c0_61, %c0_62] : memref<128x384xbf16, #tpu.memory_space<vmem>>, vector<128x384xbf16>
      %cst_63 = arith.constant dense<0.000000e+00> : vector<128x384xf32>
      %136 = tpu.matmul %134, %135, %cst_63 {dimension_numbers = #tpu.dot_dimension_numbers<[1], [0], [0], [1], [0, 0, 1, 1], [], []>} : vector<128x128xbf16>, vector<128x384xbf16>, vector<128x384xf32> -> vector<128x384xf32>
      %137 = arith.truncf %136 : vector<128x384xf32> to vector<128x384xbf16>
      %c0_64 = arith.constant 0 : index
      %c0_65 = arith.constant 0 : index
      %138 = vector.load %arg9[%c0_64, %c0_65] : memref<128x384xbf16, #tpu.memory_space<vmem>>, vector<128x384xbf16>
      tpu.vector_store %arg9[%c0_64, %c0_65], %137 {strides = array<i32>} : memref<128x384xbf16, #tpu.memory_space<vmem>>, vector<128x384xbf16>,
    } else {
    }
    %c128_i32 = arith.constant 128 : i32
    %3 = arith.muli %arg1, %c128_i32 : i32
    %4 = tpu.assume_multiple %3, 128 : i32
    %cst = arith.constant 0.000000e+00 : f32
    %5 = vector.broadcast %cst : f32 to vector<128x128xf32>
    %6 = arith.index_cast %4 : i32 to index
    %c0 = arith.constant 0 : index
    %7 = vector.load %arg9[%6, %c0] : memref<128x384xbf16, #tpu.memory_space<vmem>>, vector<128x32xbf16>
    %c0_1 = arith.constant 0 : index
    %c128 = arith.constant 128 : index
    %8 = vector.load %arg9[%c0_1, %c128] : memref<128x384xbf16, #tpu.memory_space<vmem>>, vector<128x32xbf16>
    %c0_2 = arith.constant 0 : index
    %c256 = arith.constant 256 : index
    %9 = vector.load %arg9[%c0_2, %c256] : memref<128x384xbf16, #tpu.memory_space<vmem>>, vector<128x32xbf16>
    %cst_3 = arith.constant dense<0.000000e+00> : vector<128x128xf32>
    %10 = tpu.matmul %7, %8, %cst_3 {dimension_numbers = #tpu.dot_dimension_numbers<[1], [1], [0], [0], [0, 0, 1, 0], [], []>} : vector<128x32xbf16>, vector<128x32xbf16>, vector<128x128xf32> -> vector<128x128xf32>
    %cst_4 = arith.constant dense<0xFF800000> : vector<128xf32>
    %11 = vector.multi_reduction <maximumf>, %10, %cst_4 [1] : vector<128x128xf32> to vector<128xf32>
    %12 = vector.shape_cast %11 : vector<128xf32> to vector<128x1xf32>
    %13 = vector.broadcast %12 : vector<128x1xf32> to vector<128x128xf32>
    %14 = arith.subf %10, %13 : vector<128x128xf32>
    %15 = math.exp %14 : vector<128x128xf32>
    %cst_5 = arith.constant dense<0.000000e+00> : vector<128xf32>
    %16 = vector.multi_reduction <add>, %15, %cst_5 [1] : vector<128x128xf32> to vector<128xf32>
    %17 = vector.shape_cast %16 : vector<128xf32> to vector<128x1xf32>
    %18 = arith.truncf %15 : vector<128x128xf32> to vector<128x128xbf16>
    %cst_6 = arith.constant dense<0.000000e+00> : vector<128x32xf32>
    %19 = tpu.matmul %18, %9, %cst_6 {dimension_numbers = #tpu.dot_dimension_numbers<[1], [0], [0], [1], [0, 0, 1, 1], [], []>} : vector<128x128xbf16>, vector<128x32xbf16>, vector<128x32xf32> -> vector<128x32xf32>
    %cst_7 = arith.constant 1.000000e+00 : f32
    %20 = vector.broadcast %cst_7 : f32 to vector<128x1xf32>
    %21 = arith.divf %20, %17 : vector<128x1xf32>
    %22 = vector.broadcast %21 : vector<128x1xf32> to vector<128x32xf32>
    %23 = arith.mulf %19, %22 : vector<128x32xf32>
    %24 = arith.truncf %23 : vector<128x32xf32> to vector<128x32xbf16>
    %c0_8 = arith.constant 0 : index
    %c0_9 = arith.constant 0 : index
    %c0_10 = arith.constant 0 : index
    %25 = vector.load %arg6[%c0_8, %c0_9, %c0_10] : memref<4x32x128xbf16, #tpu.memory_space<vmem>>, vector<1x32x128xbf16>
    %26 = vector.shape_cast %25 : vector<1x32x128xbf16> to vector<32x128xbf16>
    %cst_11 = arith.constant dense<0.000000e+00> : vector<128x128xf32>
    %27 = tpu.matmul %24, %26, %cst_11 {dimension_numbers = #tpu.dot_dimension_numbers<[1], [0], [0], [1], [0, 0, 1, 1], [], []>} : vector<128x32xbf16>, vector<32x128xbf16>, vector<128x128xf32> -> vector<128x128xf32>
    %28 = arith.addf %5, %27 : vector<128x128xf32>
    %29 = arith.index_cast %4 : i32 to index
    %c32 = arith.constant 32 : index
    %30 = vector.load %arg9[%29, %c32] : memref<128x384xbf16, #tpu.memory_space<vmem>>, vector<128x32xbf16>
    %c0_12 = arith.constant 0 : index
    %c160 = arith.constant 160 : index
    %31 = vector.load %arg9[%c0_12, %c160] : memref<128x384xbf16, #tpu.memory_space<vmem>>, vector<128x32xbf16>
    %c0_13 = arith.constant 0 : index
    %c288 = arith.constant 288 : index
    %32 = vector.load %arg9[%c0_13, %c288] : memref<128x384xbf16, #tpu.memory_space<vmem>>, vector<128x32xbf16>
    %cst_14 = arith.constant dense<0.000000e+00> : vector<128x128xf32>
    %33 = tpu.matmul %30, %31, %cst_14 {dimension_numbers = #tpu.dot_dimension_numbers<[1], [1], [0], [0], [0, 0, 1, 0], [], []>} : vector<128x32xbf16>, vector<128x32xbf16>, vector<128x128xf32> -> vector<128x128xf32>
    %cst_15 = arith.constant dense<0xFF800000> : vector<128xf32>
    %34 = vector.multi_reduction <maximumf>, %33, %cst_15 [1] : vector<128x128xf32> to vector<128xf32>
    %35 = vector.shape_cast %34 : vector<128xf32> to vector<128x1xf32>
    %36 = vector.broadcast %35 : vector<128x1xf32> to vector<128x128xf32>
    %37 = arith.subf %33, %36 : vector<128x128xf32>
    %38 = math.exp %37 : vector<128x128xf32>
    %cst_16 = arith.constant dense<0.000000e+00> : vector<128xf32>
    %39 = vector.multi_reduction <add>, %38, %cst_16 [1] : vector<128x128xf32> to vector<128xf32>
    %40 = vector.shape_cast %39 : vector<128xf32> to vector<128x1xf32>
    %41 = arith.truncf %38 : vector<128x128xf32> to vector<128x128xbf16>
    %cst_17 = arith.constant dense<0.000000e+00> : vector<128x32xf32>
    %42 = tpu.matmul %41, %32, %cst_17 {dimension_numbers = #tpu.dot_dimension_numbers<[1], [0], [0], [1], [0, 0, 1, 1], [], []>} : vector<128x128xbf16>, vector<128x32xbf16>, vector<128x32xf32> -> vector<128x32xf32>
    %cst_18 = arith.constant 1.000000e+00 : f32
    %43 = vector.broadcast %cst_18 : f32 to vector<128x1xf32>
    %44 = arith.divf %43, %40 : vector<128x1xf32>
    %45 = vector.broadcast %44 : vector<128x1xf32> to vector<128x32xf32>
    %46 = arith.mulf %42, %45 : vector<128x32xf32>
    %47 = arith.truncf %46 : vector<128x32xf32> to vector<128x32xbf16>
    %c1 = arith.constant 1 : index
    %c0_19 = arith.constant 0 : index
    %c0_20 = arith.constant 0 : index
    %48 = vector.load %arg6[%c1, %c0_19, %c0_20] : memref<4x32x128xbf16, #tpu.memory_space<vmem>>, vector<1x32x128xbf16>
    %49 = vector.shape_cast %48 : vector<1x32x128xbf16> to vector<32x128xbf16>
    %cst_21 = arith.constant dense<0.000000e+00> : vector<128x128xf32>
    %50 = tpu.matmul %47, %49, %cst_21 {dimension_numbers = #tpu.dot_dimension_numbers<[1], [0], [0], [1], [0, 0, 1, 1], [], []>} : vector<128x32xbf16>, vector<32x128xbf16>, vector<128x128xf32> -> vector<128x128xf32>
    %51 = arith.addf %28, %50 : vector<128x128xf32>
    %52 = arith.index_cast %4 : i32 to index
    %c64 = arith.constant 64 : index
    %53 = vector.load %arg9[%52, %c64] : memref<128x384xbf16, #tpu.memory_space<vmem>>, vector<128x32xbf16>
    %c0_22 = arith.constant 0 : index
    %c192 = arith.constant 192 : index
    %54 = vector.load %arg9[%c0_22, %c192] : memref<128x384xbf16, #tpu.memory_space<vmem>>, vector<128x32xbf16>
    %c0_23 = arith.constant 0 : index
    %c320 = arith.constant 320 : index
    %55 = vector.load %arg9[%c0_23, %c320] : memref<128x384xbf16, #tpu.memory_space<vmem>>, vector<128x32xbf16>
    %cst_24 = arith.constant dense<0.000000e+00> : vector<128x128xf32>
    %56 = tpu.matmul %53, %54, %cst_24 {dimension_numbers = #tpu.dot_dimension_numbers<[1], [1], [0], [0], [0, 0, 1, 0], [], []>} : vector<128x32xbf16>, vector<128x32xbf16>, vector<128x128xf32> -> vector<128x128xf32>
    %cst_25 = arith.constant dense<0xFF800000> : vector<128xf32>
    %57 = vector.multi_reduction <maximumf>, %56, %cst_25 [1] : vector<128x128xf32> to vector<128xf32>
    %58 = vector.shape_cast %57 : vector<128xf32> to vector<128x1xf32>
    %59 = vector.broadcast %58 : vector<128x1xf32> to vector<128x128xf32>
    %60 = arith.subf %56, %59 : vector<128x128xf32>
    %61 = math.exp %60 : vector<128x128xf32>
    %cst_26 = arith.constant dense<0.000000e+00> : vector<128xf32>
    %62 = vector.multi_reduction <add>, %61, %cst_26 [1] : vector<128x128xf32> to vector<128xf32>
    %63 = vector.shape_cast %62 : vector<128xf32> to vector<128x1xf32>
    %64 = arith.truncf %61 : vector<128x128xf32> to vector<128x128xbf16>
    %cst_27 = arith.constant dense<0.000000e+00> : vector<128x32xf32>
    %65 = tpu.matmul %64, %55, %cst_27 {dimension_numbers = #tpu.dot_dimension_numbers<[1], [0], [0], [1], [0, 0, 1, 1], [], []>} : vector<128x128xbf16>, vector<128x32xbf16>, vector<128x32xf32> -> vector<128x32xf32>
    %cst_28 = arith.constant 1.000000e+00 : f32
    %66 = vector.broadcast %cst_28 : f32 to vector<128x1xf32>
    %67 = arith.divf %66, %63 : vector<128x1xf32>
    %68 = vector.broadcast %67 : vector<128x1xf32> to vector<128x32xf32>
    %69 = arith.mulf %65, %68 : vector<128x32xf32>
    %70 = arith.truncf %69 : vector<128x32xf32> to vector<128x32xbf16>
    %c2 = arith.constant 2 : index
    %c0_29 = arith.constant 0 : index
    %c0_30 = arith.constant 0 : index
    %71 = vector.load %arg6[%c2, %c0_29, %c0_30] : memref<4x32x128xbf16, #tpu.memory_space<vmem>>, vector<1x32x128xbf16>
    %72 = vector.shape_cast %71 : vector<1x32x128xbf16> to vector<32x128xbf16>
    %cst_31 = arith.constant dense<0.000000e+00> : vector<128x128xf32>
    %73 = tpu.matmul %70, %72, %cst_31 {dimension_numbers = #tpu.dot_dimension_numbers<[1], [0], [0], [1], [0, 0, 1, 1], [], []>} : vector<128x32xbf16>, vector<32x128xbf16>, vector<128x128xf32> -> vector<128x128xf32>
    %74 = arith.addf %51, %73 : vector<128x128xf32>
    %75 = arith.index_cast %4 : i32 to index
    %c96 = arith.constant 96 : index
    %76 = vector.load %arg9[%75, %c96] : memref<128x384xbf16, #tpu.memory_space<vmem>>, vector<128x32xbf16>
    %c0_32 = arith.constant 0 : index
    %c224 = arith.constant 224 : index
    %77 = vector.load %arg9[%c0_32, %c224] : memref<128x384xbf16, #tpu.memory_space<vmem>>, vector<128x32xbf16>
    %c0_33 = arith.constant 0 : index
    %c352 = arith.constant 352 : index
    %78 = vector.load %arg9[%c0_33, %c352] : memref<128x384xbf16, #tpu.memory_space<vmem>>, vector<128x32xbf16>
    %cst_34 = arith.constant dense<0.000000e+00> : vector<128x128xf32>
    %79 = tpu.matmul %76, %77, %cst_34 {dimension_numbers = #tpu.dot_dimension_numbers<[1], [1], [0], [0], [0, 0, 1, 0], [], []>} : vector<128x32xbf16>, vector<128x32xbf16>, vector<128x128xf32> -> vector<128x128xf32>
    %cst_35 = arith.constant dense<0xFF800000> : vector<128xf32>
    %80 = vector.multi_reduction <maximumf>, %79, %cst_35 [1] : vector<128x128xf32> to vector<128xf32>
    %81 = vector.shape_cast %80 : vector<128xf32> to vector<128x1xf32>
    %82 = vector.broadcast %81 : vector<128x1xf32> to vector<128x128xf32>
    %83 = arith.subf %79, %82 : vector<128x128xf32>
    %84 = math.exp %83 : vector<128x128xf32>
    %cst_36 = arith.constant dense<0.000000e+00> : vector<128xf32>
    %85 = vector.multi_reduction <add>, %84, %cst_36 [1] : vector<128x128xf32> to vector<128xf32>
    %86 = vector.shape_cast %85 : vector<128xf32> to vector<128x1xf32>
    %87 = arith.truncf %84 : vector<128x128xf32> to vector<128x128xbf16>
    %cst_37 = arith.constant dense<0.000000e+00> : vector<128x32xf32>
    %88 = tpu.matmul %87, %78, %cst_37 {dimension_numbers = #tpu.dot_dimension_numbers<[1], [0], [0], [1], [0, 0, 1, 1], [], []>} : vector<128x128xbf16>, vector<128x32xbf16>, vector<128x32xf32> -> vector<128x32xf32>
    %cst_38 = arith.constant 1.000000e+00 : f32
    %89 = vector.broadcast %cst_38 : f32 to vector<128x1xf32>
    %90 = arith.divf %89, %86 : vector<128x1xf32>
    %91 = vector.broadcast %90 : vector<128x1xf32> to vector<128x32xf32>
    %92 = arith.mulf %88, %91 : vector<128x32xf32>
    %93 = arith.truncf %92 : vector<128x32xf32> to vector<128x32xbf16>
    %c3 = arith.constant 3 : index
    %c0_39 = arith.constant 0 : index
    %c0_40 = arith.constant 0 : index
    %94 = vector.load %arg6[%c3, %c0_39, %c0_40] : memref<4x32x128xbf16, #tpu.memory_space<vmem>>, vector<1x32x128xbf16>
    %95 = vector.shape_cast %94 : vector<1x32x128xbf16> to vector<32x128xbf16>
    %cst_41 = arith.constant dense<0.000000e+00> : vector<128x128xf32>
    %96 = tpu.matmul %93, %95, %cst_41 {dimension_numbers = #tpu.dot_dimension_numbers<[1], [0], [0], [1], [0, 0, 1, 1], [], []>} : vector<128x32xbf16>, vector<32x128xbf16>, vector<128x128xf32> -> vector<128x128xf32>
    %97 = arith.addf %74, %96 : vector<128x128xf32>
    %c0_42 = arith.constant 0 : index
    %98 = arith.index_cast %4 : i32 to index
    %c0_43 = arith.constant 0 : index
    %99 = vector.load %arg2[%c0_42, %98, %c0_43] : memref<1x128x128xf32, #tpu.memory_space<vmem>>, vector<1x128x128xf32>
    %100 = vector.shape_cast %99 : vector<1x128x128xf32> to vector<128x128xf32>
    %101 = arith.addf %100, %97 : vector<128x128xf32>
    %c0_44 = arith.constant 0 : index
    %c0_45 = arith.constant 0 : index
    %102 = vector.load %arg7[%c0_44, %c0_45] : memref<1x128xf32, #tpu.memory_space<vmem>>, vector<1x128xf32>
    %103 = vector.broadcast %102 : vector<1x128xf32> to vector<128x128xf32>
    %104 = arith.addf %101, %103 : vector<128x128xf32>
    %c0_46 = arith.constant 0 : index
    %c0_47 = arith.constant 0 : index
    %c0_48 = arith.constant 0 : index
    %105 = vector.load %arg8[%c0_46, %c0_47, %c0_48] : memref<1x128x128xf32, #tpu.memory_space<vmem>>, vector<1x128x128xf32>
    %106 = vector.shape_cast %105 : vector<1x128x128xf32> to vector<128x128xf32>
    %107 = vector.shape_cast %104 : vector<128x128xf32> to vector<1x128x128xf32>
    tpu.vector_store %arg8[%c0_46, %c0_47, %c0_48], %107 {strides = array<i32>} : memref<1x128x128xf32, #tpu.memory_space<vmem>>, vector<1x128x128xf32>,
    return
  }
  func.func @transform_0(%arg0: i32, %arg1: i32) -> (i32, i32, i32) {
    %c0_i32 = arith.constant 0 : i32
    %c0_i32_0 = arith.constant 0 : i32
    %c0_i32_1 = arith.constant 0 : i32
    return %arg0, %c0_i32, %c0_i32_0 : i32, i32, i32
  }
  func.func @transform_1(%arg0: i32, %arg1: i32) -> (i32, i32) {
    %c0_i32 = arith.constant 0 : i32
    %c0_i32_0 = arith.constant 0 : i32
    %c0_i32_1 = arith.constant 0 : i32
    return %c0_i32, %c0_i32_0 : i32, i32
  }
  func.func @transform_2(%arg0: i32, %arg1: i32) -> (i32, i32) {
    %c0_i32 = arith.constant 0 : i32
    %c0_i32_0 = arith.constant 0 : i32
    %c0_i32_1 = arith.constant 0 : i32
    return %c0_i32, %c0_i32_0 : i32, i32
  }
  func.func @transform_3(%arg0: i32, %arg1: i32) -> (i32, i32) {
    %c0_i32 = arith.constant 0 : i32
    %c0_i32_0 = arith.constant 0 : i32
    %c0_i32_1 = arith.constant 0 : i32
    return %c0_i32, %c0_i32_0 : i32, i32
  }
  func.func @transform_4(%arg0: i32, %arg1: i32) -> (i32, i32, i32) {
    %c0_i32 = arith.constant 0 : i32
    %c0_i32_0 = arith.constant 0 : i32
    %c0_i32_1 = arith.constant 0 : i32
    %c0_i32_2 = arith.constant 0 : i32
    return %c0_i32, %c0_i32_0, %c0_i32_1 : i32, i32, i32
  }
  func.func @transform_5(%arg0: i32, %arg1: i32) -> (i32, i32) {
    %c0_i32 = arith.constant 0 : i32
    %c0_i32_0 = arith.constant 0 : i32
    %c0_i32_1 = arith.constant 0 : i32
    return %c0_i32, %c0_i32_0 : i32, i32
  }
  func.func @transform_6(%arg0: i32, %arg1: i32) -> (i32, i32, i32) {
    %c0_i32 = arith.constant 0 : i32
    %c0_i32_0 = arith.constant 0 : i32
    return %arg0, %arg1, %c0_i32 : i32, i32, i32
  }
}

</mosaic_0001>

<bundles_post_ra>
// kernel: attn_block.1
= control target key start
LH: loop header
LB: loop body
LE: loop exit
PB: predicated region body
PF: predicated region fallthrough
CT: control target
= control target key end

     0   :  { %11 = vsyncpa [#allocation4], 0  ;;  %s6697_s0 = inlined_call_operand.vmem [shape: f32[2,128,128], index: 0, kind: input, shape index: {}]   ;;  %s6698_s1 = inlined_call_operand.vmem [shape: f32[1,128], index: 1, kind: input, shape index: {}]   ;;  %s6699_s2 = inlined_call_operand.vmem [shape: f32[1,128], index: 2, kind: input, shape index: {}]   ;;  %s6700_s3 = inlined_call_operand.vmem [shape: bf16[128,384], index: 3, kind: input, shape index: {}]   ;;  %s6701_s4 = inlined_call_operand.vmem [shape: bf16[4,32,128], index: 4, kind: input, shape index: {}]   ;;  %s6702_s5 = inlined_call_operand.vmem [shape: f32[1,128], index: 5, kind: input, shape index: {}]   ;;  %s6703_s6 = inlined_call_operand.hbm [shape: f32[2,128,128], index: 6, kind: output, shape index: {}]  }
   0x1   :  { %13 = vsyncpa [#allocation4 + $0x1], 0  ;;  %s5197_s21 = smov 0   ;;  %s5199_s22 = smov 0  }
   0x2   :  { %s5201_s23 = smov 0   ;;  %s5203_s24 = smov 0  }
   0x3   :  { %s5205_s25 = smov 0   ;;  %s5207_s26 = smov 0  }
   0x4 LB: > { %s3850_s27 = sadd.s32 4294967295, %s5153_s26   ;;  %s3851_s28 = sadd.s32 4294967294, %s5153_s26   ;;  %s5153_s26 = sphi %s5207_s26, %s19_s26   ;;  %s5149_s25 = sphi %s5205_s25, %s6764_s25   ;;  %s5145_s24 = sphi %s5203_s24, %s6763_s24   ;;  %s5141_s23 = sphi %s5201_s23, %s6762_s23   ;;  %s5137_s22 = sphi %s5199_s22, %s6761_s22   ;;  %s5133_s21 = sphi %s5197_s21, %s6760_s21  }
   0x5   : > { %s31_s29 = sadd.s32 1, %s5149_s25  ;;  %s171_s30 = sadd.s32 1, %s5141_s23 }
   0x6   : > { %p33_p0 = scmp.ge.s32.totalorder %s31_s29, 2  ;;  %p181_p1 = scmp.ne.s32.totalorder %s5141_s23, %s5137_s22 }
   0x7   : > { %p182_p2 = scmp.eq.s32.totalorder %s3850_s27, 1  ;;  %p187_p3 = scmp.ne.s32.totalorder %s5137_s22, %s5133_s21 }
   0x8   : > { %s6766_s29 = smov (%p33_p0, %s31_s29), 0  ;;  %p188_p5 = scmp.eq.s32.totalorder %s3851_s28, 1 }
   0x9   : > { %p5237_p4 = por %p182_p2, %p181_p1  ;;  %s166_s8 = ssub.s32 %s5149_s25, %s6766_s29 }
   0xa   : > { %p3854_p6 = scmp.ge.s32.totalorder %s5153_s26, 1  ;;  %p169_p7 = scmp.eq.s32.totalorder %s166_s8, 0 }
   0xb   : > { %p5244_p8 = por %p188_p5, %p187_p3  ;;  %p229_p9 = scmp.lt.s32.totalorder %s5153_s26, 3 }
   0xc   : > { %s5250_s10 = scalar_select %p169_p7, %s5141_s23, %s171_s30  }
   0xd   : > { %p230_p10 = pnand %p3854_p6, %p229_p9 }
   0xf   : > { %233 = sbr.rel (%p230_p10) target bundleno = 2862 (0xb2e), region = 44 }
  0x14   : > { %p259_p11 = scmp.lt.s32.totalorder %s5145_s24, 1  ;;  %v4709_v16 = vld [vmem:[%s6700_s3 + $0xac] ss:$12 sps:$4 sm:$0xff]   ;;  %v4711_v17 = vld [vmem:[%s6700_s3 + $0xa8] ss:$12 sps:$4 sm:$0xff]   ;;  %vm1213_vm0 = vcmask 261120  }
  0x15   : > { %677 = vmatprep.subr.bf16.mxu0 %v4709_v16  ;;  %v4712_v53 = vld [vmem:[%s6700_s3 + $0x94] ss:$12 sps:$4 sm:$0xff]   ;;  %v4714_v54 = vld [vmem:[%s6700_s3 + $0xb0] ss:$12 sps:$4 sm:$0xff]   ;;  %s5156_s16 = smov 96   ;;  %s5157_s17 = smov 64  }
  0x16   : > { %s260_s11 = scalar_select %p259_p11, %s5145_s24, 1  ;;  %678 = vmatpush1.bf16.msra.mxu0 %v4711_v17  ;;  %v4715_v55 = vld [vmem:[%s6700_s3 + $0x90] ss:$12 sps:$4 sm:$0xff]   ;;  %4248 = vmatprep.subr.bf16.mxu1 %v4714_v54 }
  0x17   : > { %679 = vmatprep.subr.bf16.mxu0 %v4712_v53  ;;  %4249 = vmatpush3.bf16.msra.mxu1 %v4714_v54  ;;  %s5158_s28 = smov 32   ;;  %s4063_s13 = sshll.u32 %s5145_s24, 11 }
  0x18   : > { %s4030_s12 = sshll.u32 %s260_s11, 7  ;;  %s6643_s18 = scalar_lea.hbm %s6703_s6, %s4063_s13 }
  0x19   : > { %s5257_s15 = scalar_lea.vmem %s6697_s0, %s4030_s12  ;;  %s5159_s19 = smov [#allocation3]  }
  0x1a   : > { %v270_v0 = vld [vmem:[%s5257_s15] sm:$0xff]  ;;  %v272_v1 = vld [vmem:[%s5257_s15 + $0x10] sm:$0xff]  ;;  %v271_v2 = vld [vmem:[%s5257_s15 + $0x8] sm:$0xff]  ;;  %680 = vmatpush1.bf16.msra.mxu0 %v4715_v55  ;;  %s5081_s20 = sshll.u32 %s5159_s19, 4  ;;  %s5082_s20 = int_to_ptr.vmem [resolvable:$false] %s5081_s20 }
  0x1b   : > { %286 = vadd.xlane.f32.xlu0 %v270_v0  ;;  %290 = vadd.xlane.f32.xlu1 %v272_v1  ;;  %v273_v3 = vld [vmem:[%s5257_s15 + $0x18] sm:$0xff]  ;;  %v274_v4 = vld [vmem:[%s5257_s15 + $0x20] sm:$0xff]  ;;  %v275_v5 = vld [vmem:[%s5257_s15 + $0x28] sm:$0xff]  ;;  %s5083_s27 = scalar_lea.vmem %s5082_s20, 4096 }
  0x1c   : > { %v276_v6 = vld [vmem:[%s5257_s15 + $0x30] sm:$0xff]  ;;  %v277_v7 = vld [vmem:[%s5257_s15 + $0x38] sm:$0xff]  ;;  %v5268_v8 = vld [vmem:[%s5257_s15 + $0x40] sm:$0xff] }
  0x1d   : > { %v5271_v9 = vld [vmem:[%s5257_s15 + $0x48] sm:$0xff]  ;;  %v5276_v10 = vld [vmem:[%s5257_s15 + $0x50] sm:$0xff]  ;;  %v5279_v11 = vld [vmem:[%s5257_s15 + $0x58] sm:$0xff] }
  0x1e   : > { %v5284_v12 = vld [vmem:[%s5257_s15 + $0x60] sm:$0xff]  ;;  %v5287_v13 = vld [vmem:[%s5257_s15 + $0x68] sm:$0xff]  ;;  %v5292_v14 = vld [vmem:[%s5257_s15 + $0x70] sm:$0xff] }
  0x1f   : > { %288 = vadd.xlane.f32.xlu0 %v271_v2  ;;  %292 = vadd.xlane.f32.xlu1 %v273_v3  ;;  %v5295_v15 = vld [vmem:[%s5257_s15 + $0x78] sm:$0xff] }
  0x23   : > { %294 = vadd.xlane.f32.xlu0 %v274_v4  ;;  %296 = vadd.xlane.f32.xlu1 %v275_v5 }
  0x27   : > { %298 = vadd.xlane.f32.xlu0 %v276_v6  ;;  %300 = vadd.xlane.f32.xlu1 %v277_v7 }
  0x2b   : > { %302 = vadd.xlane.f32.xlu0 %v5268_v8  ;;  %304 = vadd.xlane.f32.xlu1 %v5271_v9 }
  0x2f   : > { %306 = vadd.xlane.f32.xlu0 %v5276_v10  ;;  %308 = vadd.xlane.f32.xlu1 %v5279_v11 }
  0x33   : > { %310 = vadd.xlane.f32.xlu0 %v5284_v12  ;;  %312 = vadd.xlane.f32.xlu1 %v5287_v13 }
  0x37   : > { %314 = vadd.xlane.f32.xlu0 %v5292_v14  ;;  %316 = vadd.xlane.f32.xlu1 %v5295_v15 }
  0xa4   : > { %v287_v18 = vpop.xlane.xlu0 %286  ;;  %v291_v19 = vpop.xlane.xlu1 %290 }
  0xa5   : > { %v319_v20 = vmul.f32 0.0078125, %v287_v18  ;;  %v321_v21 = vmul.f32 0.0078125, %v291_v19 }
  0xa7   : > { %v5305_v22 = vsub.f32 %v270_v0, %v319_v20  ;;  %v5307_v23 = vsub.f32 %v272_v1, %v321_v21  ;;  %v4716_v0 = vld [vmem:[%s6700_s3 + $0x7c] ss:$12 sps:$4 sm:$0xff]   ;;  %v4718_v1 = vld [vmem:[%s6700_s3 + $0x98] ss:$12 sps:$4 sm:$0xff]   ;;  %v4723_v20 = vld [vmem:[%s6700_s3 + $0x60] ss:$12 sps:$4 sm:$0xff]  }
  0xa8   : > { %v289_v24 = vpop.xlane.xlu0 %288  ;;  %v293_v25 = vpop.xlane.xlu1 %292  ;;  %681 = vmatprep.subr.bf16.mxu0 %v4716_v0  ;;  %4250 = vmatprep.subr.bf16.mxu1 %v4718_v1 }
  0xa9   : > { %v320_v26 = vmul.f32 0.0078125, %v289_v24  ;;  %v351_v27 = vmul.f32 %v5305_v22, %v5305_v22  ;;  %v322_v28 = vmul.f32 0.0078125, %v293_v25  ;;  %v353_v29 = vmul.f32 %v5307_v23, %v5307_v23  ;;  %4251 = vmatpush3.bf16.msra.mxu1 %v4718_v1 }
  0xab   : > { %367 = vadd.xlane.f32.xlu0 %v351_v27  ;;  %v5313_v30 = vsub.f32 %v271_v2, %v320_v26  ;;  %v5315_v31 = vsub.f32 %v273_v3, %v322_v28 }
  0xac   : > { %v295_v32 = vpop.xlane.xlu0 %294  ;;  %v297_v33 = vpop.xlane.xlu1 %296 }
  0xad   : > { %v323_v34 = vmul.f32 0.0078125, %v295_v32  ;;  %v352_v35 = vmul.f32 %v5313_v30, %v5313_v30  ;;  %v324_v36 = vmul.f32 0.0078125, %v297_v33  ;;  %v354_v37 = vmul.f32 %v5315_v31, %v5315_v31  ;;  %v4727_v33 = vld [vmem:[%s6700_s3 + $0x48] ss:$12 sps:$4 sm:$0xff]  }
  0xaf   : > { %371 = vadd.xlane.f32.xlu0 %v353_v29  ;;  %369 = vadd.xlane.f32.xlu1 %v352_v35  ;;  %v5321_v38 = vsub.f32 %v274_v4, %v323_v34  ;;  %v5323_v39 = vsub.f32 %v275_v5, %v324_v36  ;;  %v4719_v5 = vld [vmem:[%s6700_s3 + $0x78] ss:$12 sps:$4 sm:$0xff]   ;;  %v4728_v35 = vld [vmem:[%s6700_s3 + $0x34] ss:$12 sps:$4 sm:$0xff]   ;;  %v4731_v36 = vld [vmem:[%s6700_s3 + $0x30] ss:$12 sps:$4 sm:$0xff]  }
  0xb0   : > { %v299_v40 = vpop.xlane.xlu0 %298  ;;  %v301_v41 = vpop.xlane.xlu1 %300  ;;  %682 = vmatpush1.bf16.msra.mxu0 %v4719_v5 }
  0xb1   : > { %v325_v42 = vmul.f32 0.0078125, %v299_v40  ;;  %v355_v43 = vmul.f32 %v5321_v38, %v5321_v38  ;;  %v326_v44 = vmul.f32 0.0078125, %v301_v41  ;;  %v356_v45 = vmul.f32 %v5323_v39, %v5323_v39  ;;  %v4734_v40 = vld [vmem:[%s6700_s3 + $0x38] ss:$12 sps:$4 sm:$0xff]  }
  0xb2   : > { %v4735_v41 = vld [vmem:[%s6700_s3 + $0x18] ss:$12 sps:$4 sm:$0xff]  }
  0xb3   : > { %373 = vadd.xlane.f32.xlu1 %v354_v37  ;;  %375 = vadd.xlane.f32.xlu0 %v355_v43  ;;  %v5329_v46 = vsub.f32 %v276_v6, %v325_v42  ;;  %v5331_v47 = vsub.f32 %v277_v7, %v326_v44  ;;  %v4732_v37 = vld [vmem:[%s6700_s3 + $0x1c] ss:$12 sps:$4 sm:$0xff]   ;;  %v4736_v42 = vld [vmem:[%s6700_s3 + $0x4] ss:$12 sps:$4 sm:$0xff]   ;;  %v4738_v43 = vld [vmem:[%s6700_s3 + $0x20] ss:$12 sps:$4 sm:$0xff]  }
  0xb4   : > { %v303_v48 = vpop.xlane.xlu0 %302  ;;  %v305_v49 = vpop.xlane.xlu1 %304  ;;  %v4739_v44 = vld [vmem:[%s6700_s3] ss:$12 sps:$4 sm:$0xff]  }
  0xb5   : > { %v327_v50 = vmul.f32 0.0078125, %v303_v48  ;;  %v357_v51 = vmul.f32 %v5329_v46, %v5329_v46  ;;  %v328_v52 = vmul.f32 0.0078125, %v305_v49  ;;  %v358_v56 = vmul.f32 %v5331_v47, %v5331_v47 }
  0xb6   : > { %v5155_v48 = vmov 0  }
  0xb7   : > { %377 = vadd.xlane.f32.xlu1 %v356_v45  ;;  %379 = vadd.xlane.f32.xlu0 %v357_v51  ;;  %v5347_v57 = vsub.f32 %v5268_v8, %v327_v50  ;;  %v5350_v58 = vsub.f32 %v5271_v9, %v328_v52  ;;  %v4740_v45 = vld [vmem:[%s6700_s3 + $0x8] ss:$12 sps:$4 sm:$0xff]  }
  0xb8   : > { %v307_v59 = vpop.xlane.xlu0 %306  ;;  %v309_v60 = vpop.xlane.xlu1 %308  ;;  %709 = vmatprep.mubr.bf16.mxu0 %v5155_v48 }
  0xb9   : > { %v329_v61 = vmul.f32 0.0078125, %v307_v59  ;;  %v359_v62 = vmul.f32 %v5347_v57, %v5347_v57  ;;  %v330_v63 = vmul.f32 0.0078125, %v309_v60  ;;  %v360_v2 = vmul.f32 %v5350_v58, %v5350_v58 }
  0xbb   : > { %381 = vadd.xlane.f32.xlu1 %v358_v56  ;;  %383 = vadd.xlane.f32.xlu0 %v359_v62  ;;  %v5363_v3 = vsub.f32 %v5276_v10, %v329_v61  ;;  %v5366_v4 = vsub.f32 %v5279_v11, %v330_v63  ;;  %v4720_v10 = vld [vmem:[%s6700_s3 + $0x64] ss:$12 sps:$4 sm:$0xff]   ;;  %v4722_v11 = vld [vmem:[%s6700_s3 + $0x80] ss:$12 sps:$4 sm:$0xff]  }
  0xbc   : > { %v311_v6 = vpop.xlane.xlu0 %310  ;;  %v313_v7 = vpop.xlane.xlu1 %312  ;;  %683 = vmatprep.subr.bf16.mxu0 %v4720_v10  ;;  %4252 = vmatprep.subr.bf16.mxu1 %v4722_v11 }
  0xbd   : > { %v331_v8 = vmul.f32 0.0078125, %v311_v6  ;;  %v361_v9 = vmul.f32 %v5363_v3, %v5363_v3  ;;  %v332_v16 = vmul.f32 0.0078125, %v313_v7  ;;  %v362_v17 = vmul.f32 %v5366_v4, %v5366_v4  ;;  %684 = vmatpush1.bf16.msra.mxu0 %v4723_v20  ;;  %4253 = vmatpush3.bf16.msra.mxu1 %v4722_v11 }
  0xbf   : > { %385 = vadd.xlane.f32.xlu1 %v360_v2  ;;  %387 = vadd.xlane.f32.xlu0 %v361_v9  ;;  %v5382_v18 = vsub.f32 %v5284_v12, %v331_v8  ;;  %v5385_v19 = vsub.f32 %v5287_v13, %v332_v16  ;;  %v4724_v12 = vld [vmem:[%s6700_s3 + $0x4c] ss:$12 sps:$4 sm:$0xff]   ;;  %v4726_v13 = vld [vmem:[%s6700_s3 + $0x68] ss:$12 sps:$4 sm:$0xff]  }
  0xc0   : > { %v315_v21 = vpop.xlane.xlu0 %314  ;;  %v317_v24 = vpop.xlane.xlu1 %316  ;;  %685 = vmatprep.subr.bf16.mxu0 %v4724_v12  ;;  %4254 = vmatprep.subr.bf16.mxu1 %v4726_v13 }
  0xc1   : > { %v333_v25 = vmul.f32 0.0078125, %v315_v21  ;;  %v363_v26 = vmul.f32 %v5382_v18, %v5382_v18  ;;  %v334_v27 = vmul.f32 0.0078125, %v317_v24  ;;  %v364_v28 = vmul.f32 %v5385_v19, %v5385_v19  ;;  %686 = vmatpush1.bf16.msra.mxu0 %v4727_v33  ;;  %4255 = vmatpush3.bf16.msra.mxu1 %v4726_v13 }
  0xc2   : > { %687 = vmatprep.subr.bf16.mxu0 %v4728_v35 }
  0xc3   : > { %389 = vadd.xlane.f32.xlu1 %v362_v17  ;;  %391 = vadd.xlane.f32.xlu0 %v363_v26  ;;  %v5401_v29 = vsub.f32 %v5292_v14, %v333_v25  ;;  %v5404_v32 = vsub.f32 %v5295_v15, %v334_v27  ;;  %v4730_v14 = vld [vmem:[%s6700_s3 + $0x50] ss:$12 sps:$4 sm:$0xff]   ;;  %v5448_v26 = vld [vmem:[%s6698_s1] ss:$0 sm:$0xff] }
  0xc4   : > { %4256 = vmatprep.subr.bf16.mxu1 %v4730_v14 }
  0xc5   : > { %v365_v34 = vmul.f32 %v5401_v29, %v5401_v29  ;;  %v366_v15 = vmul.f32 %v5404_v32, %v5404_v32  ;;  %688 = vmatpush1.bf16.msra.mxu0 %v4731_v36  ;;  %4257 = vmatpush3.bf16.msra.mxu1 %v4730_v14 }
  0xc6   : > { %689 = vmatprep.subr.bf16.mxu0 %v4732_v37  ;;  %4258 = vmatprep.subr.bf16.mxu1 %v4734_v40 }
  0xc7   : > { %393 = vadd.xlane.f32.xlu1 %v364_v28  ;;  %395 = vadd.xlane.f32.xlu0 %v365_v34 }
  0xc9   : > { %690 = vmatpush1.bf16.msra.mxu0 %v4735_v41  ;;  %4259 = vmatpush3.bf16.msra.mxu1 %v4734_v40 }
  0xca   : > { %691 = vmatprep.subr.bf16.mxu0 %v4736_v42  ;;  %4260 = vmatprep.subr.bf16.mxu1 %v4738_v43 }
  0xcb   : > { %397 = vadd.xlane.f32.xlu1 %v366_v15 }
  0xcd   : > { %692 = vmatpush1.bf16.msra.mxu0 %v4739_v44  ;;  %4261 = vmatpush3.bf16.msra.mxu1 %v4738_v43 }
  0xce   : > { %4262 = vmatprep.subr.bf16.mxu1 %v4740_v45 }
  0xd1   : > { %4263 = vmatpush3.bf16.msra.mxu1 %v4740_v45 }
 0x134   : > { %v368_v49 = vpop.xlane.xlu0 %367 }
 0x135   : > { %v399_v50 = vmul.f32 0.0078125, %v368_v49 }
 0x137   : > { %v415_v51 = vadd.f32 1e-05, %v399_v50 }
 0x138   : > { %v370_v52 = vpop.xlane.xlu1 %369  ;;  %v372_v53 = vpop.xlane.xlu0 %371 }
 0x139   : > { %4773 = vrsqrt.f32 %v415_v51  ;;  %v400_v54 = vmul.f32 0.0078125, %v370_v52  ;;  %v401_v55 = vmul.f32 0.0078125, %v372_v53 }
 0x13b   : > { %v416_v56 = vadd.f32 1e-05, %v400_v54  ;;  %v417_v59 = vadd.f32 1e-05, %v401_v55 }
 0x13c   : > { %v374_v60 = vpop.xlane.xlu1 %373  ;;  %v376_v61 = vpop.xlane.xlu0 %375 }
 0x13d   : > { %4775 = vrsqrt.f32 %v416_v56  ;;  %v402_v62 = vmul.f32 0.0078125, %v374_v60  ;;  %v403_v63 = vmul.f32 0.0078125, %v376_v61 }
 0x13e   : > { %4777 = vrsqrt.f32 %v417_v59 }
 0x13f   : > { %v418_v0 = vadd.f32 1e-05, %v402_v62  ;;  %v419_v1 = vadd.f32 1e-05, %v403_v63 }
 0x140   : > { %v378_v2 = vpop.xlane.xlu1 %377  ;;  %v380_v5 = vpop.xlane.xlu0 %379 }
 0x141   : > { %4779 = vrsqrt.f32 %v418_v0  ;;  %v404_v6 = vmul.f32 0.0078125, %v378_v2  ;;  %v405_v7 = vmul.f32 0.0078125, %v380_v5 }
 0x142   : > { %4781 = vrsqrt.f32 %v419_v1 }
 0x143   : > { %v420_v8 = vadd.f32 1e-05, %v404_v6  ;;  %v421_v9 = vadd.f32 1e-05, %v405_v7 }
 0x144   : > { %v382_v16 = vpop.xlane.xlu1 %381  ;;  %v384_v10 = vpop.xlane.xlu0 %383 }
 0x145   : > { %4783 = vrsqrt.f32 %v420_v8  ;;  %v406_v11 = vmul.f32 0.0078125, %v382_v16  ;;  %v407_v17 = vmul.f32 0.0078125, %v384_v10 }
 0x146   : > { %v4774_v20 = vpop.eup %4773  ;;  %4785 = vrsqrt.f32 %v421_v9 }
 0x147   : > { %v422_v21 = vadd.f32 1e-05, %v406_v11  ;;  %v423_v24 = vadd.f32 1e-05, %v407_v17  ;;  %v447_v25 = vmul.f32 %v4774_v20, %v5305_v22  ;;  %v5455_v22 = vld [vmem:[%s6699_s2] ss:$0 sm:$0xff] }
 0x148   : > { %v386_v27 = vpop.xlane.xlu1 %385  ;;  %v388_v12 = vpop.xlane.xlu0 %387 }
 0x149   : > { %4787 = vrsqrt.f32 %v422_v21  ;;  %v408_v13 = vmul.f32 0.0078125, %v386_v27  ;;  %v409_v28 = vmul.f32 0.0078125, %v388_v12  ;;  %v470_v34 = vmul.f32 %v5448_v26, %v447_v25 }
 0x14a   : > { %v4776_v33 = vpop.eup %4775  ;;  %4789 = vrsqrt.f32 %v423_v24 }
 0x14b   : > { %v4778_v35 = vpop.eup %4777  ;;  %v424_v14 = vadd.f32 1e-05, %v408_v13  ;;  %v425_v15 = vadd.f32 1e-05, %v409_v28  ;;  %v448_v36 = vmul.f32 %v4776_v33, %v5313_v30  ;;  %v493_v49 = vadd.f32 %v5455_v22, %v470_v34 }
 0x14c   : > { %v390_v37 = vpop.xlane.xlu1 %389  ;;  %v392_v40 = vpop.xlane.xlu0 %391  ;;  %v449_v41 = vmul.f32 %v4778_v35, %v5307_v23 }
 0x14d   : > { %4791 = vrsqrt.f32 %v424_v14  ;;  %v410_v42 = vmul.f32 0.0078125, %v390_v37  ;;  %v411_v43 = vmul.f32 0.0078125, %v392_v40  ;;  %v471_v44 = vmul.f32 %v5448_v26, %v448_v36 }
 0x14e   : > { %v4780_v45 = vpop.eup %4779  ;;  %4793 = vrsqrt.f32 %v425_v15  ;;  %v472_v23 = vmul.f32 %v5448_v26, %v449_v41 }
 0x14f   : > { %v4782_v50 = vpop.eup %4781  ;;  %v426_v30 = vadd.f32 1e-05, %v410_v42  ;;  %v427_v51 = vadd.f32 1e-05, %v411_v43  ;;  %v494_v52 = vadd.f32 %v5455_v22, %v471_v44  ;;  %v450_v53 = vmul.f32 %v4780_v45, %v5315_v31 }
 0x150   : > { %v394_v54 = vpop.xlane.xlu1 %393  ;;  %v396_v55 = vpop.xlane.xlu0 %395  ;;  %v451_v56 = vmul.f32 %v4782_v50, %v5321_v38  ;;  %v495_v38 = vadd.f32 %v5455_v22, %v472_v23 }
 0x151   : > { %4795 = vrsqrt.f32 %v426_v30  ;;  %v412_v59 = vmul.f32 0.0078125, %v394_v54  ;;  %v413_v60 = vmul.f32 0.0078125, %v396_v55  ;;  %v509_v61 = vpack.c.bf16 %v494_v52, %v493_v49 }
 0x152   : > { %v4784_v62 = vpop.eup %4783  ;;  %4797 = vrsqrt.f32 %v427_v51  ;;  %v473_v63 = vmul.f32 %v5448_v26, %v450_v53  ;;  %v474_v5 = vmul.f32 %v5448_v26, %v451_v56 }
 0x153   : > { %v4786_v0 = vpop.eup %4785  ;;  %v428_v1 = vadd.f32 1e-05, %v412_v59  ;;  %v429_v2 = vadd.f32 1e-05, %v413_v60  ;;  %710 = vmatmul.mubr.bf16.vlgmr.msra.gmra.mxu0 %v509_v61  ;;  %4264 = vmatprep.mubr.bf16.mxu1 %v509_v61  ;;  %v452_v31 = vmul.f32 %v4784_v62, %v5323_v39 }
 0x154   : > { %v398_v6 = vpop.xlane.xlu1 %397  ;;  %v496_v7 = vadd.f32 %v5455_v22, %v473_v63  ;;  %719 = vmatprep.mubr.bf16.mxu0 %v5155_v48  ;;  %v453_v8 = vmul.f32 %v4786_v0, %v5329_v46  ;;  %v497_v21 = vadd.f32 %v5455_v22, %v474_v5 }
 0x155   : > { %4799 = vrsqrt.f32 %v428_v1  ;;  %v414_v9 = vmul.f32 0.0078125, %v398_v6  ;;  %v475_v16 = vmul.f32 %v5448_v26, %v452_v31 }
 0x156   : > { %v4788_v10 = vpop.eup %4787  ;;  %4801 = vrsqrt.f32 %v429_v2  ;;  %v510_v11 = vpack.c.bf16 %v496_v7, %v495_v38  ;;  %v476_v39 = vmul.f32 %v5448_v26, %v453_v8 }
 0x157   : > { %v4790_v17 = vpop.eup %4789  ;;  %v430_v20 = vadd.f32 1e-05, %v414_v9  ;;  %v498_v24 = vadd.f32 %v5455_v22, %v475_v16  ;;  %v454_v25 = vmul.f32 %v4788_v10, %v5331_v47 }
 0x158   : > { %4265 = vmatmul.mubr.bf16.vlgmr.msra.gmra.mxu1 %v510_v11  ;;  %v455_v46 = vmul.f32 %v4790_v17, %v5347_v57  ;;  %v499_v28 = vadd.f32 %v5455_v22, %v476_v39 }
 0x159   : > { %4803 = vrsqrt.f32 %v430_v20  ;;  %v511_v27 = vpack.c.bf16 %v498_v24, %v497_v21  ;;  %v477_v12 = vmul.f32 %v5448_v26, %v454_v25 }
 0x15a   : > { %v4792_v13 = vpop.eup %4791  ;;  %v478_v14 = vmul.f32 %v5448_v26, %v455_v46 }
 0x15b   : > { %v4794_v33 = vpop.eup %4793  ;;  %720 = vmatmul.mubr.bf16.gmra.mxu0 %v510_v11  ;;  %4268 = vmatprep.mubr.bf16.mxu1 %v511_v27  ;;  %v500_v34 = vadd.f32 %v5455_v22, %v477_v12  ;;  %v456_v35 = vmul.f32 %v4792_v13, %v5350_v58 }
 0x15c   : > { %729 = vmatprep.mubr.bf16.mxu0 %v5155_v48  ;;  %v457_v47 = vmul.f32 %v4794_v33, %v5363_v3  ;;  %v501_v41 = vadd.f32 %v5455_v22, %v478_v14 }
 0x15d   : > { %v512_v57 = vpack.c.bf16 %v500_v34, %v499_v28  ;;  %v479_v15 = vmul.f32 %v5448_v26, %v456_v35 }
 0x15e   : > { %v4796_v36 = vpop.eup %4795  ;;  %v480_v37 = vmul.f32 %v5448_v26, %v457_v47 }
 0x15f   : > { %v4798_v40 = vpop.eup %4797  ;;  %v502_v42 = vadd.f32 %v5455_v22, %v479_v15  ;;  %v458_v43 = vmul.f32 %v4796_v36, %v5366_v4 }
 0x160   : > { %4269 = vmatmul.mubr.bf16.gmra.mxu1 %v512_v57  ;;  %v459_v58 = vmul.f32 %v4798_v40, %v5382_v18  ;;  %v503_v49 = vadd.f32 %v5455_v22, %v480_v37 }
 0x161   : > { %v513_v44 = vpack.c.bf16 %v502_v42, %v501_v41  ;;  %v481_v45 = vmul.f32 %v5448_v26, %v458_v43 }
 0x162   : > { %v4800_v3 = vpop.eup %4799  ;;  %v482_v52 = vmul.f32 %v5448_v26, %v459_v58 }
 0x163   : > { %v4802_v50 = vpop.eup %4801  ;;  %730 = vmatmul.mubr.bf16.gmra.mxu0 %v511_v27  ;;  %4272 = vmatprep.mubr.bf16.mxu1 %v513_v44  ;;  %v504_v30 = vadd.f32 %v5455_v22, %v481_v45  ;;  %v460_v51 = vmul.f32 %v4800_v3, %v5385_v19 }
 0x164   : > { %739 = vmatprep.mubr.bf16.mxu0 %v5155_v48  ;;  %v461_v4 = vmul.f32 %v4802_v50, %v5401_v29  ;;  %v505_v55 = vadd.f32 %v5455_v22, %v482_v52 }
 0x165   : > { %v514_v18 = vpack.c.bf16 %v504_v30, %v503_v49  ;;  %v483_v53 = vmul.f32 %v5448_v26, %v460_v51 }
 0x166   : > { %v4804_v54 = vpop.eup %4803  ;;  %v484_v59 = vmul.f32 %v5448_v26, %v461_v4 }
 0x167   : > { %v506_v23 = vadd.f32 %v5455_v22, %v483_v53  ;;  %v462_v56 = vmul.f32 %v4804_v54, %v5404_v32 }
 0x168   : > { %4273 = vmatmul.mubr.bf16.gmra.mxu1 %v514_v18  ;;  %v507_v29 = vadd.f32 %v5455_v22, %v484_v59 }
 0x169   : > { %v515_v19 = vpack.c.bf16 %v506_v23, %v505_v55  ;;  %v485_v60 = vmul.f32 %v5448_v26, %v462_v56 }
 0x16b   : > { %740 = vmatmul.mubr.bf16.gmra.mxu0 %v512_v57  ;;  %4276 = vmatprep.mubr.bf16.mxu1 %v515_v19  ;;  %v508_v61 = vadd.f32 %v5455_v22, %v485_v60 }
 0x16c   : > { %749 = vmatprep.mubr.bf16.mxu0 %v5155_v48 }
 0x16d   : > { %v516_v62 = vpack.c.bf16 %v508_v61, %v507_v29 }
 0x170   : > { %4277 = vmatmul.mubr.bf16.gmra.mxu1 %v516_v62 }
 0x173   : > { %750 = vmatmul.mubr.bf16.gmra.mxu0 %v513_v44 }
 0x174   : > { %759 = vmatprep.mubr.bf16.mxu0 %v5155_v48 }
 0x17b   : > { %760 = vmatmul.mubr.bf16.gmra.mxu0 %v514_v18 }
 0x17c   : > { %769 = vmatprep.mubr.bf16.mxu0 %v5155_v48 }
 0x183   : > { %770 = vmatmul.mubr.bf16.gmra.mxu0 %v515_v19 }
 0x184   : > { %779 = vmatprep.mubr.bf16.mxu0 %v5155_v48 }
 0x18b   : > { %780 = vmatmul.mubr.bf16.gmra.mxu0 %v516_v62 }
 0x213   : > { %v711_v32 = vpop.f32.mrf.mxu0 }
 0x215   : > { %v713_v26 = vpop.f32.mrf.mxu0 }
 0x216   : > { %v4031_v63 = vpack.c.bf16 %v713_v26, %v711_v32 }
 0x217   : > { %v715_v0 = vpop.f32.mrf.mxu0 }
 0x218   : > { %1047 = vst [vmem:[#allocation2] sm:$0xff] %v4031_v63  ;;  %v4266_v22 = vpop.f32.mrf.mxu1 }
 0x219   : > { %v4036_v1 = vpack.c.bf16 %v4266_v22, %v4266_v22  ;;  %v717_v2 = vpop.f32.mrf.mxu0 }
 0x21a   : > { %v4033_v31 = vpack.c.bf16 %v717_v2, %v715_v0  ;;  %v824_v5 = vpop.f32.mrf.mxu1 }
 0x21b   : > { %1052 = vst [vmem:[#allocation2 + $0x20] sm:$0xf] %v4036_v1  ;;  %v4032_v6 = vpack.c.bf16 %v824_v5, %v824_v5  ;;  %v721_v38 = vpop.f32.mrf.mxu0 }
 0x21c   : > { %1049 = vst [vmem:[#allocation2 + $0xc] sm:$0xff] %v4033_v31  ;;  %v4267_v7 = vpop.f32.mrf.mxu1 }
 0x21d   : > { %1048 = vst [vmem:[#allocation2 + $0x8] sm:$0xf] %v4032_v6  ;;  %v4038_v8 = vpack.c.bf16 %v4267_v7, %v4267_v7  ;;  %v723_v9 = vpop.f32.mrf.mxu0 }
 0x21e   : > { %v4035_v48 = vpack.c.bf16 %v723_v9, %v721_v38  ;;  %v827_v16 = vpop.f32.mrf.mxu1 }
 0x21f   : > { %1054 = vst [vmem:[#allocation2 + $0x2c] sm:$0xf] %v4038_v8  ;;  %v4034_v10 = vpack.c.bf16 %v827_v16, %v827_v16  ;;  %v725_v11 = vpop.f32.mrf.mxu0 }
 0x220   : > { %1051 = vst [vmem:[#allocation2 + $0x18] sm:$0xff] %v4035_v48  ;;  %v4270_v39 = vpop.f32.mrf.mxu1 }
 0x221   : > { %1050 = vst [vmem:[#allocation2 + $0x14] sm:$0xf] %v4034_v10  ;;  %v4044_v17 = vpack.c.bf16 %v4270_v39, %v4270_v39  ;;  %v727_v20 = vpop.f32.mrf.mxu0 }
 0x222   : > { %v4037_v21 = vpack.c.bf16 %v727_v20, %v725_v11  ;;  %v840_v24 = vpop.f32.mrf.mxu1 }
 0x223   : > { %1060 = vst [vmem:[#allocation2 + $0x50] sm:$0xf] %v4044_v17  ;;  %v4040_v25 = vpack.c.bf16 %v840_v24, %v840_v24  ;;  %v731_v46 = vpop.f32.mrf.mxu0  ;;  %v5509_v27 = vld [vmem:[#allocation2] ss:$12 sps:$4 sm:$0xff]  }
 0x224   : > { %1053 = vst [vmem:[#allocation2 + $0x24] sm:$0xff] %v4037_v21  ;;  %v4271_v12 = vpop.f32.mrf.mxu1  ;;  %4296 = vmatprep.mubr.msk.bf16.mxu0 %vm1213_vm0, %v5509_v27 }
 0x225   : > { %1056 = vst [vmem:[#allocation2 + $0x38] sm:$0xf] %v4040_v25  ;;  %v4046_v13 = vpack.c.bf16 %v4271_v12, %v4271_v12  ;;  %v733_v28 = vpop.f32.mrf.mxu0 }
 0x226   : > { %v4039_v33 = vpack.c.bf16 %v733_v28, %v731_v46  ;;  %v843_v34 = vpop.f32.mrf.mxu1  ;;  %v5542_v12 = vld [vmem:[#allocation2 + $0x20] ss:$12 sps:$4 sm:$0xff]  }
 0x227   : > { %1062 = vst [vmem:[#allocation2 + $0x5c] sm:$0xf] %v4046_v13  ;;  %v4042_v35 = vpack.c.bf16 %v843_v34, %v843_v34  ;;  %v735_v14 = vpop.f32.mrf.mxu0 }
 0x228   : > { %1055 = vst [vmem:[#allocation2 + $0x30] sm:$0xff] %v4039_v33  ;;  %v4274_v47 = vpop.f32.mrf.mxu1  ;;  %v5548_v13 = vld [vmem:[#allocation2 + $0x8] ss:$12 sps:$4 sm:$0xff]  }
 0x229   : > { %1058 = vst [vmem:[#allocation2 + $0x44] sm:$0xf] %v4042_v35  ;;  %v4052_v57 = vpack.c.bf16 %v4274_v47, %v4274_v47  ;;  %v737_v15 = vpop.f32.mrf.mxu0 }
 0x22a   : > { %v4041_v36 = vpack.c.bf16 %v737_v15, %v735_v14  ;;  %v856_v37 = vpop.f32.mrf.mxu1 }
 0x22b   : > { %1068 = vst [vmem:[#allocation2 + $0x80] sm:$0xf] %v4052_v57  ;;  %v4048_v40 = vpack.c.bf16 %v856_v37, %v856_v37  ;;  %v741_v41 = vpop.f32.mrf.mxu0 }
 0x22c   : > { %1057 = vst [vmem:[#allocation2 + $0x3c] sm:$0xff] %v4041_v36  ;;  %v4275_v42 = vpop.f32.mrf.mxu1 }
 0x22d   : > { %1064 = vst [vmem:[#allocation2 + $0x68] sm:$0xf] %v4048_v40  ;;  %v4054_v43 = vpack.c.bf16 %v4275_v42, %v4275_v42  ;;  %v743_v58 = vpop.f32.mrf.mxu0  ;;  %v5587_v40 = vld [vmem:[#allocation2 + $0x1c] ss:$12 sps:$4 sm:$0xff]   ;;  %v5593_v42 = vld [vmem:[#allocation2 + $0x4] ss:$12 sps:$4 sm:$0xff]  }
 0x22e   : > { %v4043_v44 = vpack.c.bf16 %v743_v58, %v741_v41  ;;  %v859_v45 = vpop.f32.mrf.mxu1  ;;  %v5530_v11 = vld [vmem:[#allocation2 + $0x50] ss:$12 sps:$4 sm:$0xff]   ;;  %v1242_v41 = vsel %vm1213_vm0, %v5587_v40, 0  ;;  %v5599_v58 = vld [vmem:[#allocation2 + $0x18] ss:$12 sps:$4 sm:$0xff]  }
 0x22f   : > { %1070 = vst [vmem:[#allocation2 + $0x8c] sm:$0xf] %v4054_v43  ;;  %v4050_v3 = vpack.c.bf16 %v859_v45, %v859_v45  ;;  %v745_v49 = vpop.f32.mrf.mxu0  ;;  %v1239_v43 = vsel %vm1213_vm0, %v5593_v42, 0 }
 0x230   : > { %1059 = vst [vmem:[#allocation2 + $0x48] sm:$0xff] %v4043_v44  ;;  %v4278_v50 = vpop.f32.mrf.mxu1  ;;  %v5536_v21 = vld [vmem:[#allocation2 + $0x38] ss:$12 sps:$4 sm:$0xff]  }
 0x231   : > { %1066 = vst [vmem:[#allocation2 + $0x74] sm:$0xf] %v4050_v3  ;;  %v4060_v30 = vpack.c.bf16 %v4278_v50, %v4278_v50  ;;  %v747_v51 = vpop.f32.mrf.mxu0 }
 0x232   : > { %v4045_v52 = vpack.c.bf16 %v747_v51, %v745_v49  ;;  %v872_v4 = vpop.f32.mrf.mxu1 }
 0x233   : > { %1076 = vst [vmem:[#allocation2 + $0xb0] sm:$0xf] %v4060_v30  ;;  %v4056_v18 = vpack.c.bf16 %v872_v4, %v872_v4  ;;  %v751_v53 = vpop.f32.mrf.mxu0  ;;  %v5581_v36 = vld [vmem:[#allocation2 + $0x34] ss:$12 sps:$4 sm:$0xff]   ;;  %v5601_v44 = vld [vmem:[#allocation2 + $0x30] ss:$12 sps:$4 sm:$0xff]  }
 0x234   : > { %1061 = vst [vmem:[#allocation2 + $0x54] sm:$0xff] %v4045_v52  ;;  %v4279_v54 = vpop.f32.mrf.mxu1  ;;  %v1245_v37 = vsel %vm1213_vm0, %v5581_v36, 0 }
 0x235   : > { %1072 = vst [vmem:[#allocation2 + $0x98] sm:$0xf] %v4056_v18  ;;  %v4062_v55 = vpack.c.bf16 %v4279_v54, %v4279_v54  ;;  %v753_v23 = vpop.f32.mrf.mxu0 }
 0x236   : > { %v4047_v56 = vpack.c.bf16 %v753_v23, %v751_v53  ;;  %v875_v59 = vpop.f32.mrf.mxu1  ;;  %v5520_v5 = vld [vmem:[#allocation2 + $0x80] ss:$12 sps:$4 sm:$0xff]  }
 0x237   : > { %1078 = vst [vmem:[#allocation2 + $0xbc] sm:$0xf] %v4062_v55  ;;  %v4058_v19 = vpack.c.bf16 %v875_v59, %v875_v59  ;;  %v755_v60 = vpop.f32.mrf.mxu0 }
 0x238   : > { %1063 = vst [vmem:[#allocation2 + $0x60] sm:$0xff] %v4047_v56  ;;  %v5524_v8 = vld [vmem:[#allocation2 + $0x68] ss:$12 sps:$4 sm:$0xff]  }
 0x239   : > { %1074 = vst [vmem:[#allocation2 + $0xa4] sm:$0xf] %v4058_v19  ;;  %v757_v29 = vpop.f32.mrf.mxu0 }
 0x23a   : > { %v4049_v61 = vpack.c.bf16 %v757_v29, %v755_v60 }
 0x23b   : > { %v761_v62 = vpop.f32.mrf.mxu0  ;;  %v5575_v57 = vld [vmem:[#allocation2 + $0x4c] ss:$12 sps:$4 sm:$0xff]   ;;  %v5607_v45 = vld [vmem:[#allocation2 + $0x48] ss:$12 sps:$4 sm:$0xff]  }
 0x23c   : > { %1065 = vst [vmem:[#allocation2 + $0x6c] sm:$0xff] %v4049_v61  ;;  %v1248_v15 = vsel %vm1213_vm0, %v5575_v57, 0 }
 0x23d   : > { %v763_v32 = vpop.f32.mrf.mxu0 }
 0x23e   : > { %v4051_v26 = vpack.c.bf16 %v763_v32, %v761_v62  ;;  %v5513_v63 = vld [vmem:[#allocation2 + $0xb0] ss:$12 sps:$4 sm:$0xff]  }
 0x23f   : > { %v765_v0 = vpop.f32.mrf.mxu0  ;;  %4312 = vmatprep.subr.bf16.mxu1 %v5513_v63 }
 0x240   : > { %1067 = vst [vmem:[#allocation2 + $0x78] sm:$0xff] %v4051_v26  ;;  %v5516_v22 = vld [vmem:[#allocation2 + $0x98] ss:$12 sps:$4 sm:$0xff]   ;;  %4313 = vmatpush3.bf16.msra.mxu1 %v5513_v63 }
 0x241   : > { %v767_v1 = vpop.f32.mrf.mxu0  ;;  %4314 = vmatprep.subr.bf16.mxu1 %v5516_v22 }
 0x242   : > { %v4053_v2 = vpack.c.bf16 %v767_v1, %v765_v0 }
 0x243   : > { %v771_v31 = vpop.f32.mrf.mxu0  ;;  %v5569_v14 = vld [vmem:[#allocation2 + $0x64] ss:$12 sps:$4 sm:$0xff]   ;;  %v5609_v3 = vld [vmem:[#allocation2 + $0x60] ss:$12 sps:$4 sm:$0xff]  }
 0x244   : > { %1069 = vst [vmem:[#allocation2 + $0x84] sm:$0xff] %v4053_v2  ;;  %4315 = vmatpush3.bf16.msra.mxu1 %v5516_v22  ;;  %v1251_v47 = vsel %vm1213_vm0, %v5569_v14, 0 }
 0x245   : > { %v773_v6 = vpop.f32.mrf.mxu0  ;;  %4316 = vmatprep.subr.bf16.mxu1 %v5520_v5 }
 0x246   : > { %v4055_v38 = vpack.c.bf16 %v773_v6, %v771_v31 }
 0x247   : > { %v775_v7 = vpop.f32.mrf.mxu0 }
 0x248   : > { %1071 = vst [vmem:[#allocation2 + $0x90] sm:$0xff] %v4055_v38  ;;  %4317 = vmatpush3.bf16.msra.mxu1 %v5520_v5 }
 0x249   : > { %v777_v9 = vpop.f32.mrf.mxu0  ;;  %4318 = vmatprep.subr.bf16.mxu1 %v5524_v8 }
 0x24a   : > { %v4057_v48 = vpack.c.bf16 %v777_v9, %v775_v7 }
 0x24b   : > { %v781_v16 = vpop.f32.mrf.mxu0  ;;  %v5528_v10 = vld [vmem:[#allocation2 + $0x7c] ss:$12 sps:$4 sm:$0xff]   ;;  %v5615_v49 = vld [vmem:[#allocation2 + $0x78] ss:$12 sps:$4 sm:$0xff]  }
 0x24c   : > { %1073 = vst [vmem:[#allocation2 + $0x9c] sm:$0xff] %v4057_v48  ;;  %4319 = vmatpush3.bf16.msra.mxu1 %v5524_v8  ;;  %1710 = vrot.lane.b32.xlu0 %v5528_v10, %s5156_s16  ;;  %v1254_v35 = vsel %vm1213_vm0, %v5528_v10, 0 }
 0x24d   : > { %v783_v39 = vpop.f32.mrf.mxu0  ;;  %4320 = vmatprep.subr.bf16.mxu1 %v5530_v11 }
 0x24e   : > { %v4059_v17 = vpack.c.bf16 %v783_v39, %v781_v16 }
 0x24f   : > { %v785_v20 = vpop.f32.mrf.mxu0 }
 0x250   : > { %1075 = vst [vmem:[#allocation2 + $0xa8] sm:$0xff] %v4059_v17  ;;  %4321 = vmatpush3.bf16.msra.mxu1 %v5530_v11 }
 0x251   : > { %v787_v24 = vpop.f32.mrf.mxu0  ;;  %4322 = vmatprep.subr.bf16.mxu1 %v5536_v21 }
 0x252   : > { %v4061_v25 = vpack.c.bf16 %v787_v24, %v785_v20 }
 0x253   : > { %v5540_v46 = vld [vmem:[#allocation2 + $0x94] ss:$12 sps:$4 sm:$0xff]   ;;  %v5617_v50 = vld [vmem:[#allocation2 + $0x90] ss:$12 sps:$4 sm:$0xff]  }
 0x254   : > { %1077 = vst [vmem:[#allocation2 + $0xb4] sm:$0xff] %v4061_v25  ;;  %4323 = vmatpush3.bf16.msra.mxu1 %v5536_v21  ;;  %1712 = vrot.lane.b32.xlu1 %v5540_v46, %s5156_s16  ;;  %v1257_v34 = vsel %vm1213_vm0, %v5540_v46, 0 }
 0x255   : > { %4324 = vmatprep.subr.bf16.mxu1 %v5542_v12 }
 0x258   : > { %4325 = vmatpush3.bf16.msra.mxu1 %v5542_v12 }
 0x259   : > { %4326 = vmatprep.subr.bf16.mxu1 %v5548_v13 }
 0x25b   : > { %v5552_v28 = vld [vmem:[#allocation2 + $0xac] ss:$12 sps:$4 sm:$0xff]   ;;  %v5623_v30 = vld [vmem:[#allocation2 + $0xa8] ss:$12 sps:$4 sm:$0xff]  }
 0x25c   : > { %4327 = vmatpush3.bf16.msra.mxu1 %v5548_v13  ;;  %1714 = vrot.lane.b32.xlu0 %v5552_v28, %s5156_s16  ;;  %v1260_v33 = vsel %vm1213_vm0, %v5552_v28, 0 }
 0x25d   : > { %4616 = vmatprep.subr.msk.bf16.mxu0 %vm1213_vm0, %v5552_v28 }
 0x25e   : > { %4281 = vmatpush3.bf16.xpose.msra.mxu0 %v1260_v33 }
 0x25f   : > { %4617 = vmatprep.subr.msk.bf16.mxu0 %vm1213_vm0, %v5540_v46 }
 0x266   : > { %4283 = vmatpush3.bf16.xpose.msra.mxu0 %v1257_v34 }
 0x267   : > { %4618 = vmatprep.subr.msk.bf16.mxu0 %vm1213_vm0, %v5528_v10 }
 0x26e   : > { %4285 = vmatpush3.bf16.xpose.msra.mxu0 %v1254_v35 }
 0x26f   : > { %4619 = vmatprep.subr.msk.bf16.mxu0 %vm1213_vm0, %v5569_v14 }
 0x276   : > { %4287 = vmatpush3.bf16.xpose.msra.mxu0 %v1251_v47 }
 0x277   : > { %4620 = vmatprep.subr.msk.bf16.mxu0 %vm1213_vm0, %v5575_v57 }
 0x27e   : > { %4289 = vmatpush3.bf16.xpose.msra.mxu0 %v1248_v15 }
 0x27f   : > { %4621 = vmatprep.subr.msk.bf16.mxu0 %vm1213_vm0, %v5581_v36 }
 0x286   : > { %4291 = vmatpush3.bf16.xpose.msra.mxu0 %v1245_v37 }
 0x287   : > { %4622 = vmatprep.subr.msk.bf16.mxu0 %vm1213_vm0, %v5587_v40 }
 0x28e   : > { %4293 = vmatpush3.bf16.xpose.msra.mxu0 %v1242_v41 }
 0x28f   : > { %4623 = vmatprep.subr.msk.bf16.mxu0 %vm1213_vm0, %v5593_v42 }
 0x296   : > { %4295 = vmatpush3.bf16.xpose.msra.mxu0 %v1239_v43 }
 0x29d   : > { %4297 = vmatmul.mubr.msk.bf16.vlgmr.msra.gmra.mxu0 %vm1213_vm0, %v5599_v58 }
 0x29e   : > { %4300 = vmatprep.mubr.msk.bf16.mxu0 %vm1213_vm0, %v5601_v44 }
 0x2a5   : > { %4301 = vmatmul.mubr.msk.bf16.gmra.mxu0 %vm1213_vm0, %v5607_v45 }
 0x2a6   : > { %4304 = vmatprep.mubr.msk.bf16.mxu0 %vm1213_vm0, %v5609_v3 }
 0x2ad   : > { %4305 = vmatmul.mubr.msk.bf16.gmra.mxu0 %vm1213_vm0, %v5615_v49 }
 0x2ae   : > { %4308 = vmatprep.mubr.msk.bf16.mxu0 %vm1213_vm0, %v5617_v50 }
 0x2b5   : > { %4309 = vmatmul.mubr.msk.bf16.gmra.mxu0 %vm1213_vm0, %v5623_v30 }
 0x2be   : > { %v5627_v51 = vpop.permute.xlu0 %1710 }
 0x2ce   : > { %v5629_v52 = vpop.permute.xlu0 %1714 }
 0x2cf   : > { %4624 = vmatprep.subr.msk.bf16.mxu1 %vm1213_vm0, %v5629_v52 }
 0x35d   : > { %v5633_v4 = vpop.f32.mrf.mxu0 }
 0x35e   : > { %1363 = vmax.xlane.f32.xlu0 %v5633_v4 }
 0x35f   : > { %v1296_v18 = vpop.f32.mrf.mxu0 }
 0x361   : > { %v4299_v53 = vpop.f32.mrf.mxu0 }
 0x362   : > { %1359 = vmax.xlane.f32.xlu0 %v1296_v18  ;;  %1365 = vmax.xlane.f32.xlu1 %v4299_v53 }
 0x363   : > { %v1299_v54 = vpop.f32.mrf.mxu0 }
 0x365   : > { %v5636_v55 = vpop.f32.mrf.mxu0 }
 0x366   : > { %1361 = vmax.xlane.f32.xlu1 %v1299_v54 }
 0x367   : > { %v5638_v23 = vpop.f32.mrf.mxu0 }
 0x369   : > { %v5640_v56 = vpop.f32.mrf.mxu0 }
 0x36a   : > { %1371 = vmax.xlane.f32.xlu1 %v5636_v55 }
 0x36b   : > { %v5643_v59 = vpop.f32.mrf.mxu0 }
 0x36d   : > { %v5645_v19 = vpop.f32.mrf.mxu0 }
 0x36e   : > { %1367 = vmax.xlane.f32.xlu1 %v5638_v23 }
 0x36f   : > { %v5648_v60 = vpop.f32.mrf.mxu0 }
 0x371   : > { %v5651_v29 = vpop.f32.mrf.mxu0 }
 0x372   : > { %1373 = vmax.xlane.f32.xlu1 %v5640_v56 }
 0x373   : > { %v5656_v61 = vpop.f32.mrf.mxu0 }
 0x375   : > { %v5659_v62 = vpop.f32.mrf.mxu0 }
 0x376   : > { %1369 = vmax.xlane.f32.xlu1 %v5643_v59 }
 0x377   : > { %v5662_v32 = vpop.f32.mrf.mxu0 }
 0x378   : > { %1708 = vrot.lane.b32.xlu0 %v5569_v14, %s5156_s16 }
 0x379   : > { %v5665_v26 = vpop.f32.mrf.mxu0 }
 0x37a   : > { %1377 = vmax.xlane.f32.xlu1 %v5656_v61 }
 0x37b   : > { %v5668_v0 = vpop.f32.mrf.mxu0 }
 0x37e   : > { %1387 = vmax.xlane.f32.xlu1 %v5659_v62 }
 0x382   : > { %1383 = vmax.xlane.f32.xlu1 %v5662_v32 }
 0x386   : > { %1389 = vmax.xlane.f32.xlu1 %v5665_v26 }
 0x38a   : > { %1385 = vmax.xlane.f32.xlu1 %v5668_v0 }
 0x397   : > { %1379 = vmax.xlane.f32.xlu0 %v5645_v19 }
 0x39b   : > { %1375 = vmax.xlane.f32.xlu0 %v5648_v60  ;;  %1706 = vrot.lane.b32.xlu1 %v5575_v57, %s5156_s16 }
 0x39f   : > { %1381 = vmax.xlane.f32.xlu0 %v5651_v29  ;;  %1686 = vrot.lane.b32.xlu1 %v5599_v58, %s5156_s16 }
 0x3a3   : > { %1690 = vrot.lane.b32.xlu1 %v5607_v45, %s5156_s16 }
 0x3a7   : > { %1694 = vrot.lane.b32.xlu1 %v5615_v49, %s5156_s16 }
 0x3ab   : > { %1698 = vrot.lane.b32.xlu1 %v5623_v30, %s5156_s16 }
 0x3af   : > { %1993 = vrot.lane.b32.xlu1 %v5516_v22, %s5156_s16  ;;  %v1713_v22 = vpop.permute.xlu1 %1712 }
 0x3b3   : > { %1991 = vrot.lane.b32.xlu1 %v5520_v5, %s5156_s16 }
 0x3b5   : > { %1704 = vrot.lane.b32.xlu0 %v5581_v36, %s5156_s16 }
 0x3b7   : > { %1989 = vrot.lane.b32.xlu1 %v5524_v8, %s5156_s16 }
 0x3b9   : > { %1702 = vrot.lane.b32.xlu0 %v5587_v40, %s5156_s16 }
 0x3bb   : > { %1985 = vrot.lane.b32.xlu1 %v5536_v21, %s5156_s16 }
 0x3bd   : > { %1700 = vrot.lane.b32.xlu0 %v5593_v42, %s5156_s16 }
 0x3bf   : > { %1981 = vrot.lane.b32.xlu1 %v5548_v13, %s5156_s16 }
 0x3c1   : > { %1684 = vrot.lane.b32.xlu0 %v5509_v27, %s5156_s16 }
 0x3c5   : > { %1688 = vrot.lane.b32.xlu0 %v5601_v44, %s5156_s16 }
 0x3c9   : > { %1692 = vrot.lane.b32.xlu0 %v5609_v3, %s5156_s16 }
 0x3cd   : > { %1696 = vrot.lane.b32.xlu0 %v5617_v50, %s5156_s16 }
 0x3d1   : > { %1995 = vrot.lane.b32.xlu0 %v5513_v63, %s5156_s16 }
 0x3d5   : > { %1987 = vrot.lane.b32.xlu0 %v5530_v11, %s5156_s16 }
 0x3e7   : > { %v1364_v1 = vpop.xlane.xlu0 %1363 }
 0x3e8   : > { %v1393_v38 = vsub.f32 %v5633_v4, %v1364_v1 }
 0x3ea   : > { %v1411_v16 = vmul.f32 1.442695, %v1393_v38 }
 0x3eb   : > { %v1366_v2 = vpop.xlane.xlu1 %1365  ;;  %v1360_v31 = vpop.xlane.xlu0 %1359 }
 0x3ec   : > { %v1394_v5 = vsub.f32 %v4299_v53, %v1366_v2  ;;  %v1391_v6 = vsub.f32 %v1296_v18, %v1360_v31 }
 0x3ee   : > { %v1413_v7 = vmul.f32 1.442695, %v1394_v5  ;;  %v1407_v8 = vmul.f32 1.442695, %v1391_v6 }
 0x3ef   : > { %v1362_v9 = vpop.xlane.xlu1 %1361  ;;  %v1709_v38 = vpop.permute.xlu0 %1708 }
 0x3f0   : > { %v1392_v48 = vsub.f32 %v1299_v54, %v1362_v9  ;;  %4805 = vpow2.f32 %v1413_v7  ;;  %v1762_v54 = vsel %vm1213_vm0, %v5629_v52, 0 }
 0x3f1   : > { %4807 = vpow2.f32 %v1407_v8  ;;  %v1753_v8 = vsel %vm1213_vm0, %v1709_v38, 0 }
 0x3f2   : > { %v1409_v39 = vmul.f32 1.442695, %v1392_v48 }
 0x3f3   : > { %v1372_v63 = vpop.xlane.xlu1 %1371 }
 0x3f4   : > { %4809 = vpow2.f32 %v1409_v39  ;;  %v1397_v24 = vsub.f32 %v5636_v55, %v1372_v63 }
 0x3f5   : > { %4811 = vpow2.f32 %v1411_v16 }
 0x3f6   : > { %v1419_v37 = vmul.f32 1.442695, %v1397_v24 }
 0x3f7   : > { %v1368_v11 = vpop.xlane.xlu1 %1367 }
 0x3f8   : > { %v1395_v17 = vsub.f32 %v5638_v23, %v1368_v11 }
 0x3fa   : > { %v1415_v25 = vmul.f32 1.442695, %v1395_v17 }
 0x3fb   : > { %v1374_v20 = vpop.xlane.xlu1 %1373 }
 0x3fc   : > { %v1398_v21 = vsub.f32 %v5640_v56, %v1374_v20  ;;  %4813 = vpow2.f32 %v1415_v25  ;;  %v1759_v56 = vsel %vm1213_vm0, %v1713_v22, 0 }
 0x3fd   : > { %v5716_v13 = vpop.eup %4805 }
 0x3fe   : > { %v1421_v33 = vmul.f32 1.442695, %v1398_v21  ;;  %v5718_v35 = vpop.eup %4807 }
 0x3ff   : > { %v1370_v34 = vpop.xlane.xlu1 %1369 }
 0x400   : > { %v1396_v47 = vsub.f32 %v5643_v59, %v1370_v34  ;;  %4815 = vpow2.f32 %v1421_v33 }
 0x401   : > { %v5721_v15 = vpop.eup %4809 }
 0x402   : > { %v5723_v41 = vpop.eup %4811  ;;  %v1417_v43 = vmul.f32 1.442695, %v1396_v47  ;;  %v1471_v4 = vpack.c.bf16 %v5721_v15, %v5718_v35 }
 0x403   : > { %v1378_v18 = vpop.xlane.xlu1 %1377  ;;  %v1472_v53 = vpack.c.bf16 %v5716_v13, %v5723_v41 }
 0x404   : > { %4817 = vpow2.f32 %v1417_v43  ;;  %4328 = vmatprep.mubr.bf16.mxu1 %v1471_v4  ;;  %v1400_v48 = vsub.f32 %v5656_v61, %v1378_v18 }
 0x405   : > { %4819 = vpow2.f32 %v1419_v37  ;;  %4329 = vmatmul.mubr.bf16.vlgmr.msra.gmra.mxu1 %v1472_v53 }
 0x406   : > { %4345 = vmatpush3.bf16.xpose.msra.mxu1 %v1762_v54  ;;  %v1425_v63 = vmul.f32 1.442695, %v1400_v48 }
 0x407   : > { %4625 = vmatprep.subr.msk.bf16.mxu1 %vm1213_vm0, %v1713_v22  ;;  %v1388_v55 = vpop.xlane.xlu1 %1387  ;;  %v1756_v22 = vsel %vm1213_vm0, %v5627_v51, 0 }
 0x408   : > { %4821 = vpow2.f32 %v1425_v63  ;;  %v1405_v37 = vsub.f32 %v5659_v62, %v1388_v55 }
 0x409   : > { %v5733_v59 = vpop.eup %4813 }
 0x40b   : > { %v1384_v23 = vpop.xlane.xlu1 %1383 }
 0x40c   : > { %v1403_v21 = vsub.f32 %v5662_v32, %v1384_v23 }
 0x40d   : > { %v5737_v1 = vpop.eup %4815 }
 0x40e   : > { %4347 = vmatpush3.bf16.xpose.msra.mxu1 %v1759_v56 }
 0x40f   : > { %4626 = vmatprep.subr.msk.bf16.mxu1 %vm1213_vm0, %v5627_v51  ;;  %v1390_v52 = vpop.xlane.xlu1 %1389 }
 0x410   : > { %v1406_v47 = vsub.f32 %v5665_v26, %v1390_v52 }
 0x411   : > { %v5739_v2 = vpop.eup %4817 }
 0x412   : > { %v5741_v31 = vpop.eup %4819  ;;  %v1473_v5 = vpack.c.bf16 %v5739_v2, %v5733_v59  ;;  %v1437_v4 = vmul.f32 1.442695, %v1406_v47 }
 0x413   : > { %v1474_v6 = vpack.c.bf16 %v5737_v1, %v5741_v31  ;;  %v1386_v7 = vpop.xlane.xlu1 %1385 }
 0x414   : > { %4332 = vmatprep.mubr.bf16.mxu1 %v1473_v5  ;;  %v1404_v39 = vsub.f32 %v5668_v0, %v1386_v7  ;;  %v1431_v0 = vmul.f32 1.442695, %v1403_v21 }
 0x415   : > { %4333 = vmatmul.mubr.bf16.gmra.mxu1 %v1474_v6  ;;  %v5764_v54 = vpop.eup %4821 }
 0x416   : > { %4349 = vmatpush3.bf16.xpose.msra.mxu1 %v1756_v22  ;;  %v1433_v24 = vmul.f32 1.442695, %v1404_v39 }
 0x417   : > { %4627 = vmatprep.subr.msk.bf16.mxu1 %vm1213_vm0, %v1709_v38  ;;  %v1707_v9 = vpop.permute.xlu1 %1706 }
 0x418   : > { %v1750_v20 = vsel %vm1213_vm0, %v1707_v9, 0 }
 0x41b   : > { %v1687_v43 = vpop.permute.xlu1 %1686 }
 0x41e   : > { %4351 = vmatpush3.bf16.xpose.msra.mxu1 %v1753_v8 }
 0x41f   : > { %4628 = vmatprep.subr.msk.bf16.mxu1 %vm1213_vm0, %v1707_v9  ;;  %v1691_v26 = vpop.permute.xlu1 %1690 }
 0x420   : > { %v1380_v16 = vpop.xlane.xlu0 %1379 }
 0x421   : > { %v1401_v11 = vsub.f32 %v5645_v19, %v1380_v16 }
 0x423   : > { %v1427_v33 = vmul.f32 1.442695, %v1401_v11  ;;  %v1695_v22 = vpop.permute.xlu1 %1694 }
 0x424   : > { %v1376_v51 = vpop.xlane.xlu0 %1375 }
 0x425   : > { %v1399_v17 = vsub.f32 %v5648_v60, %v1376_v51 }
 0x426   : > { %4353 = vmatpush3.bf16.xpose.msra.mxu1 %v1750_v20 }
 0x427   : > { %v1423_v25 = vmul.f32 1.442695, %v1399_v17  ;;  %v1699_v39 = vpop.permute.xlu1 %1698 }
 0x428   : > { %v1382_v34 = vpop.xlane.xlu0 %1381 }
 0x429   : > { %4823 = vpow2.f32 %v1423_v25  ;;  %v1402_v61 = vsub.f32 %v5651_v29, %v1382_v34  ;;  %v1435_v29 = vmul.f32 1.442695, %v1405_v37 }
 0x42a   : > { %4825 = vpow2.f32 %v1433_v24 }
 0x42b   : > { %v1429_v19 = vmul.f32 1.442695, %v1402_v61  ;;  %4827 = vpow2.f32 %v1427_v33  ;;  %v1994_v20 = vpop.permute.xlu1 %1993 }
 0x42c   : > { %v1705_v60 = vpop.permute.xlu0 %1704 }
 0x42d   : > { %4829 = vpow2.f32 %v1429_v19  ;;  %4629 = vmatprep.subr.msk.bf16.mxu1 %vm1213_vm0, %v1705_v60  ;;  %v1747_v32 = vsel %vm1213_vm0, %v1705_v60, 0 }
 0x42e   : > { %4831 = vpow2.f32 %v1431_v0  ;;  %4355 = vmatpush3.bf16.xpose.msra.mxu1 %v1747_v32 }
 0x42f   : > { %4833 = vpow2.f32 %v1437_v4  ;;  %v1992_v24 = vpop.permute.xlu1 %1991 }
 0x430   : > { %v1703_v18 = vpop.permute.xlu0 %1702  ;;  %4835 = vpow2.f32 %v1435_v29 }
 0x431   : > { %4630 = vmatprep.subr.msk.bf16.mxu1 %vm1213_vm0, %v1703_v18  ;;  %v1744_v62 = vsel %vm1213_vm0, %v1703_v18, 0 }
 0x433   : > { %v1990_v25 = vpop.permute.xlu1 %1989 }
 0x434   : > { %v1701_v53 = vpop.permute.xlu0 %1700 }
 0x435   : > { %v1741_v48 = vsel %vm1213_vm0, %v1701_v53, 0 }
 0x436   : > { %v5767_v55 = vpop.eup %4823  ;;  %4357 = vmatpush3.bf16.xpose.msra.mxu1 %v1744_v62 }
 0x437   : > { %4631 = vmatprep.subr.msk.bf16.mxu1 %vm1213_vm0, %v1701_v53  ;;  %v1475_v23 = vpack.c.bf16 %v5764_v54, %v5767_v55  ;;  %v5772_v56 = vpop.eup %4825  ;;  %v1986_v34 = vpop.permute.xlu1 %1985 }
 0x438   : > { %v1685_v52 = vpop.permute.xlu0 %1684  ;;  %v5774_v5 = vpop.eup %4827 }
 0x439   : > { %4336 = vmatprep.mubr.bf16.mxu1 %v1475_v23 }
 0x43a   : > { %v5776_v6 = vpop.eup %4829 }
 0x43b   : > { %v5778_v38 = vpop.eup %4831  ;;  %v1476_v7 = vpack.c.bf16 %v5776_v6, %v5774_v5 }
 0x43c   : > { %v1689_v8 = vpop.permute.xlu0 %1688  ;;  %v1477_v9 = vpack.c.bf16 %v5772_v56, %v5778_v38  ;;  %v5785_v16 = vpop.eup %4833 }
 0x43d   : > { %4337 = vmatmul.mubr.bf16.gmra.mxu1 %v1476_v7  ;;  %v5787_v11 = vpop.eup %4835 }
 0x43e   : > { %4340 = vmatprep.mubr.bf16.mxu1 %v1477_v9  ;;  %4359 = vmatpush3.bf16.xpose.msra.mxu1 %v1741_v48  ;;  %v1478_v51 = vpack.c.bf16 %v5785_v16, %v5787_v11 }
 0x440   : > { %v1693_v63 = vpop.permute.xlu0 %1692 }
 0x444   : > { %v1697_v17 = vpop.permute.xlu0 %1696 }
 0x445   : > { %4341 = vmatmul.mubr.bf16.gmra.mxu1 %v1478_v51 }
 0x446   : > { %4360 = vmatprep.mubr.msk.bf16.mxu1 %vm1213_vm0, %v1685_v52 }
 0x448   : > { %v1996_v21 = vpop.permute.xlu0 %1995 }
 0x449   : > { %4376 = vmatprep.subr.bf16.mxu0 %v1996_v21 }
 0x44a   : > { %4377 = vmatpush3.bf16.msra.mxu0 %v1996_v21 }
 0x44b   : > { %4378 = vmatprep.subr.bf16.mxu0 %v1994_v20 }
 0x44c   : > { %v1988_v33 = vpop.permute.xlu0 %1987 }
 0x44d   : > { %4361 = vmatmul.mubr.msk.bf16.vlgmr.msra.gmra.mxu1 %vm1213_vm0, %v1687_v43 }
 0x44e   : > { %4364 = vmatprep.mubr.msk.bf16.mxu1 %vm1213_vm0, %v1689_v8  ;;  %4379 = vmatpush3.bf16.msra.mxu0 %v1994_v20 }
 0x44f   : > { %4380 = vmatprep.subr.bf16.mxu0 %v1992_v24 }
 0x452   : > { %4381 = vmatpush3.bf16.msra.mxu0 %v1992_v24 }
 0x453   : > { %4382 = vmatprep.subr.bf16.mxu0 %v1990_v25 }
 0x455   : > { %4365 = vmatmul.mubr.msk.bf16.gmra.mxu1 %vm1213_vm0, %v1691_v26 }
 0x456   : > { %4368 = vmatprep.mubr.msk.bf16.mxu1 %vm1213_vm0, %v1693_v63  ;;  %4383 = vmatpush3.bf16.msra.mxu0 %v1990_v25 }
 0x457   : > { %4384 = vmatprep.subr.bf16.mxu0 %v1988_v33 }
 0x45a   : > { %4385 = vmatpush3.bf16.msra.mxu0 %v1988_v33 }
 0x45b   : > { %4386 = vmatprep.subr.bf16.mxu0 %v1986_v34 }
 0x45d   : > { %4369 = vmatmul.mubr.msk.bf16.gmra.mxu1 %vm1213_vm0, %v1695_v22 }
 0x45e   : > { %4372 = vmatprep.mubr.msk.bf16.mxu1 %vm1213_vm0, %v1697_v17  ;;  %4387 = vmatpush3.bf16.msra.mxu0 %v1986_v34 }
 0x465   : > { %4373 = vmatmul.mubr.msk.bf16.gmra.mxu1 %vm1213_vm0, %v1699_v39 }
 0x4c5   : > { %v5799_v61 = vpop.f32.mrf.mxu1 }
 0x4c7   : > { %v5801_v0 = vpop.f32.mrf.mxu1 }
 0x4c9   : > { %v5803_v47 = vpop.f32.mrf.mxu1 }
 0x4cb   : > { %v5805_v19 = vpop.f32.mrf.mxu1 }
 0x4d5   : > { %v5807_v60 = vpop.f32.mrf.mxu1 }
 0x4d6   : > { %6706 = vst [vmem:[#allocation6_spill] sm:$0xff] %v5807_v60 }
 0x4d7   : > { %v5809_v37 = vpop.f32.mrf.mxu1 }
 0x4d9   : > { %v5811_v32 = vpop.f32.mrf.mxu1 }
 0x4da   : > { %6707 = vst [vmem:[#allocation7_spill] sm:$0xff] %v5811_v32 }
 0x4db   : > { %v5813_v43 = vpop.f32.mrf.mxu1 }
 0x4fd   : > { %v5815_v4 = vpop.f32.mrf.mxu1 }
 0x4fe   : > { %6708 = vst [vmem:[#allocation8_spill] sm:$0xff] %v5815_v4 }
 0x4ff   : > { %v5817_v18 = vpop.f32.mrf.mxu1 }
 0x500   : > { %6709 = vst [vmem:[#allocation9_spill] sm:$0xff] %v5817_v18 }
 0x501   : > { %v5819_v29 = vpop.f32.mrf.mxu1 }
 0x502   : > { %6710 = vst [vmem:[#allocation10_spill] sm:$0xff] %v5819_v29 }
 0x503   : > { %v5821_v26 = vpop.f32.mrf.mxu1 }
 0x505   : > { %v5823_v53 = vpop.f32.mrf.mxu1 }
 0x506   : > { %6711 = vst [vmem:[#allocation11_spill] sm:$0xff] %v5823_v53 }
 0x507   : > { %v5825_v62 = vpop.f32.mrf.mxu1 }
 0x508   : > { %6712 = vst [vmem:[#allocation12_spill] sm:$0xff] %v5825_v62 }
 0x509   : > { %v5827_v23 = vpop.f32.mrf.mxu1 }
 0x50a   : > { %6713 = vst [vmem:[#allocation13_spill] sm:$0xff] %v5827_v23  ;;  %v1982_v23 = vpop.permute.xlu1 %1981 }
 0x50b   : > { %v5829_v52 = vpop.f32.mrf.mxu1 }
 0x50c   : > { %6714 = vst [vmem:[#allocation14_spill] sm:$0xff] %v5829_v52 }
 0x50d   : > { %v4362_v22 = vpop.f32.mrf.mxu1 }
 0x50e   : > { %1865 = vmax.xlane.f32.xlu0 %v4362_v22 }
 0x50f   : > { %v1798_v7 = vpop.f32.mrf.mxu1 }
 0x511   : > { %v4363_v8 = vpop.f32.mrf.mxu1 }
 0x512   : > { %1861 = vmax.xlane.f32.xlu0 %v1798_v7 }
 0x513   : > { %v1801_v9 = vpop.f32.mrf.mxu1 }
 0x514   : > { %1863 = vmax.xlane.f32.xlu1 %v1801_v9 }
 0x515   : > { %v5831_v48 = vpop.f32.mrf.mxu1 }
 0x516   : > { %1867 = vmax.xlane.f32.xlu0 %v4363_v8 }
 0x517   : > { %v5833_v39 = vpop.f32.mrf.mxu1 }
 0x519   : > { %v5835_v63 = vpop.f32.mrf.mxu1 }
 0x51b   : > { %v5837_v51 = vpop.f32.mrf.mxu1 }
 0x51c   : > { %1871 = vmax.xlane.f32.xlu1 %v5837_v51 }
 0x51d   : > { %v5840_v17 = vpop.f32.mrf.mxu1 }
 0x51f   : > { %v5842_v20 = vpop.f32.mrf.mxu1 }
 0x521   : > { %v5844_v21 = vpop.f32.mrf.mxu1 }
 0x522   : > { %1883 = vmax.xlane.f32.xlu1 %v5844_v21 }
 0x523   : > { %v5847_v24 = vpop.f32.mrf.mxu1 }
 0x526   : > { %1879 = vmax.xlane.f32.xlu1 %v5847_v24 }
 0x52c   : > { %1983 = vrot.lane.b32.xlu0 %v5542_v12, %s5156_s16  ;;  %v5868_v12 = vpop.f32.mrf.mxu1 }
 0x52e   : > { %v5871_v25 = vpop.f32.mrf.mxu1 }
 0x537   : > { %2457 = vrot.lane.b32.xlu1 %v5540_v46, %s5157_s17 }
 0x53b   : > { %2453 = vrot.lane.b32.xlu1 %v5569_v14, %s5157_s17 }
 0x53f   : > { %2449 = vrot.lane.b32.xlu1 %v5581_v36, %s5157_s17 }
 0x543   : > { %2445 = vrot.lane.b32.xlu1 %v5593_v42, %s5157_s17 }
 0x547   : > { %2431 = vrot.lane.b32.xlu1 %v5599_v58, %s5157_s17  ;;  %v5875_v58 = vpop.f32.mrf.mxu1 }
 0x54b   : > { %1873 = vmax.xlane.f32.xlu0 %v5831_v48  ;;  %2435 = vrot.lane.b32.xlu1 %v5607_v45, %s5157_s17  ;;  %v5878_v45 = vpop.f32.mrf.mxu1 }
 0x54f   : > { %1869 = vmax.xlane.f32.xlu0 %v5833_v39 }
 0x553   : > { %1875 = vmax.xlane.f32.xlu0 %v5835_v63 }
 0x557   : > { %1877 = vmax.xlane.f32.xlu0 %v5842_v20 }
 0x55b   : > { %1881 = vmax.xlane.f32.xlu0 %v5840_v17 }
 0x55f   : > { %1885 = vmax.xlane.f32.xlu0 %v5871_v25 }
 0x563   : > { %1889 = vmax.xlane.f32.xlu0 %v5868_v12 }
 0x56f   : > { %1891 = vmax.xlane.f32.xlu1 %v5875_v58 }
 0x573   : > { %1887 = vmax.xlane.f32.xlu1 %v5878_v45 }
 0x579   : > { %2459 = vrot.lane.b32.xlu0 %v5552_v28, %s5157_s17 }
 0x57d   : > { %2455 = vrot.lane.b32.xlu0 %v5528_v10, %s5157_s17 }
 0x581   : > { %2451 = vrot.lane.b32.xlu0 %v5575_v57, %s5157_s17 }
 0x584   : > { %2439 = vrot.lane.b32.xlu1 %v5615_v49, %s5157_s17 }
 0x585   : > { %2447 = vrot.lane.b32.xlu0 %v5587_v40, %s5157_s17 }
 0x589   : > { %2429 = vrot.lane.b32.xlu0 %v5509_v27, %s5157_s17 }
 0x58d   : > { %2433 = vrot.lane.b32.xlu0 %v5601_v44, %s5157_s17 }
 0x591   : > { %2437 = vrot.lane.b32.xlu0 %v5609_v3, %s5157_s17  ;;  %v4765_v3 = vld [vmem:[%s6701_s4 + $0x18] sm:$0xff]  }
 0x597   : > { %v1866_v33 = vpop.xlane.xlu0 %1865 }
 0x598   : > { %v1895_v34 = vsub.f32 %v4362_v22, %v1866_v33 }
 0x59a   : > { %v1913_v52 = vmul.f32 1.442695, %v1895_v34 }
 0x59b   : > { %v1862_v53 = vpop.xlane.xlu0 %1861 }
 0x59c   : > { %v1893_v62 = vsub.f32 %v1798_v7, %v1862_v53  ;;  %4837 = vpow2.f32 %v1913_v52 }
 0x59d   : > { %v1864_v29 = vpop.xlane.xlu1 %1863 }
 0x59e   : > { %v1909_v49 = vmul.f32 1.442695, %v1893_v62  ;;  %v1894_v4 = vsub.f32 %v1801_v9, %v1864_v29 }
 0x59f   : > { %v1868_v18 = vpop.xlane.xlu0 %1867 }
 0x5a0   : > { %v1911_v32 = vmul.f32 1.442695, %v1894_v4  ;;  %v1896_v60 = vsub.f32 %v4363_v8, %v1868_v18  ;;  %4839 = vpow2.f32 %v1909_v49 }
 0x5a2   : > { %4841 = vpow2.f32 %v1911_v32  ;;  %v1915_v27 = vmul.f32 1.442695, %v1896_v60  ;;  %v4766_v32 = vld [vmem:[%s6701_s4 + $0x10] sm:$0xff]  }
 0x5a3   : > { %v1984_v44 = vpop.permute.xlu0 %1983 }
 0x5a4   : > { %4843 = vpow2.f32 %v1915_v27  ;;  %4388 = vmatprep.subr.bf16.mxu0 %v1984_v44 }
 0x5a5   : > { %4389 = vmatpush3.bf16.msra.mxu0 %v1984_v44 }
 0x5a6   : > { %4390 = vmatprep.subr.bf16.mxu0 %v1982_v23 }
 0x5a9   : > { %4391 = vmatpush3.bf16.msra.mxu0 %v1982_v23  ;;  %v4838_v53 = vpop.eup %4837  ;;  %v1872_v23 = vpop.xlane.xlu1 %1871 }
 0x5aa   : > { %4408 = vmatprep.subr.bf16.mxu0 %v4765_v3  ;;  %v1898_v7 = vsub.f32 %v5837_v51, %v1872_v23 }
 0x5ac   : > { %v1919_v49 = vmul.f32 1.442695, %v1898_v7 }
 0x5ad   : > { %v4840_v29 = vpop.eup %4839  ;;  %v1884_v52 = vpop.xlane.xlu1 %1883 }
 0x5af   : > { %v4842_v62 = vpop.eup %4841 }
 0x5b0   : > { %1945 = vadd.xlane.f32.xlu0 %v4838_v53  ;;  %v1973_v4 = vpack.c.bf16 %v4842_v62, %v4840_v29 }
 0x5b1   : > { %v4844_v18 = vpop.eup %4843  ;;  %v1880_v22 = vpop.xlane.xlu1 %1879 }
 0x5b2   : > { %4392 = vmatprep.mubr.bf16.mxu0 %v1973_v4  ;;  %1947 = vadd.xlane.f32.xlu1 %v4844_v18  ;;  %v1974_v60 = vpack.c.bf16 %v4844_v18, %v4838_v53  ;;  %v1902_v53 = vsub.f32 %v5847_v24, %v1880_v22 }
 0x5b4   : > { %1941 = vadd.xlane.f32.xlu0 %v4840_v29  ;;  %4393 = vmatmul.mubr.bf16.vlgmr.msra.gmra.mxu0 %v1974_v60  ;;  %v1927_v18 = vmul.f32 1.442695, %v1902_v53 }
 0x5b5   : > { %4409 = vmatpush3.bf16.msra.mxu0 %v4765_v3  ;;  %v5905_v33 = vpop.permute.xlu1 %2457 }
 0x5b6   : > { %1943 = vadd.xlane.f32.xlu1 %v4842_v62  ;;  %4410 = vmatprep.subr.bf16.mxu0 %v4766_v32 }
 0x5b9   : > { %4411 = vmatpush3.bf16.msra.mxu0 %v4766_v32  ;;  %v5909_v29 = vpop.permute.xlu1 %2453 }
 0x5bd   : > { %v5914_v23 = vpop.permute.xlu1 %2449 }
 0x5d4   : > { %v1874_v8 = vpop.xlane.xlu0 %1873 }
 0x5d5   : > { %v1899_v9 = vsub.f32 %v5831_v48, %v1874_v8  ;;  %v1904_v48 = vsub.f32 %v5844_v21, %v1884_v52 }
 0x5d7   : > { %v1921_v34 = vmul.f32 1.442695, %v1899_v9  ;;  %v1931_v7 = vmul.f32 1.442695, %v1904_v48 }
 0x5d8   : > { %v1870_v27 = vpop.xlane.xlu0 %1869 }
 0x5d9   : > { %4845 = vpow2.f32 %v1921_v34  ;;  %v1897_v44 = vsub.f32 %v5833_v39, %v1870_v27 }
 0x5da   : > { %4847 = vpow2.f32 %v1919_v49 }
 0x5db   : > { %v1917_v3 = vmul.f32 1.442695, %v1897_v44 }
 0x5dc   : > { %v1876_v62 = vpop.xlane.xlu0 %1875 }
 0x5dd   : > { %4849 = vpow2.f32 %v1917_v3  ;;  %v1900_v51 = vsub.f32 %v5835_v63, %v1876_v62  ;;  %v5917_v63 = vpop.permute.xlu1 %2445 }
 0x5df   : > { %v1923_v4 = vmul.f32 1.442695, %v1900_v51 }
 0x5e0   : > { %v1878_v60 = vpop.xlane.xlu0 %1877 }
 0x5e1   : > { %4851 = vpow2.f32 %v1923_v4  ;;  %v1901_v32 = vsub.f32 %v5842_v20, %v1878_v60  ;;  %v5919_v44 = vpop.permute.xlu1 %2431 }
 0x5e2   : > { %4853 = vpow2.f32 %v1927_v18 }
 0x5e3   : > { %v1925_v39 = vmul.f32 1.442695, %v1901_v32 }
 0x5e4   : > { %v1882_v24 = vpop.xlane.xlu0 %1881 }
 0x5e5   : > { %4855 = vpow2.f32 %v1925_v39  ;;  %v1903_v22 = vsub.f32 %v5840_v17, %v1882_v24  ;;  %v5925_v4 = vpop.permute.xlu1 %2435 }
 0x5e6   : > { %v4846_v8 = vpop.eup %4845  ;;  %4857 = vpow2.f32 %v1931_v7 }
 0x5e7   : > { %v1929_v9 = vmul.f32 1.442695, %v1903_v22  ;;  %1953 = vadd.xlane.f32.xlu0 %v4846_v8  ;;  %v4848_v52 = vpop.eup %4847 }
 0x5e8   : > { %v1886_v21 = vpop.xlane.xlu0 %1885 }
 0x5e9   : > { %4859 = vpow2.f32 %v1929_v9  ;;  %v1905_v60 = vsub.f32 %v5871_v25, %v1886_v21 }
 0x5ea   : > { %v4850_v34 = vpop.eup %4849 }
 0x5eb   : > { %1951 = vadd.xlane.f32.xlu0 %v4848_v52  ;;  %1949 = vadd.xlane.f32.xlu1 %v4850_v34  ;;  %v1975_v20 = vpack.c.bf16 %v4848_v52, %v4850_v34  ;;  %v1933_v22 = vmul.f32 1.442695, %v1905_v60 }
 0x5ec   : > { %v1890_v49 = vpop.xlane.xlu0 %1889 }
 0x5ed   : > { %4396 = vmatprep.mubr.bf16.mxu0 %v1975_v20  ;;  %v1907_v24 = vsub.f32 %v5868_v12, %v1890_v49  ;;  %4861 = vpow2.f32 %v1933_v22 }
 0x5ee   : > { %v4852_v27 = vpop.eup %4851 }
 0x5ef   : > { %1955 = vadd.xlane.f32.xlu1 %v4852_v27  ;;  %v1976_v17 = vpack.c.bf16 %v4852_v27, %v4846_v8  ;;  %v4854_v53 = vpop.eup %4853  ;;  %v1937_v34 = vmul.f32 1.442695, %v1907_v24 }
 0x5f0   : > { %v5921_v3 = vpop.permute.xlu0 %2459 }
 0x5f1   : > { %4397 = vmatmul.mubr.bf16.gmra.mxu0 %v1976_v17  ;;  %4632 = vmatprep.subr.msk.bf16.mxu0 %vm1213_vm0, %v5921_v3 }
 0x5f2   : > { %v4856_v62 = vpop.eup %4855 }
 0x5f3   : > { %v1977_v51 = vpack.c.bf16 %v4854_v53, %v4856_v62  ;;  %v4858_v48 = vpop.eup %4857 }
 0x5f5   : > { %4400 = vmatprep.mubr.bf16.mxu0 %v1977_v51 }
 0x5f6   : > { %v4860_v18 = vpop.eup %4859 }
 0x5f7   : > { %v1978_v32 = vpack.c.bf16 %v4858_v48, %v4860_v18 }
 0x5f8   : > { %v1892_v39 = vpop.xlane.xlu1 %1891 }
 0x5f9   : > { %v1908_v7 = vsub.f32 %v5875_v58, %v1892_v39  ;;  %4401 = vmatmul.mubr.bf16.gmra.mxu0 %v1978_v32 }
 0x5fa   : > { %v4862_v25 = vpop.eup %4861 }
 0x5fb   : > { %v1939_v8 = vmul.f32 1.442695, %v1908_v7 }
 0x5fc   : > { %v1888_v9 = vpop.xlane.xlu1 %1887 }
 0x5fd   : > { %v1906_v52 = vsub.f32 %v5878_v45, %v1888_v9  ;;  %4863 = vpow2.f32 %v1939_v8 }
 0x5ff   : > { %v1935_v20 = vmul.f32 1.442695, %v1906_v52 }
 0x600   : > { %2443 = vrot.lane.b32.xlu1 %v5623_v30, %s5157_s17 }
 0x601   : > { %4865 = vpow2.f32 %v1935_v20  ;;  %2441 = vrot.lane.b32.xlu0 %v5617_v50, %s5157_s17  ;;  %v2456_v50 = vpop.permute.xlu0 %2455 }
 0x602   : > { %4867 = vpow2.f32 %v1937_v34  ;;  %v2501_v9 = vsel %vm1213_vm0, %v2456_v50, 0 }
 0x605   : > { %v2452_v30 = vpop.permute.xlu0 %2451 }
 0x606   : > { %v2495_v20 = vsel %vm1213_vm0, %v2452_v30, 0 }
 0x609   : > { %v5947_v45 = vpop.permute.xlu0 %2447 }
 0x60a   : > { %v4864_v58 = vpop.eup %4863 }
 0x60e   : > { %v4866_v12 = vpop.eup %4865 }
 0x60f   : > { %v4868_v21 = vpop.eup %4867  ;;  %v1979_v49 = vpack.c.bf16 %v4866_v12, %v4862_v25 }
 0x610   : > { %v1980_v27 = vpack.c.bf16 %v4864_v58, %v4868_v21 }
 0x611   : > { %4404 = vmatprep.mubr.bf16.mxu0 %v1979_v49 }
 0x612   : > { %4405 = vmatmul.mubr.bf16.gmra.mxu0 %v1980_v27  ;;  %v4767_v27 = vld [vmem:[%s6701_s4 + $0x8] sm:$0xff]  }
 0x613   : > { %4428 = vmatprep.subr.bf16.mxu1 %v4767_v27 }
 0x614   : > { %4429 = vmatpush3.bf16.msra.mxu1 %v4767_v27 }
 0x620   : > { %1969 = vadd.xlane.f32.xlu0 %v4868_v21 }
 0x624   : > { %1961 = vadd.xlane.f32.xlu1 %v4860_v18  ;;  %1965 = vadd.xlane.f32.xlu0 %v4862_v25 }
 0x628   : > { %1957 = vadd.xlane.f32.xlu1 %v4856_v62  ;;  %1971 = vadd.xlane.f32.xlu0 %v4864_v58 }
 0x62c   : > { %1963 = vadd.xlane.f32.xlu1 %v4858_v48 }
 0x630   : > { %1959 = vadd.xlane.f32.xlu1 %v4854_v53  ;;  %v5955_v53 = vpop.permute.xlu1 %2439 }
 0x63b   : > { %v1948_v62 = vpop.xlane.xlu1 %1947 }
 0x63c   : > { %4869 = vrcp.f32 %v1948_v62 }
 0x63e   : > { %3087 = vrot.lane.b32.xlu0 %v5552_v28, %s5158_s28  ;;  %v5949_v28 = vpop.permute.xlu0 %2429 }
 0x641   : > { %3085 = vrot.lane.b32.xlu1 %v5540_v46, %s5158_s28 }
 0x642   : > { %3083 = vrot.lane.b32.xlu0 %v5528_v10, %s5158_s28  ;;  %v5951_v17 = vpop.permute.xlu0 %2433 }
 0x645   : > { %3081 = vrot.lane.b32.xlu1 %v5569_v14, %s5158_s28 }
 0x646   : > { %3079 = vrot.lane.b32.xlu0 %v5575_v57, %s5158_s28  ;;  %v5953_v46 = vpop.permute.xlu0 %2437  ;;  %v1944_v57 = vpop.xlane.xlu1 %1943 }
 0x649   : > { %v4870_v48 = vpop.eup %4869 }
 0x64a   : > { %3075 = vrot.lane.b32.xlu0 %v5587_v40, %s5158_s28  ;;  %v1946_v10 = vpop.xlane.xlu0 %1945 }
 0x64e   : > { %v1942_v14 = vpop.xlane.xlu0 %1941 }
 0x64f   : > { %4871 = vrcp.f32 %v1942_v14 }
 0x650   : > { %4873 = vrcp.f32 %v1944_v57  ;;  %v4768_v57 = vld [vmem:[%s6701_s4] sm:$0xff]  }
 0x651   : > { %4875 = vrcp.f32 %v1946_v10  ;;  %4430 = vmatprep.subr.bf16.mxu1 %v4768_v57 }
 0x652   : > { %4431 = vmatpush3.bf16.msra.mxu1 %v4768_v57 }
 0x65c   : > { %v4872_v60 = vpop.eup %4871 }
 0x65d   : > { %v4874_v32 = vpop.eup %4873 }
 0x65e   : > { %v4876_v7 = vpop.eup %4875 }
 0x669   : > { %1967 = vadd.xlane.f32.xlu1 %v4866_v12  ;;  %1441 = vadd.xlane.f32.xlu0 %v5721_v15 }
 0x66d   : > { %1443 = vadd.xlane.f32.xlu0 %v5723_v41 }
 0x670   : > { %v1954_v52 = vpop.xlane.xlu0 %1953 }
 0x671   : > { %1445 = vadd.xlane.f32.xlu0 %v5716_v13 }
 0x674   : > { %v4394_v40 = vpop.f32.mrf.mxu0  ;;  %v1952_v34 = vpop.xlane.xlu0 %1951 }
 0x675   : > { %1447 = vadd.xlane.f32.xlu0 %v5733_v59  ;;  %v2136_v22 = vmul.f32 %v4876_v7, %v4394_v40  ;;  %v2507_v59 = vsel %vm1213_vm0, %v5921_v3, 0  ;;  %v2498_v3 = vsel %vm1213_vm0, %v5909_v29, 0 }
 0x676   : > { %v2039_v51 = vpop.f32.mrf.mxu0 }
 0x677   : > { %v2134_v41 = vmul.f32 %v4872_v60, %v2039_v51 }
 0x678   : > { %v4395_v18 = vpop.f32.mrf.mxu0  ;;  %v5984_v58 = vpop.permute.xlu0 %2441 }
 0x679   : > { %1449 = vadd.xlane.f32.xlu0 %v5739_v2  ;;  %v2137_v15 = vmul.f32 %v4870_v48, %v4395_v18  ;;  %v5061_v2 = vld [vmem:[#allocation2] ss:$12 sps:$4 sm:$0xff]  }
 0x67a   : > { %v2042_v39 = vpop.f32.mrf.mxu0  ;;  %3077 = vrot.lane.b32.xlu1 %v5581_v36, %s5158_s28  ;;  %v2504_v36 = vsel %vm1213_vm0, %v5905_v33, 0 }
 0x67b   : > { %v2135_v24 = vmul.f32 %v4874_v32, %v2042_v39  ;;  %v2151_v8 = vpack.c.bf16 %v2137_v15, %v2136_v22  ;;  %v2486_v32 = vsel %vm1213_vm0, %v5917_v63, 0 }
 0x67d   : > { %v2150_v13 = vpack.c.bf16 %v2135_v24, %v2134_v41 }
 0x67f   : > { %4412 = vmatprep.mubr.msk.bf16.mxu0 %vm1213_vm0, %v2150_v13 }
 0x680   : > { %4413 = vmatmul.mubr.msk.bf16.vlgmr.msra.gmra.mxu0 %vm1213_vm0, %v2151_v8 }
 0x681   : > { %4449 = vmatpush3.bf16.xpose.msra.mxu0 %v2507_v59 }
 0x682   : > { %4633 = vmatprep.subr.msk.bf16.mxu0 %vm1213_vm0, %v5905_v33  ;;  %v1950_v33 = vpop.xlane.xlu1 %1949 }
 0x683   : > { %4877 = vrcp.f32 %v1950_v33 }
 0x686   : > { %v1956_v25 = vpop.xlane.xlu1 %1955 }
 0x687   : > { %4879 = vrcp.f32 %v1956_v25  ;;  %v5063_v25 = vld [vmem:[#allocation2 + $0x18] ss:$12 sps:$4 sm:$0xff]  }
 0x688   : > { %4881 = vrcp.f32 %v1952_v34 }
 0x689   : > { %4451 = vmatpush3.bf16.xpose.msra.mxu0 %v2504_v36  ;;  %4883 = vrcp.f32 %v1954_v52 }
 0x68a   : > { %4634 = vmatprep.subr.msk.bf16.mxu0 %vm1213_vm0, %v2456_v50  ;;  %v5988_v12 = vpop.permute.xlu1 %2443 }
 0x68f   : > { %3057 = vrot.lane.b32.xlu0 %v5061_v2, %s5158_s28 }
 0x691   : > { %4453 = vmatpush3.bf16.xpose.msra.mxu0 %v2501_v9 }
 0x692   : > { %4635 = vmatprep.subr.msk.bf16.mxu0 %vm1213_vm0, %v5909_v29  ;;  %v2492_v29 = vsel %vm1213_vm0, %v5914_v23, 0 }
 0x699   : > { %4455 = vmatpush3.bf16.xpose.msra.mxu0 %v2498_v3 }
 0x69a   : > { %4636 = vmatprep.subr.msk.bf16.mxu0 %vm1213_vm0, %v2452_v30 }
 0x69e   : > { %1439 = vadd.xlane.f32.xlu1 %v5718_v35 }
 0x6a1   : > { %4457 = vmatpush3.bf16.xpose.msra.mxu0 %v2495_v20 }
 0x6a2   : > { %4637 = vmatprep.subr.msk.bf16.mxu0 %vm1213_vm0, %v5914_v23  ;;  %v2489_v23 = vsel %vm1213_vm0, %v5947_v45, 0 }
 0x6a9   : > { %4459 = vmatpush3.bf16.xpose.msra.mxu0 %v2492_v29  ;;  %v5990_v21 = vpop.xlane.xlu0 %1969 }
 0x6aa   : > { %4638 = vmatprep.subr.msk.bf16.mxu0 %vm1213_vm0, %v5947_v45 }
 0x6ad   : > { %v1962_v35 = vpop.xlane.xlu1 %1961  ;;  %v5994_v49 = vpop.xlane.xlu0 %1965 }
 0x6ae   : > { %1453 = vadd.xlane.f32.xlu0 %v5737_v1 }
 0x6af   : > { %3073 = vrot.lane.b32.xlu1 %v5593_v42, %s5158_s28  ;;  %v4878_v42 = vpop.eup %4877 }
 0x6b0   : > { %v4880_v45 = vpop.eup %4879 }
 0x6b1   : > { %4461 = vmatpush3.bf16.xpose.msra.mxu0 %v2489_v23  ;;  %v4398_v50 = vpop.f32.mrf.mxu0  ;;  %v1958_v30 = vpop.xlane.xlu1 %1957 }
 0x6b2   : > { %4639 = vmatprep.subr.msk.bf16.mxu0 %vm1213_vm0, %v5917_v63  ;;  %1455 = vadd.xlane.f32.xlu0 %v5767_v55  ;;  %v1972_v10 = vpop.xlane.xlu0 %1971  ;;  %v4882_v40 = vpop.eup %4881 }
 0x6b3   : > { %v2055_v1 = vpop.f32.mrf.mxu0  ;;  %v4884_v18 = vpop.eup %4883 }
 0x6b4   : > { %v2138_v55 = vmul.f32 %v4878_v42, %v2055_v1  ;;  %v2140_v15 = vmul.f32 %v4884_v18, %v4398_v50 }
 0x6b5   : > { %v4399_v62 = vpop.f32.mrf.mxu0  ;;  %v1964_v14 = vpop.xlane.xlu1 %1963 }
 0x6b6   : > { %1457 = vadd.xlane.f32.xlu0 %v5764_v54  ;;  %v2141_v51 = vmul.f32 %v4880_v45, %v4399_v62  ;;  %4885 = vrcp.f32 %v1964_v14  ;;  %v6013_v39 = vpop.permute.xlu0 %3087 }
 0x6b7   : > { %v2058_v48 = vpop.f32.mrf.mxu0  ;;  %4887 = vrcp.f32 %v1958_v30 }
 0x6b8   : > { %v2139_v60 = vmul.f32 %v4882_v40, %v2058_v48  ;;  %4889 = vrcp.f32 %v1962_v35  ;;  %v2153_v41 = vpack.c.bf16 %v2141_v51, %v2140_v15  ;;  %v5064_v35 = vld [vmem:[#allocation2 + $0x30] ss:$12 sps:$4 sm:$0xff]   ;;  %v3135_v15 = vsel %vm1213_vm0, %v6013_v39, 0 }
 0x6b9   : > { %4463 = vmatpush3.bf16.xpose.msra.mxu0 %v2486_v32  ;;  %v1960_v54 = vpop.xlane.xlu1 %1959  ;;  %v4402_v24 = vpop.f32.mrf.mxu0 }
 0x6ba   : > { %v2152_v7 = vpack.c.bf16 %v2139_v60, %v2138_v55  ;;  %4891 = vrcp.f32 %v1960_v54  ;;  %4640 = vmatprep.subr.msk.bf16.mxu0 %vm1213_vm0, %v6013_v39  ;;  %1459 = vadd.xlane.f32.xlu0 %v5774_v5  ;;  %v5062_v5 = vld [vmem:[#allocation2 + $0x48] ss:$12 sps:$4 sm:$0xff]   ;;  %v3084_v50 = vpop.permute.xlu0 %3083  ;;  %v5065_v55 = vld [vmem:[#allocation2 + $0x78] ss:$12 sps:$4 sm:$0xff]   ;;  %v5066_v60 = vld [vmem:[#allocation2 + $0x90] ss:$12 sps:$4 sm:$0xff]  }
 0x6bb   : > { %v2071_v63 = vpop.f32.mrf.mxu0  ;;  %4893 = vrcp.f32 %v5994_v49  ;;  %v6053_v54 = vld [vmem:[#allocation2 + $0x50] ss:$12 sps:$4 sm:$0xff]  }
 0x6bc   : > { %4416 = vmatprep.mubr.msk.bf16.mxu0 %vm1213_vm0, %v2152_v7  ;;  %4895 = vrcp.f32 %v1972_v10 }
 0x6bd   : > { %4417 = vmatmul.mubr.msk.bf16.gmra.mxu0 %vm1213_vm0, %v2153_v41  ;;  %v4403_v22 = vpop.f32.mrf.mxu0  ;;  %v3086_v29 = vpop.permute.xlu1 %3085 }
 0x6be   : > { %v3080_v62 = vpop.permute.xlu0 %3079 }
 0x6bf   : > { %v2074_v9 = vpop.f32.mrf.mxu0  ;;  %v3123_v41 = vsel %vm1213_vm0, %v3080_v62, 0 }
 0x6c1   : > { %v6026_v23 = vpop.permute.xlu1 %3081 }
 0x6c2   : > { %v6032_v18 = vpop.permute.xlu0 %3075 }
 0x6c3   : > { %v4886_v13 = vpop.eup %4885 }
 0x6c4   : > { %v4888_v8 = vpop.eup %4887  ;;  %v2145_v2 = vmul.f32 %v4886_v13, %v4403_v22 }
 0x6c5   : > { %v4890_v59 = vpop.eup %4889  ;;  %v2142_v3 = vmul.f32 %v4888_v8, %v2071_v63 }
 0x6c6   : > { %v2144_v33 = vmul.f32 %v4890_v59, %v4402_v24 }
 0x6c7   : > { %v4892_v36 = vpop.eup %4891 }
 0x6c8   : > { %v2143_v52 = vmul.f32 %v4892_v36, %v2074_v9  ;;  %v2155_v20 = vpack.c.bf16 %v2145_v2, %v2144_v33  ;;  %v4894_v42 = vpop.eup %4893 }
 0x6c9   : > { %v4896_v14 = vpop.eup %4895 }
 0x6ca   : > { %v2154_v34 = vpack.c.bf16 %v2143_v52, %v2142_v3 }
 0x6cc   : > { %4420 = vmatprep.mubr.msk.bf16.mxu0 %vm1213_vm0, %v2154_v34 }
 0x6cd   : > { %4421 = vmatmul.mubr.msk.bf16.gmra.mxu0 %vm1213_vm0, %v2155_v20 }
 0x6d0   : > { %3063 = vrot.lane.b32.xlu0 %v5062_v5, %s5158_s28  ;;  %v6096_v5 = vld [vmem:[#allocation2 + $0xb0] ss:$12 sps:$4 sm:$0xff]  }
 0x6d3   : > { %1451 = vadd.xlane.f32.xlu1 %v5741_v31  ;;  %v4406_v31 = vpop.f32.mrf.mxu0 }
 0x6d5   : > { %v2087_v30 = vpop.f32.mrf.mxu0 }
 0x6d6   : > { %v2146_v51 = vmul.f32 %v4894_v42, %v2087_v30  ;;  %v6111_v30 = vld [vmem:[#allocation2 + $0x38] ss:$12 sps:$4 sm:$0xff]  }
 0x6d7   : > { %v4407_v1 = vpop.f32.mrf.mxu0 }
 0x6d8   : > { %v2149_v57 = vmul.f32 %v4896_v14, %v4407_v1 }
 0x6d9   : > { %v2090_v40 = vpop.f32.mrf.mxu0 }
 0x6e4   : > { %3059 = vrot.lane.b32.xlu1 %v5063_v25, %s5158_s28 }
 0x6e8   : > { %3061 = vrot.lane.b32.xlu1 %v5064_v35, %s5158_s28 }
 0x6ef   : > { %1463 = vadd.xlane.f32.xlu0 %v5778_v38 }
 0x6f2   : > { %v1968_v27 = vpop.xlane.xlu1 %1967 }
 0x6f3   : > { %4897 = vrcp.f32 %v1968_v27  ;;  %1467 = vadd.xlane.f32.xlu0 %v5787_v11 }
 0x6f4   : > { %4899 = vrcp.f32 %v5990_v21  ;;  %v1442_v21 = vpop.xlane.xlu0 %1441 }
 0x6f5   : > { %4901 = vrcp.f32 %v1442_v21 }
 0x6f8   : > { %v1444_v32 = vpop.xlane.xlu0 %1443 }
 0x6f9   : > { %4903 = vrcp.f32 %v1444_v32 }
 0x700   : > { %v4898_v45 = vpop.eup %4897 }
 0x701   : > { %v4900_v38 = vpop.eup %4899  ;;  %v2147_v49 = vmul.f32 %v4898_v45, %v2090_v40  ;;  %v6715_v40 = vld [vmem:[#allocation6_spill] sm:$0xff] }
 0x702   : > { %v2148_v10 = vmul.f32 %v4900_v38, %v4406_v31  ;;  %v4902_v24 = vpop.eup %4901  ;;  %v6106_v31 = vld [vmem:[#allocation2 + $0x68] ss:$12 sps:$4 sm:$0xff]  }
 0x703   : > { %v2156_v48 = vpack.c.bf16 %v2147_v49, %v2146_v51  ;;  %v1657_v9 = vmul.f32 %v4902_v24, %v5805_v19  ;;  %v6716_v51 = vld [vmem:[#allocation7_spill] sm:$0xff] }
 0x704   : > { %v2157_v11 = vpack.c.bf16 %v2149_v57, %v2148_v10  ;;  %v6717_v10 = vld [vmem:[#allocation9_spill] sm:$0xff] }
 0x705   : > { %4424 = vmatprep.mubr.msk.bf16.mxu0 %vm1213_vm0, %v2156_v48 }
 0x706   : > { %4425 = vmatmul.mubr.msk.bf16.gmra.mxu0 %vm1213_vm0, %v2157_v11  ;;  %v4904_v63 = vpop.eup %4903 }
 0x707   : > { %4464 = vmatprep.mubr.msk.bf16.mxu0 %vm1213_vm0, %v5949_v28  ;;  %v6049_v28 = vld [vmem:[#allocation2 + $0x80] ss:$12 sps:$4 sm:$0xff]   ;;  %v1658_v52 = vmul.f32 %v4904_v63, %v5799_v61 }
 0x709   : > { %3067 = vrot.lane.b32.xlu0 %v5065_v55, %s5158_s28 }
 0x70c   : > { %1461 = vadd.xlane.f32.xlu1 %v5776_v6  ;;  %v1446_v6 = vpop.xlane.xlu0 %1445 }
 0x70d   : > { %3069 = vrot.lane.b32.xlu0 %v5066_v60, %s5158_s28  ;;  %4905 = vrcp.f32 %v1446_v6 }
 0x70e   : > { %4465 = vmatmul.mubr.msk.bf16.vlgmr.msra.gmra.mxu0 %vm1213_vm0, %v5919_v44  ;;  %v3132_v44 = vsel %vm1213_vm0, %v3086_v29, 0 }
 0x70f   : > { %4533 = vmatpush3.bf16.xpose.msra.mxu0 %v3135_v15  ;;  %4468 = vmatprep.mubr.msk.bf16.mxu0 %vm1213_vm0, %v5951_v17  ;;  %v3129_v17 = vsel %vm1213_vm0, %v3084_v50, 0 }
 0x710   : > { %4641 = vmatprep.subr.msk.bf16.mxu0 %vm1213_vm0, %v3086_v29  ;;  %1465 = vadd.xlane.f32.xlu1 %v5772_v56  ;;  %v1448_v56 = vpop.xlane.xlu0 %1447  ;;  %v5071_v29 = vld [vmem:[#allocation2 + $0xa8] ss:$12 sps:$4 sm:$0xff]  }
 0x711   : > { %2736 = vrot.lane.b32.xlu0 %v6049_v28, %s5157_s17 }
 0x714   : > { %v1450_v39 = vpop.xlane.xlu0 %1449 }
 0x715   : > { %2732 = vrot.lane.b32.xlu0 %v6053_v54, %s5157_s17  ;;  %4907 = vrcp.f32 %v1450_v39 }
 0x716   : > { %4469 = vmatmul.mubr.msk.bf16.gmra.mxu0 %vm1213_vm0, %v5925_v4  ;;  %v5069_v4 = vld [vmem:[#allocation2 + $0x60] ss:$12 sps:$4 sm:$0xff]   ;;  %4909 = vrcp.f32 %v1448_v56 }
 0x717   : > { %4535 = vmatpush3.bf16.xpose.msra.mxu0 %v3132_v44  ;;  %4472 = vmatprep.mubr.msk.bf16.mxu0 %vm1213_vm0, %v5953_v46  ;;  %v3078_v46 = vpop.permute.xlu1 %3077 }
 0x718   : > { %4642 = vmatprep.subr.msk.bf16.mxu0 %vm1213_vm0, %v3084_v50  ;;  %v3058_v7 = vpop.permute.xlu0 %3057  ;;  %v3120_v36 = vsel %vm1213_vm0, %v3078_v46, 0 }
 0x71a   : > { %v4906_v22 = vpop.eup %4905 }
 0x71b   : > { %v1659_v59 = vmul.f32 %v4906_v22, %v5803_v47 }
 0x71d   : > { %v1673_v20 = vpack.c.bf16 %v1659_v59, %v1658_v52 }
 0x71e   : > { %4473 = vmatmul.mubr.msk.bf16.gmra.mxu0 %vm1213_vm0, %v5955_v53  ;;  %v3126_v53 = vsel %vm1213_vm0, %v6026_v23, 0 }
 0x71f   : > { %4537 = vmatpush3.bf16.xpose.msra.mxu0 %v3129_v17  ;;  %4476 = vmatprep.mubr.msk.bf16.mxu0 %vm1213_vm0, %v5984_v58 }
 0x720   : > { %4643 = vmatprep.subr.msk.bf16.mxu0 %vm1213_vm0, %v6026_v23 }
 0x721   : > { %3065 = vrot.lane.b32.xlu1 %v5069_v4, %s5158_s28 }
 0x726   : > { %4477 = vmatmul.mubr.msk.bf16.gmra.mxu0 %vm1213_vm0, %v5988_v12  ;;  %v4908_v12 = vpop.eup %4907 }
 0x727   : > { %4539 = vmatpush3.bf16.xpose.msra.mxu0 %v3126_v53  ;;  %v1440_v58 = vpop.xlane.xlu1 %1439  ;;  %4548 = vmatprep.mubr.msk.bf16.mxu0 %vm1213_vm0, %v3058_v7  ;;  %v4910_v13 = vpop.eup %4909  ;;  %v1661_v3 = vmul.f32 %v4908_v12, %v5813_v43  ;;  %v6719_v53 = vld [vmem:[#allocation10_spill] sm:$0xff]  ;;  %v6720_v12 = vld [vmem:[#allocation12_spill] sm:$0xff] }
 0x728   : > { %4911 = vrcp.f32 %v1440_v58  ;;  %4644 = vmatprep.subr.msk.bf16.mxu0 %vm1213_vm0, %v3080_v62  ;;  %v1660_v34 = vmul.f32 %v4910_v13, %v5809_v37 }
 0x72a   : > { %v1674_v47 = vpack.c.bf16 %v1661_v3, %v1660_v34 }
 0x72b   : > { %v3074_v19 = vpop.permute.xlu1 %3073 }
 0x72c   : > { %v3114_v61 = vsel %vm1213_vm0, %v3074_v19, 0 }
 0x72f   : > { %4541 = vmatpush3.bf16.xpose.msra.mxu0 %v3123_v41 }
 0x730   : > { %4645 = vmatprep.subr.msk.bf16.mxu0 %vm1213_vm0, %v3078_v46  ;;  %v6718_v46 = vld [vmem:[#allocation8_spill] sm:$0xff] }
 0x735   : > { %v4912_v8 = vpop.eup %4911 }
 0x736   : > { %v1656_v2 = vmul.f32 %v4912_v8, %v5801_v0  ;;  %v3117_v0 = vsel %vm1213_vm0, %v6032_v18, 0  ;;  %v6721_v8 = vld [vmem:[#allocation14_spill] sm:$0xff] }
 0x737   : > { %4543 = vmatpush3.bf16.xpose.msra.mxu0 %v3120_v36  ;;  %v1454_v37 = vpop.xlane.xlu0 %1453 }
 0x738   : > { %4646 = vmatprep.subr.msk.bf16.mxu0 %vm1213_vm0, %v6032_v18  ;;  %v1672_v33 = vpack.c.bf16 %v1657_v9, %v1656_v2 }
 0x73a   : > { %4432 = vmatprep.mubr.msk.bf16.mxu1 %vm1213_vm0, %v1672_v33 }
 0x73b   : > { %4433 = vmatmul.mubr.msk.bf16.vlgmr.msra.gmra.mxu1 %vm1213_vm0, %v1673_v20  ;;  %v1456_v43 = vpop.xlane.xlu0 %1455 }
 0x73c   : > { %4436 = vmatprep.mubr.msk.bf16.mxu1 %vm1213_vm0, %v1674_v47 }
 0x73f   : > { %4545 = vmatpush3.bf16.xpose.msra.mxu0 %v3117_v0  ;;  %v1458_v25 = vpop.xlane.xlu0 %1457 }
 0x740   : > { %4647 = vmatprep.subr.msk.bf16.mxu0 %vm1213_vm0, %v3074_v19  ;;  %4913 = vrcp.f32 %v1458_v25  ;;  %v6122_v15 = vpop.f32.mrf.mxu0 }
 0x741   : > { %4915 = vrcp.f32 %v1454_v37 }
 0x742   : > { %4917 = vrcp.f32 %v1456_v43  ;;  %v6126_v56 = vpop.f32.mrf.mxu0 }
 0x743   : > { %v1460_v27 = vpop.xlane.xlu0 %1459 }
 0x744   : > { %v6129_v4 = vpop.f32.mrf.mxu0 }
 0x745   : > { %1469 = vadd.xlane.f32.xlu1 %v5785_v16  ;;  %v6101_v16 = vld [vmem:[#allocation2 + $0x98] ss:$12 sps:$4 sm:$0xff]  }
 0x746   : > { %v6133_v22 = vpop.f32.mrf.mxu0 }
 0x747   : > { %4547 = vmatpush3.bf16.xpose.msra.mxu0 %v3114_v61  ;;  %v3064_v62 = vpop.permute.xlu0 %3063 }
 0x74d   : > { %v4914_v1 = vpop.eup %4913 }
 0x74e   : > { %v4916_v42 = vpop.eup %4915  ;;  %v1665_v57 = vmul.f32 %v4914_v1, %v5821_v26 }
 0x74f   : > { %v4918_v14 = vpop.eup %4917  ;;  %v1663_v49 = vmul.f32 %v4916_v42, %v6716_v51  ;;  %v6729_v51 = vld [vmem:[#allocation11_spill] sm:$0xff] }
 0x750   : > { %v1664_v48 = vmul.f32 %v4918_v14, %v6717_v10  ;;  %v6730_v10 = vld [vmem:[#allocation13_spill] sm:$0xff] }
 0x752   : > { %v1676_v11 = vpack.c.bf16 %v1665_v57, %v1664_v48 }
 0x756   : > { %2740 = vrot.lane.b32.xlu1 %v6096_v5, %s5157_s17 }
 0x75a   : > { %3071 = vrot.lane.b32.xlu1 %v5071_v29, %s5158_s28 }
 0x75c   : > { %v1452_v35 = vpop.xlane.xlu1 %1451 }
 0x75d   : > { %4919 = vrcp.f32 %v1452_v35 }
 0x75e   : > { %2738 = vrot.lane.b32.xlu1 %v6101_v16, %s5157_s17  ;;  %4921 = vrcp.f32 %v1460_v27 }
 0x760   : > { %v3060_v23 = vpop.permute.xlu1 %3059 }
 0x761   : > { %4549 = vmatmul.mubr.msk.bf16.vlgmr.msra.gmra.mxu0 %vm1213_vm0, %v3060_v23 }
 0x762   : > { %2734 = vrot.lane.b32.xlu1 %v6106_v31, %s5157_s17 }
 0x764   : > { %v3062_v50 = vpop.permute.xlu1 %3061 }
 0x765   : > { %4552 = vmatprep.mubr.msk.bf16.mxu0 %vm1213_vm0, %v3062_v50 }
 0x766   : > { %2730 = vrot.lane.b32.xlu1 %v6111_v30, %s5157_s17 }
 0x769   : > { %4553 = vmatmul.mubr.msk.bf16.gmra.mxu0 %vm1213_vm0, %v3064_v62 }
 0x76a   : > { %v4920_v45 = vpop.eup %4919 }
 0x76b   : > { %v1662_v38 = vmul.f32 %v4920_v45, %v6715_v40  ;;  %v4922_v17 = vpop.eup %4921 }
 0x76c   : > { %v1666_v7 = vmul.f32 %v4922_v17, %v6718_v46 }
 0x76d   : > { %v1675_v18 = vpack.c.bf16 %v1663_v49, %v1662_v38 }
 0x76f   : > { %4437 = vmatmul.mubr.msk.bf16.gmra.mxu1 %vm1213_vm0, %v1675_v18 }
 0x770   : > { %4440 = vmatprep.mubr.msk.bf16.mxu1 %vm1213_vm0, %v1676_v11 }
 0x778   : > { %v1464_v21 = vpop.xlane.xlu0 %1463 }
 0x77c   : > { %v1468_v55 = vpop.xlane.xlu0 %1467 }
 0x77d   : > { %v6138_v36 = vpop.f32.mrf.mxu0 }
 0x77f   : > { %v6141_v9 = vpop.f32.mrf.mxu0 }
 0x780   : > { %v3068_v32 = vpop.permute.xlu0 %3067 }
 0x781   : > { %v6143_v3 = vpop.f32.mrf.mxu0 }
 0x783   : > { %v6145_v52 = vpop.f32.mrf.mxu0 }
 0x784   : > { %v3070_v44 = vpop.permute.xlu0 %3069 }
 0x788   : > { %v2737_v40 = vpop.permute.xlu0 %2736 }
 0x78d   : > { %v6147_v33 = vpop.f32.mrf.mxu0 }
 0x78f   : > { %v6149_v34 = vpop.f32.mrf.mxu0 }
 0x790   : > { %6722 = vst [vmem:[#allocation6_spill] sm:$0xff] %v6149_v34 }
 0x791   : > { %v6151_v20 = vpop.f32.mrf.mxu0 }
 0x792   : > { %6723 = vst [vmem:[#allocation7_spill] sm:$0xff] %v6151_v20 }
 0x793   : > { %v6153_v47 = vpop.f32.mrf.mxu0 }
 0x794   : > { %6724 = vst [vmem:[#allocation9_spill] sm:$0xff] %v6153_v47 }
 0x795   : > { %v1462_v60 = vpop.xlane.xlu1 %1461 }
 0x796   : > { %4923 = vrcp.f32 %v1462_v60 }
 0x797   : > { %4925 = vrcp.f32 %v1464_v21 }
 0x799   : > { %v1466_v26 = vpop.xlane.xlu1 %1465 }
 0x79a   : > { %4927 = vrcp.f32 %v1466_v26 }
 0x79b   : > { %4929 = vrcp.f32 %v1468_v55 }
 0x79d   : > { %v3066_v6 = vpop.permute.xlu1 %3065 }
 0x79e   : > { %4556 = vmatprep.mubr.msk.bf16.mxu0 %vm1213_vm0, %v3066_v6 }
 0x79f   : > { %4557 = vmatmul.mubr.msk.bf16.gmra.mxu0 %vm1213_vm0, %v3068_v32  ;;  %v2733_v32 = vpop.permute.xlu0 %2732 }
 0x7a0   : > { %4560 = vmatprep.mubr.msk.bf16.mxu0 %vm1213_vm0, %v3070_v44 }
 0x7a3   : > { %v4924_v39 = vpop.eup %4923 }
 0x7a4   : > { %v1667_v58 = vmul.f32 %v4924_v39, %v6719_v53  ;;  %v4926_v41 = vpop.eup %4925  ;;  %v6219_v53 = vld [vmem:[#allocation2 + $0x20] ss:$12 sps:$4 sm:$0xff]  }
 0x7a5   : > { %v1668_v13 = vmul.f32 %v4926_v41, %v6720_v12 }
 0x7a6   : > { %v1677_v24 = vpack.c.bf16 %v1667_v58, %v1666_v7  ;;  %v6215_v7 = vld [vmem:[#allocation2 + $0x8] ss:$12 sps:$4 sm:$0xff]  }
 0x7a7   : > { %v4928_v63 = vpop.eup %4927 }
 0x7a8   : > { %4441 = vmatmul.mubr.msk.bf16.gmra.mxu1 %vm1213_vm0, %v1677_v24  ;;  %v1669_v59 = vmul.f32 %v4928_v63, %v6721_v8  ;;  %v4930_v62 = vpop.eup %4929 }
 0x7a9   : > { %v1670_v49 = vmul.f32 %v4930_v62, %v6729_v51 }
 0x7aa   : > { %v1678_v2 = vpack.c.bf16 %v1669_v59, %v1668_v13 }
 0x7ac   : > { %4444 = vmatprep.mubr.msk.bf16.mxu1 %vm1213_vm0, %v1678_v2 }
 0x7c6   : > { %v6155_v0 = vpop.f32.mrf.mxu0 }
 0x7c7   : > { %6725 = vst [vmem:[#allocation8_spill] sm:$0xff] %v6155_v0 }
 0x7c8   : > { %v6157_v19 = vpop.f32.mrf.mxu0 }
 0x7c9   : > { %6726 = vst [vmem:[#allocation10_spill] sm:$0xff] %v6157_v19 }
 0x7ca   : > { %v6159_v61 = vpop.f32.mrf.mxu0 }
 0x7cb   : > { %6727 = vst [vmem:[#allocation12_spill] sm:$0xff] %v6159_v61 }
 0x7cc   : > { %v6161_v37 = vpop.f32.mrf.mxu0 }
 0x7cd   : > { %6728 = vst [vmem:[#allocation14_spill] sm:$0xff] %v6161_v37 }
 0x7ce   : > { %v1470_v43 = vpop.xlane.xlu1 %1469  ;;  %v6163_v25 = vpop.f32.mrf.mxu0 }
 0x7cf   : > { %4931 = vrcp.f32 %v1470_v43  ;;  %2610 = vmax.xlane.f32.xlu1 %v6163_v25 }
 0x7d0   : > { %v6166_v29 = vpop.f32.mrf.mxu0 }
 0x7d1   : > { %2606 = vmax.xlane.f32.xlu0 %v6166_v29 }
 0x7d2   : > { %v2741_v35 = vpop.permute.xlu1 %2740  ;;  %v6169_v23 = vpop.f32.mrf.mxu0 }
 0x7d3   : > { %4480 = vmatprep.subr.bf16.mxu1 %v2741_v35  ;;  %2612 = vmax.xlane.f32.xlu1 %v6169_v23 }
 0x7d4   : > { %v6172_v27 = vpop.f32.mrf.mxu0  ;;  %4481 = vmatpush3.bf16.msra.mxu1 %v2741_v35 }
 0x7d6   : > { %v3072_v50 = vpop.permute.xlu1 %3071  ;;  %v6174_v1 = vpop.f32.mrf.mxu0 }
 0x7d7   : > { %2608 = vmax.xlane.f32.xlu1 %v6172_v27  ;;  %2618 = vmax.xlane.f32.xlu0 %v6174_v1 }
 0x7d8   : > { %4561 = vmatmul.mubr.msk.bf16.gmra.mxu0 %vm1213_vm0, %v3072_v50  ;;  %v6179_v42 = vpop.f32.mrf.mxu0 }
 0x7da   : > { %v2739_v14 = vpop.permute.xlu1 %2738  ;;  %v6181_v45 = vpop.f32.mrf.mxu0 }
 0x7db   : > { %2614 = vmax.xlane.f32.xlu1 %v6179_v42  ;;  %4482 = vmatprep.subr.bf16.mxu1 %v2739_v14 }
 0x7dc   : > { %v4932_v57 = vpop.eup %4931  ;;  %v6184_v38 = vpop.f32.mrf.mxu0  ;;  %4483 = vmatpush3.bf16.msra.mxu1 %v2739_v14 }
 0x7dd   : > { %2616 = vmax.xlane.f32.xlu0 %v6184_v38  ;;  %4484 = vmatprep.subr.bf16.mxu1 %v2737_v40  ;;  %v1671_v48 = vmul.f32 %v4932_v57, %v6730_v10 }
 0x7de   : > { %v6189_v18 = vpop.f32.mrf.mxu0  ;;  %v2735_v55 = vpop.permute.xlu1 %2734 }
 0x7df   : > { %2620 = vmax.xlane.f32.xlu1 %v6181_v45  ;;  %v1679_v11 = vpack.c.bf16 %v1671_v48, %v1670_v49 }
 0x7e0   : > { %v6192_v21 = vpop.f32.mrf.mxu0  ;;  %4485 = vmatpush3.bf16.msra.mxu1 %v2737_v40 }
 0x7e1   : > { %2626 = vmax.xlane.f32.xlu0 %v6189_v18  ;;  %4445 = vmatmul.mubr.msk.bf16.gmra.mxu1 %vm1213_vm0, %v1679_v11 }
 0x7e2   : > { %4486 = vmatprep.subr.bf16.mxu1 %v2735_v55  ;;  %v6196_v60 = vpop.f32.mrf.mxu0  ;;  %v2731_v44 = vpop.permute.xlu1 %2730 }
 0x7e3   : > { %2622 = vmax.xlane.f32.xlu1 %v6192_v21 }
 0x7e4   : > { %v6199_v26 = vpop.f32.mrf.mxu0  ;;  %4487 = vmatpush3.bf16.msra.mxu1 %v2735_v55 }
 0x7e5   : > { %2624 = vmax.xlane.f32.xlu0 %v6199_v26  ;;  %4488 = vmatprep.subr.bf16.mxu1 %v2733_v32 }
 0x7e6   : > { %v6202_v6 = vpop.f32.mrf.mxu0 }
 0x7e7   : > { %2628 = vmax.xlane.f32.xlu1 %v6196_v60 }
 0x7e8   : > { %v6205_v17 = vpop.f32.mrf.mxu0  ;;  %4489 = vmatpush3.bf16.msra.mxu1 %v2733_v32 }
 0x7e9   : > { %2634 = vmax.xlane.f32.xlu0 %v6202_v6  ;;  %4490 = vmatprep.subr.bf16.mxu1 %v2731_v44 }
 0x7ea   : > { %v6208_v39 = vpop.f32.mrf.mxu0 }
 0x7eb   : > { %2630 = vmax.xlane.f32.xlu1 %v6205_v17 }
 0x7ec   : > { %v6211_v46 = vpop.f32.mrf.mxu0  ;;  %4491 = vmatpush3.bf16.msra.mxu1 %v2731_v44 }
 0x7ed   : > { %2632 = vmax.xlane.f32.xlu0 %v6211_v46 }
 0x7ef   : > { %2636 = vmax.xlane.f32.xlu1 %v6208_v39 }
 0x800   : > { %2726 = vrot.lane.b32.xlu1 %v6215_v7, %s5157_s17 }
 0x803   : > { %2728 = vrot.lane.b32.xlu0 %v6219_v53, %s5157_s17 }
 0x804   : > { %3366 = vrot.lane.b32.xlu1 %v6101_v16, %s5158_s28 }
 0x807   : > { %3368 = vrot.lane.b32.xlu0 %v6096_v5, %s5158_s28 }
 0x808   : > { %3362 = vrot.lane.b32.xlu1 %v6106_v31, %s5158_s28 }
 0x80b   : > { %3364 = vrot.lane.b32.xlu0 %v6049_v28, %s5158_s28 }
 0x80c   : > { %3358 = vrot.lane.b32.xlu1 %v6111_v30, %s5158_s28 }
 0x80f   : > { %3360 = vrot.lane.b32.xlu0 %v6053_v54, %s5158_s28 }
 0x821   : > { %v6235_v58 = vpop.f32.mrf.mxu0 }
 0x823   : > { %v6237_v41 = vpop.f32.mrf.mxu0 }
 0x825   : > { %v6239_v16 = vpop.f32.mrf.mxu0 }
 0x827   : > { %v6241_v24 = vpop.f32.mrf.mxu0 }
 0x829   : > { %v6243_v5 = vpop.f32.mrf.mxu0 }
 0x82b   : > { %v6247_v28 = vpop.f32.mrf.mxu0 }
 0x82d   : > { %v6251_v54 = vpop.f32.mrf.mxu0 }
 0x82e   : > { %3238 = vmax.xlane.f32.xlu0 %v6235_v58 }
 0x82f   : > { %v6255_v31 = vpop.f32.mrf.mxu0 }
 0x830   : > { %3240 = vmax.xlane.f32.xlu1 %v6239_v16 }
 0x832   : > { %3234 = vmax.xlane.f32.xlu0 %v6237_v41 }
 0x834   : > { %3236 = vmax.xlane.f32.xlu1 %v6241_v24 }
 0x836   : > { %3246 = vmax.xlane.f32.xlu0 %v6243_v5 }
 0x838   : > { %3242 = vmax.xlane.f32.xlu1 %v6247_v28 }
 0x83a   : > { %3244 = vmax.xlane.f32.xlu0 %v6255_v31 }
 0x83c   : > { %3248 = vmax.xlane.f32.xlu1 %v6251_v54 }
 0x858   : > { %v2611_v30 = vpop.xlane.xlu1 %2610 }
 0x859   : > { %v2640_v48 = vsub.f32 %v6163_v25, %v2611_v30 }
 0x85a   : > { %v2607_v63 = vpop.xlane.xlu0 %2606 }
 0x85b   : > { %v2638_v12 = vsub.f32 %v6166_v29, %v2607_v63 }
 0x85c   : > { %v2613_v13 = vpop.xlane.xlu1 %2612 }
 0x85d   : > { %v2654_v59 = vmul.f32 1.442695, %v2638_v12  ;;  %v2658_v12 = vmul.f32 1.442695, %v2640_v48 }
 0x85f   : > { %v6260_v8 = vpop.f32.mrf.mxu0  ;;  %4933 = vpow2.f32 %v2654_v59 }
 0x860   : > { %v2609_v2 = vpop.xlane.xlu1 %2608  ;;  %3254 = vmax.xlane.f32.xlu0 %v6260_v8  ;;  %v2619_v50 = vpop.xlane.xlu0 %2618 }
 0x861   : > { %v2639_v43 = vsub.f32 %v6172_v27, %v2609_v2  ;;  %v6264_v35 = vpop.f32.mrf.mxu0  ;;  %v2641_v27 = vsub.f32 %v6169_v23, %v2613_v13 }
 0x862   : > { %3250 = vmax.xlane.f32.xlu1 %v6264_v35 }
 0x863   : > { %v2656_v62 = vmul.f32 1.442695, %v2639_v43  ;;  %v6267_v14 = vpop.f32.mrf.mxu0  ;;  %v2660_v32 = vmul.f32 1.442695, %v2641_v27 }
 0x864   : > { %v2615_v57 = vpop.xlane.xlu1 %2614 }
 0x865   : > { %4935 = vpow2.f32 %v2656_v62  ;;  %v6269_v29 = vpop.f32.mrf.mxu0  ;;  %v2642_v11 = vsub.f32 %v6179_v42, %v2615_v57  ;;  %v2644_v42 = vsub.f32 %v6174_v1, %v2619_v50 }
 0x866   : > { %3256 = vmax.xlane.f32.xlu1 %v6267_v14  ;;  %3252 = vmax.xlane.f32.xlu0 %v6269_v29  ;;  %v2617_v40 = vpop.xlane.xlu0 %2616  ;;  %4937 = vpow2.f32 %v2660_v32 }
 0x867   : > { %v2643_v49 = vsub.f32 %v6184_v38, %v2617_v40  ;;  %v2662_v59 = vmul.f32 1.442695, %v2642_v11 }
 0x868   : > { %v2621_v51 = vpop.xlane.xlu1 %2620 }
 0x869   : > { %v2664_v44 = vmul.f32 1.442695, %v2643_v49  ;;  %v2645_v62 = vsub.f32 %v6181_v45, %v2621_v51  ;;  %v2666_v51 = vmul.f32 1.442695, %v2644_v42 }
 0x86a   : > { %v2627_v10 = vpop.xlane.xlu0 %2626 }
 0x86b   : > { %4939 = vpow2.f32 %v2664_v44  ;;  %v2668_v40 = vmul.f32 1.442695, %v2645_v62  ;;  %v2648_v11 = vsub.f32 %v6189_v18, %v2627_v10  ;;  %v4769_v44 = vld [vmem:[%s6701_s4 + $0x28] sm:$0xff]   ;;  %v4770_v62 = vld [vmem:[%s6701_s4 + $0x20] sm:$0xff]  }
 0x86c   : > { %v2623_v55 = vpop.xlane.xlu1 %2622  ;;  %v6277_v43 = vpop.eup %4933  ;;  %4941 = vpow2.f32 %v2658_v12 }
 0x86d   : > { %4943 = vpow2.f32 %v2662_v59  ;;  %v2646_v13 = vsub.f32 %v6192_v21, %v2623_v55 }
 0x86e   : > { %v2625_v63 = vpop.xlane.xlu0 %2624  ;;  %4945 = vpow2.f32 %v2668_v40 }
 0x86f   : > { %v2647_v38 = vsub.f32 %v6199_v26, %v2625_v63  ;;  %v2670_v49 = vmul.f32 1.442695, %v2646_v13 }
 0x870   : > { %v2629_v2 = vpop.xlane.xlu1 %2628 }
 0x871   : > { %v2672_v27 = vmul.f32 1.442695, %v2647_v38  ;;  %v2649_v26 = vsub.f32 %v6196_v60, %v2629_v2 }
 0x872   : > { %v6280_v23 = vpop.eup %4935  ;;  %v2635_v25 = vpop.xlane.xlu0 %2634 }
 0x873   : > { %v2718_v30 = vpack.c.bf16 %v6280_v23, %v6277_v43  ;;  %4947 = vpow2.f32 %v2672_v27  ;;  %v2676_v32 = vmul.f32 1.442695, %v2649_v26  ;;  %v4938_v60 = vpop.eup %4937  ;;  %v2652_v42 = vsub.f32 %v6202_v6, %v2635_v25 }
 0x874   : > { %v2631_v57 = vpop.xlane.xlu1 %2630  ;;  %4949 = vpow2.f32 %v2666_v51 }
 0x875   : > { %4496 = vmatprep.mubr.bf16.mxu1 %v2718_v30  ;;  %4951 = vpow2.f32 %v2670_v49  ;;  %v2650_v21 = vsub.f32 %v6205_v17, %v2631_v57  ;;  %v2682_v57 = vmul.f32 1.442695, %v2652_v42 }
 0x876   : > { %v2633_v45 = vpop.xlane.xlu0 %2632  ;;  %4953 = vpow2.f32 %v2676_v32 }
 0x877   : > { %v2651_v1 = vsub.f32 %v6211_v46, %v2633_v45  ;;  %v2674_v46 = vmul.f32 1.442695, %v2648_v11  ;;  %v2678_v2 = vmul.f32 1.442695, %v2650_v21 }
 0x878   : > { %v2637_v48 = vpop.xlane.xlu1 %2636  ;;  %v6294_v12 = vpop.eup %4939 }
 0x879   : > { %v2680_v63 = vmul.f32 1.442695, %v2651_v1  ;;  %v4942_v59 = vpop.eup %4941  ;;  %v2653_v17 = vsub.f32 %v6208_v39, %v2637_v48 }
 0x87a   : > { %v2729_v50 = vpop.permute.xlu0 %2728  ;;  %v4944_v18 = vpop.eup %4943  ;;  %v2719_v10 = vpack.c.bf16 %v4938_v60, %v4942_v59 }
 0x87b   : > { %4492 = vmatprep.subr.bf16.mxu1 %v2729_v50  ;;  %4955 = vpow2.f32 %v2680_v63  ;;  %v2720_v38 = vpack.c.bf16 %v6294_v12, %v4944_v18  ;;  %v2684_v30 = vmul.f32 1.442695, %v2653_v17  ;;  %v4946_v13 = vpop.eup %4945 }
 0x87c   : > { %v2727_v55 = vpop.permute.xlu1 %2726  ;;  %4493 = vmatpush3.bf16.msra.mxu1 %v2729_v50  ;;  %4957 = vpow2.f32 %v2674_v46 }
 0x87d   : > { %4494 = vmatprep.subr.bf16.mxu1 %v2727_v55  ;;  %4959 = vpow2.f32 %v2678_v2 }
 0x87e   : > { %v6302_v27 = vpop.permute.xlu0 %3368  ;;  %4961 = vpow2.f32 %v2684_v30 }
 0x87f   : > { %4963 = vpow2.f32 %v2682_v57 }
 0x880   : > { %4495 = vmatpush3.bf16.msra.mxu1 %v2727_v55  ;;  %v4948_v39 = vpop.eup %4947  ;;  %v6319_v2 = vpop.permute.xlu1 %3366 }
 0x881   : > { %4512 = vmatprep.subr.bf16.mxu1 %v4769_v44  ;;  %v4950_v40 = vpop.eup %4949 }
 0x882   : > { %v4952_v45 = vpop.eup %4951  ;;  %v2721_v51 = vpack.c.bf16 %v4946_v13, %v4950_v40  ;;  %v6321_v17 = vpop.permute.xlu0 %3364 }
 0x883   : > { %4497 = vmatmul.mubr.bf16.vlgmr.msra.gmra.mxu1 %v2719_v10  ;;  %v2722_v49 = vpack.c.bf16 %v4948_v39, %v4952_v45  ;;  %v4954_v6 = vpop.eup %4953 }
 0x884   : > { %4500 = vmatprep.mubr.bf16.mxu1 %v2720_v38  ;;  %4513 = vmatpush3.bf16.msra.mxu1 %v4769_v44  ;;  %v6323_v10 = vpop.permute.xlu1 %3362 }
 0x885   : > { %4514 = vmatprep.subr.bf16.mxu1 %v4770_v62 }
 0x888   : > { %4515 = vmatpush3.bf16.msra.mxu1 %v4770_v62  ;;  %v4956_v25 = vpop.eup %4955  ;;  %v6326_v62 = vpop.permute.xlu0 %3360 }
 0x889   : > { %4564 = vmatprep.subr.bf16.mxu1 %v6302_v27  ;;  %v4958_v48 = vpop.eup %4957 }
 0x88a   : > { %v4960_v26 = vpop.eup %4959  ;;  %v2723_v1 = vpack.c.bf16 %v4954_v6, %v4958_v48 }
 0x88b   : > { %4501 = vmatmul.mubr.bf16.gmra.mxu1 %v2721_v51  ;;  %v2724_v50 = vpack.c.bf16 %v4956_v25, %v4960_v26  ;;  %v4962_v11 = vpop.eup %4961 }
 0x88c   : > { %4504 = vmatprep.mubr.bf16.mxu1 %v2722_v49  ;;  %v4964_v21 = vpop.eup %4963 }
 0x88d   : > { %v2725_v32 = vpack.c.bf16 %v4962_v11, %v4964_v21 }
 0x893   : > { %4505 = vmatmul.mubr.bf16.gmra.mxu1 %v2723_v1 }
 0x894   : > { %4508 = vmatprep.mubr.bf16.mxu1 %v2724_v50 }
 0x898   : > { %v6305_v55 = vpop.f32.mrf.mxu0 }
 0x899   : > { %3262 = vmax.xlane.f32.xlu0 %v6305_v55 }
 0x89a   : > { %v6308_v44 = vpop.f32.mrf.mxu0 }
 0x89b   : > { %3258 = vmax.xlane.f32.xlu1 %v6308_v44  ;;  %4509 = vmatmul.mubr.bf16.gmra.mxu1 %v2725_v32 }
 0x89c   : > { %v6311_v63 = vpop.f32.mrf.mxu0 }
 0x89e   : > { %v6313_v46 = vpop.f32.mrf.mxu0 }
 0x89f   : > { %3264 = vmax.xlane.f32.xlu1 %v6311_v63  ;;  %3260 = vmax.xlane.f32.xlu0 %v6313_v46 }
 0x8a3   : > { %2690 = vadd.xlane.f32.xlu0 %v4942_v59  ;;  %2686 = vadd.xlane.f32.xlu1 %v6277_v43  ;;  %v6328_v59 = vpop.permute.xlu1 %3358 }
 0x8a7   : > { %2688 = vadd.xlane.f32.xlu0 %v6280_v23  ;;  %2692 = vadd.xlane.f32.xlu1 %v4938_v60 }
 0x8ab   : > { %2700 = vadd.xlane.f32.xlu1 %v4946_v13  ;;  %2698 = vadd.xlane.f32.xlu0 %v4950_v40 }
 0x8af   : > { %2694 = vadd.xlane.f32.xlu0 %v4944_v18  ;;  %2696 = vadd.xlane.f32.xlu1 %v6294_v12 }
 0x8b3   : > { %2708 = vadd.xlane.f32.xlu1 %v4954_v6  ;;  %2706 = vadd.xlane.f32.xlu0 %v4958_v48 }
 0x8b7   : > { %2702 = vadd.xlane.f32.xlu0 %v4952_v45  ;;  %2704 = vadd.xlane.f32.xlu1 %v4948_v39  ;;  %v3239_v43 = vpop.xlane.xlu0 %3238 }
 0x8b8   : > { %v3268_v23 = vsub.f32 %v6235_v58, %v3239_v43 }
 0x8b9   : > { %v3241_v60 = vpop.xlane.xlu1 %3240 }
 0x8ba   : > { %v3286_v38 = vmul.f32 1.442695, %v3268_v23  ;;  %v3269_v42 = vsub.f32 %v6239_v16, %v3241_v60 }
 0x8bb   : > { %2716 = vadd.xlane.f32.xlu1 %v4962_v11  ;;  %2714 = vadd.xlane.f32.xlu0 %v4964_v21  ;;  %v3235_v18 = vpop.xlane.xlu0 %3234 }
 0x8bc   : > { %v3288_v30 = vmul.f32 1.442695, %v3269_v42  ;;  %v3266_v12 = vsub.f32 %v6237_v41, %v3235_v18  ;;  %4965 = vpow2.f32 %v3286_v38 }
 0x8bd   : > { %v3237_v13 = vpop.xlane.xlu1 %3236 }
 0x8be   : > { %4967 = vpow2.f32 %v3288_v30  ;;  %v3282_v57 = vmul.f32 1.442695, %v3266_v12  ;;  %v3267_v40 = vsub.f32 %v6241_v24, %v3237_v13 }
 0x8bf   : > { %2710 = vadd.xlane.f32.xlu0 %v4960_v26  ;;  %2712 = vadd.xlane.f32.xlu1 %v4956_v25  ;;  %v3247_v39 = vpop.xlane.xlu0 %3246 }
 0x8c0   : > { %v3284_v58 = vmul.f32 1.442695, %v3267_v40  ;;  %4969 = vpow2.f32 %v3282_v57  ;;  %v3272_v45 = vsub.f32 %v6243_v5, %v3247_v39 }
 0x8c1   : > { %v3243_v16 = vpop.xlane.xlu1 %3242 }
 0x8c2   : > { %4971 = vpow2.f32 %v3284_v58  ;;  %v3270_v51 = vsub.f32 %v6247_v28, %v3243_v16  ;;  %v3294_v48 = vmul.f32 1.442695, %v3272_v45 }
 0x8c3   : > { %v3245_v49 = vpop.xlane.xlu0 %3244 }
 0x8c4   : > { %v3290_v6 = vmul.f32 1.442695, %v3270_v51  ;;  %v3271_v41 = vsub.f32 %v6255_v31, %v3245_v49  ;;  %v6394_v49 = vpop.f32.mrf.mxu1 }
 0x8c5   : > { %v3249_v1 = vpop.xlane.xlu1 %3248 }
 0x8c6   : > { %v3292_v50 = vmul.f32 1.442695, %v3271_v41  ;;  %v3273_v24 = vsub.f32 %v6251_v54, %v3249_v1  ;;  %4973 = vpow2.f32 %v3290_v6  ;;  %v6396_v6 = vpop.f32.mrf.mxu1 }
 0x8c8   : > { %4975 = vpow2.f32 %v3292_v50  ;;  %v3296_v25 = vmul.f32 1.442695, %v3273_v24  ;;  %v6398_v41 = vpop.f32.mrf.mxu1 }
 0x8c9   : > { %4977 = vpow2.f32 %v3294_v48  ;;  %v6338_v26 = vpop.eup %4965 }
 0x8ca   : > { %4979 = vpow2.f32 %v3296_v25  ;;  %v6400_v48 = vpop.f32.mrf.mxu1 }
 0x8cb   : > { %v6340_v5 = vpop.eup %4967 }
 0x8cc   : > { %v6402_v1 = vpop.f32.mrf.mxu1 }
 0x8cd   : > { %v6344_v11 = vpop.eup %4969 }
 0x8ce   : > { %v6404_v50 = vpop.f32.mrf.mxu1 }
 0x8cf   : > { %v6346_v31 = vpop.eup %4971 }
 0x8d0   : > { %3354 = vrot.lane.b32.xlu1 %v6215_v7, %s5158_s28  ;;  %v6406_v24 = vpop.f32.mrf.mxu1 }
 0x8d3   : > { %v6352_v21 = vpop.eup %4973 }
 0x8d5   : > { %v6354_v32 = vpop.eup %4975  ;;  %3356 = vrot.lane.b32.xlu0 %v6219_v53, %s5158_s28  ;;  %s256_s28 = sand.u32 1, %s5137_s22  }
 0x8d6   : > { %v6358_v43 = vpop.eup %4977  ;;  %s3855_s30 = sshll.u32 %s256_s28, 7  ;;  %s6652_s24 = scalar_lea.sflag [#allocation4], %s256_s28 }
 0x8d7   : > { %v6362_v60 = vpop.eup %4979  ;;  %s6581_s12 = scalar_lea.vmem [#allocation3], %s3855_s30 }
 0x8d8   : > { %s3773_s14 = sshll.u32 %s6581_s12, 4  ;;  %s6645_s14 = int_to_ptr.vmem [resolvable:$true] %s3773_s14 }
 0x8d9   : > { %p5084_p1 = scmp.lt.s32.totalorder %s6645_s14, %s5082_s20 }
 0x8e9   : > { %v3255_v38 = vpop.xlane.xlu0 %3254 }
 0x8ea   : > { %v3276_v42 = vsub.f32 %v6260_v8, %v3255_v38 }
 0x8eb   : > { %v3251_v18 = vpop.xlane.xlu1 %3250 }
 0x8ec   : > { %v3274_v30 = vsub.f32 %v6264_v35, %v3251_v18  ;;  %v3302_v12 = vmul.f32 1.442695, %v3276_v42  ;;  %v6409_v18 = vpop.f32.mrf.mxu1 }
 0x8ee   : > { %v3298_v13 = vmul.f32 1.442695, %v3274_v30  ;;  %4981 = vpow2.f32 %v3302_v12  ;;  %v6412_v12 = vpop.f32.mrf.mxu1 }
 0x8ef   : > { %v3257_v57 = vpop.xlane.xlu1 %3256  ;;  %v3253_v53 = vpop.xlane.xlu0 %3252 }
 0x8f0   : > { %v3277_v40 = vsub.f32 %v6267_v14, %v3257_v57  ;;  %v3275_v39 = vsub.f32 %v6269_v29, %v3253_v53  ;;  %4983 = vpow2.f32 %v3298_v13 }
 0x8f2   : > { %v3304_v58 = vmul.f32 1.442695, %v3277_v40  ;;  %v3300_v45 = vmul.f32 1.442695, %v3275_v39 }
 0x8f4   : > { %4985 = vpow2.f32 %v3304_v58  ;;  %3316 = vadd.xlane.f32.xlu0 %v6346_v31  ;;  %3314 = vadd.xlane.f32.xlu1 %v6344_v11 }
 0x8f5   : > { %4987 = vpow2.f32 %v3300_v45  ;;  %v6416_v45 = vpop.f32.mrf.mxu1 }
 0x8f6   : > { %6731 = vst [vmem:[#allocation11_spill] sm:$0xff] %v6416_v45 }
 0x8f8   : > { %3318 = vadd.xlane.f32.xlu0 %v6338_v26  ;;  %3320 = vadd.xlane.f32.xlu1 %v6340_v5 }
 0x8fb   : > { %v6376_v8 = vpop.eup %4981 }
 0x8fc   : > { %3322 = vadd.xlane.f32.xlu0 %v6352_v21  ;;  %3324 = vadd.xlane.f32.xlu1 %v6354_v32 }
 0x8fd   : > { %v6378_v35 = vpop.eup %4983 }
 0x900   : > { %3326 = vadd.xlane.f32.xlu0 %v6358_v43  ;;  %3328 = vadd.xlane.f32.xlu1 %v6362_v60 }
 0x901   : > { %v6382_v14 = vpop.eup %4985 }
 0x902   : > { %v6384_v29 = vpop.eup %4987 }
 0x904   : > { %3330 = vadd.xlane.f32.xlu0 %v6378_v35  ;;  %3332 = vadd.xlane.f32.xlu1 %v6384_v29 }
 0x908   : > { %3334 = vadd.xlane.f32.xlu0 %v6376_v8  ;;  %3336 = vadd.xlane.f32.xlu1 %v6382_v14 }
 0x922   : > { %v3263_v25 = vpop.xlane.xlu0 %3262 }
 0x923   : > { %v3280_v38 = vsub.f32 %v6305_v55, %v3263_v25 }
 0x924   : > { %v3259_v42 = vpop.xlane.xlu1 %3258 }
 0x925   : > { %v3278_v30 = vsub.f32 %v6308_v44, %v3259_v42  ;;  %v3310_v57 = vmul.f32 1.442695, %v3280_v38  ;;  %v6418_v44 = vpop.f32.mrf.mxu1 }
 0x926   : > { %6732 = vst [vmem:[#allocation13_spill] sm:$0xff] %v6418_v44 }
 0x927   : > { %v3306_v13 = vmul.f32 1.442695, %v3278_v30  ;;  %v6420_v30 = vpop.f32.mrf.mxu1 }
 0x928   : > { %v3265_v53 = vpop.xlane.xlu1 %3264  ;;  %v3261_v40 = vpop.xlane.xlu0 %3260  ;;  %6733 = vst [vmem:[#allocation15_spill] sm:$0xff] %v6420_v30 }
 0x929   : > { %4989 = vpow2.f32 %v3306_v13  ;;  %v3281_v39 = vsub.f32 %v6311_v63, %v3265_v53  ;;  %v3279_v58 = vsub.f32 %v6313_v46, %v3261_v40  ;;  %v6422_v63 = vpop.f32.mrf.mxu1 }
 0x92a   : > { %4991 = vpow2.f32 %v3310_v57  ;;  %6734 = vst [vmem:[#allocation16_spill] sm:$0xff] %v6422_v63 }
 0x92b   : > { %v3312_v16 = vmul.f32 1.442695, %v3281_v39  ;;  %v3308_v55 = vmul.f32 1.442695, %v3279_v58  ;;  %v6429_v40 = vpop.f32.mrf.mxu1 }
 0x92c   : > { %v2687_v25 = vpop.xlane.xlu1 %2686  ;;  %v2691_v51 = vpop.xlane.xlu0 %2690  ;;  %6735 = vst [vmem:[#allocation17_spill] sm:$0xff] %v6429_v40 }
 0x92d   : > { %4993 = vpow2.f32 %v3312_v16  ;;  %v6441_v28 = vpop.f32.mrf.mxu1 }
 0x92e   : > { %4995 = vpow2.f32 %v3308_v55  ;;  %6736 = vst [vmem:[#allocation18_spill] sm:$0xff] %v6441_v28 }
 0x92f   : > { %4997 = vrcp.f32 %v2687_v25  ;;  %v6444_v25 = vpop.f32.mrf.mxu1 }
 0x930   : > { %v2693_v42 = vpop.xlane.xlu1 %2692  ;;  %v2689_v38 = vpop.xlane.xlu0 %2688  ;;  %6737 = vst [vmem:[#allocation19_spill] sm:$0xff] %v6444_v25 }
 0x931   : > { %4999 = vrcp.f32 %v2693_v42 }
 0x932   : > { %5001 = vrcp.f32 %v2689_v38 }
 0x933   : > { %5003 = vrcp.f32 %v2691_v51 }
 0x934   : > { %v2701_v13 = vpop.xlane.xlu1 %2700  ;;  %v2699_v7 = vpop.xlane.xlu0 %2698 }
 0x935   : > { %5005 = vrcp.f32 %v2701_v13 }
 0x936   : > { %v6424_v46 = vpop.eup %4989 }
 0x937   : > { %3338 = vadd.xlane.f32.xlu0 %v6424_v46  ;;  %v6427_v57 = vpop.eup %4991 }
 0x938   : > { %v2697_v53 = vpop.xlane.xlu1 %2696  ;;  %v2695_v16 = vpop.xlane.xlu0 %2694 }
 0x939   : > { %5007 = vrcp.f32 %v2697_v53 }
 0x93a   : > { %v6431_v39 = vpop.eup %4993  ;;  %5009 = vrcp.f32 %v2695_v16 }
 0x93b   : > { %v6433_v58 = vpop.eup %4995  ;;  %3342 = vadd.xlane.f32.xlu0 %v6427_v57  ;;  %5011 = vrcp.f32 %v2699_v7 }
 0x93c   : > { %3340 = vadd.xlane.f32.xlu1 %v6433_v58  ;;  %v2709_v54 = vpop.xlane.xlu1 %2708  ;;  %v2707_v37 = vpop.xlane.xlu0 %2706 }
 0x93d   : > { %v4998_v40 = vpop.eup %4997  ;;  %5013 = vrcp.f32 %v2709_v54 }
 0x93e   : > { %v5000_v23 = vpop.eup %4999 }
 0x93f   : > { %v5002_v63 = vpop.eup %5001 }
 0x940   : > { %3344 = vadd.xlane.f32.xlu1 %v6431_v39  ;;  %v2705_v55 = vpop.xlane.xlu1 %2704  ;;  %v2703_v38 = vpop.xlane.xlu0 %2702 }
 0x941   : > { %v5004_v0 = vpop.eup %5003  ;;  %5015 = vrcp.f32 %v2705_v55 }
 0x942   : > { %5017 = vrcp.f32 %v2703_v38  ;;  %v5006_v45 = vpop.eup %5005 }
 0x943   : > { %v4498_v42 = vpop.f32.mrf.mxu1  ;;  %5019 = vrcp.f32 %v2707_v37 }
 0x944   : > { %v2717_v30 = vpop.xlane.xlu1 %2716  ;;  %v2881_v13 = vmul.f32 %v5004_v0, %v4498_v42  ;;  %v2715_v53 = vpop.xlane.xlu0 %2714 }
 0x945   : > { %v2784_v61 = vpop.f32.mrf.mxu1  ;;  %5021 = vrcp.f32 %v2717_v30 }
 0x946   : > { %v2879_v47 = vmul.f32 %v4998_v40, %v2784_v61 }
 0x947   : > { %v4499_v19 = vpop.f32.mrf.mxu1 }
 0x948   : > { %v2882_v28 = vmul.f32 %v5000_v23, %v4499_v19  ;;  %v5008_v19 = vpop.eup %5007  ;;  %v2713_v54 = vpop.xlane.xlu1 %2712 }
 0x949   : > { %v2787_v51 = vpop.f32.mrf.mxu1  ;;  %v5010_v61 = vpop.eup %5009  ;;  %5023 = vrcp.f32 %v2713_v54 }
 0x94a   : > { %v2880_v44 = vmul.f32 %v5002_v63, %v2787_v51  ;;  %v2896_v7 = vpack.c.bf16 %v2882_v28, %v2881_v13  ;;  %v2711_v23 = vpop.xlane.xlu0 %2710 }
 0x94b   : > { %v4502_v25 = vpop.f32.mrf.mxu1  ;;  %5025 = vrcp.f32 %v2711_v23 }
 0x94c   : > { %v2895_v16 = vpack.c.bf16 %v2880_v44, %v2879_v47  ;;  %v5012_v47 = vpop.eup %5011  ;;  %5027 = vrcp.f32 %v2715_v53 }
 0x94d   : > { %v2800_v20 = vpop.f32.mrf.mxu1  ;;  %v2885_v44 = vmul.f32 %v5012_v47, %v4502_v25 }
 0x94e   : > { %4516 = vmatprep.mubr.msk.bf16.mxu1 %vm1213_vm0, %v2895_v16  ;;  %v2883_v37 = vmul.f32 %v5010_v61, %v2800_v20 }
 0x94f   : > { %v4503_v34 = vpop.f32.mrf.mxu1  ;;  %4517 = vmatmul.mubr.msk.bf16.vlgmr.msra.gmra.mxu1 %vm1213_vm0, %v2896_v7 }
 0x950   : > { %4565 = vmatpush3.bf16.msra.mxu1 %v6302_v27  ;;  %v2886_v0 = vmul.f32 %v5006_v45, %v4503_v34  ;;  %v5014_v34 = vpop.eup %5013 }
 0x951   : > { %4566 = vmatprep.subr.bf16.mxu1 %v6319_v2  ;;  %v2803_v63 = vpop.f32.mrf.mxu1  ;;  %v5016_v20 = vpop.eup %5015 }
 0x952   : > { %v2884_v28 = vmul.f32 %v5008_v19, %v2803_v63  ;;  %v2898_v42 = vpack.c.bf16 %v2886_v0, %v2885_v44  ;;  %v5018_v30 = vpop.eup %5017 }
 0x953   : > { %v4506_v40 = vpop.f32.mrf.mxu1 }
 0x954   : > { %v2897_v55 = vpack.c.bf16 %v2884_v28, %v2883_v37  ;;  %4567 = vmatpush3.bf16.msra.mxu1 %v6319_v2  ;;  %v5020_v2 = vpop.eup %5019 }
 0x955   : > { %4568 = vmatprep.subr.bf16.mxu1 %v6321_v17  ;;  %v2816_v27 = vpop.f32.mrf.mxu1  ;;  %v2889_v53 = vmul.f32 %v5020_v2, %v4506_v40  ;;  %v3357_v40 = vpop.permute.xlu0 %3356 }
 0x956   : > { %4520 = vmatprep.mubr.msk.bf16.mxu1 %vm1213_vm0, %v2897_v55  ;;  %v2887_v51 = vmul.f32 %v5018_v30, %v2816_v27  ;;  %v6738_v27 = vpack.c.bf16 %v6346_v31, %v6344_v11  ;;  %v6743_v11 = vpack.c.bf16 %v6382_v14, %v6376_v8  ;;  %v4771_v31 = vld [vmem:[%s6701_s4 + $0x38] sm:$0xff]   ;;  %v2378_v14 = vadd.f32 %v6398_v41, %v6129_v4 }
 0x957   : > { %v4507_v45 = vpop.f32.mrf.mxu1  ;;  %4521 = vmatmul.mubr.msk.bf16.gmra.mxu1 %vm1213_vm0, %v2898_v42  ;;  %v2383_v4 = vadd.f32 %v6404_v50, %v6141_v9  ;;  %v2407_v9 = vadd.f32 %v6412_v12, %v6147_v33 }
 0x958   : > { %4569 = vmatpush3.bf16.msra.mxu1 %v6321_v17  ;;  %v2890_v25 = vmul.f32 %v5014_v34, %v4507_v45  ;;  %v5022_v17 = vpop.eup %5021  ;;  %v6739_v34 = vpack.c.bf16 %v6340_v5, %v6338_v26  ;;  %v6741_v45 = vpack.c.bf16 %v6362_v60, %v6358_v43  ;;  %v6744_v26 = vpack.c.bf16 %v6433_v58, %v6424_v46 }
 0x959   : > { %4570 = vmatprep.subr.bf16.mxu1 %v6323_v10  ;;  %v2819_v38 = vpop.f32.mrf.mxu1  ;;  %v5024_v23 = vpop.eup %5023  ;;  %v6745_v5 = vpack.c.bf16 %v6431_v39, %v6427_v57  ;;  %v2367_v60 = vadd.f32 %v6396_v6, %v6126_v56  ;;  %v2370_v57 = vadd.f32 %v6400_v48, %v6133_v22  ;;  %v2394_v22 = vadd.f32 %v6406_v24, %v6143_v3 }
 0x95a   : > { %v2888_v13 = vmul.f32 %v5016_v20, %v2819_v38  ;;  %v2900_v19 = vpack.c.bf16 %v2890_v25, %v2889_v53  ;;  %v5026_v0 = vpop.eup %5025  ;;  %v6742_v20 = vpack.c.bf16 %v6384_v29, %v6378_v35 }
 0x95b   : > { %v4510_v16 = vpop.f32.mrf.mxu1  ;;  %v5028_v37 = vpop.eup %5027 }
 0x95c   : > { %v2899_v7 = vpack.c.bf16 %v2888_v13, %v2887_v51  ;;  %4571 = vmatpush3.bf16.msra.mxu1 %v6323_v10  ;;  %v2893_v44 = vmul.f32 %v5028_v37, %v4510_v16  ;;  %v6746_v16 = vld [vmem:[#allocation6_spill] sm:$0xff] }
 0x95d   : > { %4572 = vmatprep.subr.bf16.mxu1 %v6326_v62  ;;  %v2832_v54 = vpop.f32.mrf.mxu1 }
 0x95e   : > { %4524 = vmatprep.mubr.msk.bf16.mxu1 %vm1213_vm0, %v2899_v7  ;;  %v2891_v10 = vmul.f32 %v5026_v0, %v2832_v54  ;;  %v6747_v7 = vld [vmem:[#allocation11_spill] sm:$0xff] }
 0x95f   : > { %v4511_v61 = vpop.f32.mrf.mxu1  ;;  %4525 = vmatmul.mubr.msk.bf16.gmra.mxu1 %vm1213_vm0, %v2900_v19  ;;  %v2399_v3 = vadd.f32 %v6747_v7, %v6746_v16 }
 0x960   : > { %4573 = vmatpush3.bf16.msra.mxu1 %v6326_v62  ;;  %v2894_v63 = vmul.f32 %v5022_v17, %v4511_v61  ;;  %v3355_v62 = vpop.permute.xlu1 %3354  ;;  %v6748_v17 = vld [vmem:[#allocation7_spill] sm:$0xff]  ;;  %v6749_v61 = vld [vmem:[#allocation13_spill] sm:$0xff] }
 0x961   : > { %4574 = vmatprep.subr.bf16.mxu1 %v6328_v59  ;;  %v2835_v47 = vpop.f32.mrf.mxu1 }
 0x962   : > { %v2892_v28 = vmul.f32 %v5024_v23, %v2835_v47  ;;  %v2902_v42 = vpack.c.bf16 %v2894_v63, %v2893_v44  ;;  %v6750_v63 = vld [vmem:[#allocation9_spill] sm:$0xff]  ;;  %v6751_v47 = vld [vmem:[#allocation15_spill] sm:$0xff] }
 0x963   : > { %v2402_v33 = vadd.f32 %v6751_v47, %v6750_v63 }
 0x964   : > { %v2901_v55 = vpack.c.bf16 %v2892_v28, %v2891_v10  ;;  %4575 = vmatpush3.bf16.msra.mxu1 %v6328_v59  ;;  %v6740_v59 = vpack.c.bf16 %v6354_v32, %v6352_v21  ;;  %v4772_v21 = vld [vmem:[%s6701_s4 + $0x30] sm:$0xff]   ;;  %v2375_v32 = vadd.f32 %v6394_v49, %v6122_v15  ;;  %v2391_v49 = vadd.f32 %v6402_v1, %v6138_v36 }
 0x965   : > { %4576 = vmatprep.subr.bf16.mxu1 %v3357_v40  ;;  %v2386_v36 = vadd.f32 %v6409_v18, %v6145_v52  ;;  %v2410_v52 = vadd.f32 %v6749_v61, %v6748_v17  ;;  %v6752_v10 = vld [vmem:[#allocation8_spill] sm:$0xff] }
 0x966   : > { %4528 = vmatprep.mubr.msk.bf16.mxu1 %vm1213_vm0, %v2901_v55  ;;  %v6753_v28 = vld [vmem:[#allocation16_spill] sm:$0xff] }
 0x967   : > { %4529 = vmatmul.mubr.msk.bf16.gmra.mxu1 %vm1213_vm0, %v2902_v42  ;;  %v2423_v44 = vadd.f32 %v6753_v28, %v6752_v10 }
 0x968   : > { %4577 = vmatpush3.bf16.msra.mxu1 %v3357_v40  ;;  %4580 = vmatprep.mubr.bf16.mxu1 %v6738_v27  ;;  %v6755_v27 = vld [vmem:[#allocation17_spill] sm:$0xff] }
 0x969   : > { %4578 = vmatprep.subr.bf16.mxu1 %v3355_v62 }
 0x96c   : > { %4579 = vmatpush3.bf16.msra.mxu1 %v3355_v62  ;;  %v6754_v62 = vld [vmem:[#allocation10_spill] sm:$0xff] }
 0x96d   : > { %4596 = vmatprep.subr.bf16.mxu1 %v4771_v31 }
 0x96f   : > { %4581 = vmatmul.mubr.bf16.vlgmr.msra.gmra.mxu1 %v6739_v34  ;;  %v2415_v34 = vadd.f32 %v6755_v27, %v6754_v62 }
 0x970   : > { %4584 = vmatprep.mubr.bf16.mxu1 %v6740_v59  ;;  %4597 = vmatpush3.bf16.msra.mxu1 %v4771_v31 }
 0x971   : > { %4598 = vmatprep.subr.bf16.mxu1 %v4772_v21 }
 0x974   : > { %4599 = vmatpush3.bf16.msra.mxu1 %v4772_v21 }
 0x977   : > { %4585 = vmatmul.mubr.bf16.gmra.mxu1 %v6741_v45 }
 0x978   : > { %4588 = vmatprep.mubr.bf16.mxu1 %v6742_v20 }
 0x97d   : > { %v3315_v39 = vpop.xlane.xlu1 %3314  ;;  %v3317_v56 = vpop.xlane.xlu0 %3316 }
 0x97e   : > { %5029 = vrcp.f32 %v3315_v39 }
 0x97f   : > { %4589 = vmatmul.mubr.bf16.gmra.mxu1 %v6743_v11  ;;  %v6756_v11 = vld [vmem:[#allocation12_spill] sm:$0xff] }
 0x980   : > { %4592 = vmatprep.mubr.bf16.mxu1 %v6744_v26  ;;  %v6757_v26 = vld [vmem:[#allocation18_spill] sm:$0xff] }
 0x981   : > { %v3321_v48 = vpop.xlane.xlu1 %3320  ;;  %v3319_v1 = vpop.xlane.xlu0 %3318 }
 0x982   : > { %5031 = vrcp.f32 %v3321_v48 }
 0x983   : > { %5033 = vrcp.f32 %v3317_v56 }
 0x984   : > { %5035 = vrcp.f32 %v3319_v1 }
 0x985   : > { %v3325_v24 = vpop.xlane.xlu1 %3324  ;;  %v3323_v18 = vpop.xlane.xlu0 %3322 }
 0x986   : > { %5037 = vrcp.f32 %v3325_v24 }
 0x987   : > { %4593 = vmatmul.mubr.bf16.gmra.mxu1 %v6745_v5  ;;  %v2426_v5 = vadd.f32 %v6757_v26, %v6756_v11 }
 0x989   : > { %v3329_v40 = vpop.xlane.xlu1 %3328  ;;  %v3327_v59 = vpop.xlane.xlu0 %3326 }
 0x98a   : > { %5039 = vrcp.f32 %v3329_v40 }
 0x98b   : > { %5041 = vrcp.f32 %v3323_v18  ;;  %v5030_v39 = vpop.eup %5029 }
 0x98c   : > { %5043 = vrcp.f32 %v3327_v59 }
 0xa0f   : > { %v4518_v43 = vpop.f32.mrf.mxu1 }
 0xa10   : > { %v6499_v8 = vadd.f32 %v4518_v43, %v2375_v32  ;;  %v3333_v32 = vpop.xlane.xlu1 %3332 }
 0xa11   : > { %v2978_v35 = vpop.f32.mrf.mxu1  ;;  %5045 = vrcp.f32 %v3333_v32 }
 0xa12   : > { %v6503_v29 = vadd.f32 %v2978_v35, %v2367_v60  ;;  %v3331_v35 = vpop.xlane.xlu0 %3330 }
 0xa13   : > { %v4519_v46 = vpop.f32.mrf.mxu1 }
 0xa14   : > { %v6507_v58 = vadd.f32 %v4519_v46, %v2378_v14 }
 0xa15   : > { %v2981_v15 = vpop.f32.mrf.mxu1 }
 0xa16   : > { %v6511_v6 = vadd.f32 %v2981_v15, %v2370_v57  ;;  %v3337_v57 = vpop.xlane.xlu1 %3336  ;;  %v3335_v56 = vpop.xlane.xlu0 %3334 }
 0xa17   : > { %v4522_v30 = vpop.f32.mrf.mxu1  ;;  %5047 = vrcp.f32 %v3337_v57 }
 0xa18   : > { %v6515_v41 = vadd.f32 %v4522_v30, %v2391_v49  ;;  %v5032_v49 = vpop.eup %5031  ;;  %5049 = vrcp.f32 %v3331_v35 }
 0xa19   : > { %v2994_v25 = vpop.f32.mrf.mxu1  ;;  %v5034_v30 = vpop.eup %5033  ;;  %5051 = vrcp.f32 %v3335_v56 }
 0xa1a   : > { %v6519_v38 = vadd.f32 %v2994_v25, %v2383_v4  ;;  %v3341_v48 = vpop.xlane.xlu1 %3340 }
 0xa1b   : > { %v4523_v2 = vpop.f32.mrf.mxu1 }
 0xa1c   : > { %v6523_v51 = vadd.f32 %v4523_v2, %v2394_v22  ;;  %v5036_v22 = vpop.eup %5035 }
 0xa1d   : > { %v2997_v13 = vpop.f32.mrf.mxu1 }
 0xa1e   : > { %v6527_v50 = vadd.f32 %v2997_v13, %v2386_v36  ;;  %v3345_v17 = vpop.xlane.xlu1 %3344 }
 0xa1f   : > { %v4526_v53 = vpop.f32.mrf.mxu1 }
 0xa20   : > { %v6531_v19 = vadd.f32 %v4526_v53, %v2407_v9  ;;  %v3339_v9 = vpop.xlane.xlu0 %3338 }
 0xa21   : > { %v3010_v54 = vpop.f32.mrf.mxu1  ;;  %5053 = vrcp.f32 %v3339_v9 }
 0xa22   : > { %v6535_v23 = vadd.f32 %v3010_v54, %v2399_v3  ;;  %v5038_v3 = vpop.eup %5037  ;;  %5055 = vrcp.f32 %v3345_v17  ;;  %v3689_v17 = vld [vmem:[%s5257_s15 + $0x18] sm:$0xff] }
 0xa23   : > { %v4527_v0 = vpop.f32.mrf.mxu1  ;;  %v5040_v54 = vpop.eup %5039  ;;  %5057 = vrcp.f32 %v3341_v48 }
 0xa24   : > { %v6539_v12 = vadd.f32 %v4527_v0, %v2410_v52  ;;  %v5042_v61 = vpop.eup %5041  ;;  %v3343_v63 = vpop.xlane.xlu0 %3342 }
 0xa25   : > { %v3013_v37 = vpop.f32.mrf.mxu1  ;;  %v5044_v0 = vpop.eup %5043  ;;  %5059 = vrcp.f32 %v3343_v63 }
 0xa26   : > { %v6543_v55 = vadd.f32 %v3013_v37, %v2402_v33 }
 0xa27   : > { %v4530_v42 = vpop.f32.mrf.mxu1 }
 0xa28   : > { %v6547_v45 = vadd.f32 %v4530_v42, %v2423_v44  ;;  %v5046_v42 = vpop.eup %5045 }
 0xa29   : > { %v3026_v20 = vpop.f32.mrf.mxu1  ;;  %v5048_v27 = vpop.eup %5047 }
 0xa2a   : > { %v6551_v31 = vadd.f32 %v3026_v20, %v2415_v34  ;;  %v5050_v34 = vpop.eup %5049 }
 0xa2b   : > { %v4531_v21 = vpop.f32.mrf.mxu1  ;;  %v5052_v11 = vpop.eup %5051 }
 0xa2c   : > { %v6553_v43 = vadd.f32 %v4531_v21, %v2426_v5 }
 0xa2d   : > { %v6555_v60 = vpop.f32.mrf.mxu1 }
 0xa2e   : > { %v5054_v57 = vpop.eup %5053 }
 0xa2f   : > { %v4582_v14 = vpop.f32.mrf.mxu1 }
 0xa30   : > { %v3509_v1 = vmul.f32 %v5036_v22, %v4582_v14 }
 0xa31   : > { %v3412_v46 = vpop.f32.mrf.mxu1 }
 0xa32   : > { %v3507_v2 = vmul.f32 %v5030_v39, %v3412_v46 }
 0xa33   : > { %v4583_v15 = vpop.f32.mrf.mxu1 }
 0xa34   : > { %v3510_v4 = vmul.f32 %v5032_v49, %v4583_v15  ;;  %v5056_v15 = vpop.eup %5055 }
 0xa35   : > { %v3415_v25 = vpop.f32.mrf.mxu1  ;;  %v5058_v49 = vpop.eup %5057 }
 0xa36   : > { %v3508_v36 = vmul.f32 %v5034_v30, %v3415_v25  ;;  %v3524_v16 = vpack.c.bf16 %v3510_v4, %v3509_v1  ;;  %v5060_v4 = vpop.eup %5059 }
 0xa37   : > { %v4586_v13 = vpop.f32.mrf.mxu1 }
 0xa38   : > { %v3523_v53 = vpack.c.bf16 %v3508_v36, %v3507_v2  ;;  %v3513_v37 = vmul.f32 %v5044_v0, %v4586_v13  ;;  %v3688_v13 = vld [vmem:[%s5257_s15 + $0x10] sm:$0xff]  ;;  %v3687_v0 = vld [vmem:[%s5257_s15 + $0x8] sm:$0xff] }
 0xa39   : > { %v3428_v7 = vpop.f32.mrf.mxu1 }
 0xa3a   : > { %4600 = vmatprep.mubr.msk.bf16.mxu1 %vm1213_vm0, %v3523_v53  ;;  %v3511_v47 = vmul.f32 %v5042_v61, %v3428_v7  ;;  %v6573_v53 = vld [vmem:[%s6702_s5] ss:$0 sm:$0xff] }
 0xa3b   : > { %v4587_v24 = vpop.f32.mrf.mxu1  ;;  %4601 = vmatmul.mubr.msk.bf16.vlgmr.msra.gmra.mxu1 %vm1213_vm0, %v3524_v16  ;;  %v3686_v7 = vld [vmem:[%s5257_s15] sm:$0xff] }
 0xa3c   : > { %v3514_v52 = vmul.f32 %v5040_v54, %v4587_v24 }
 0xa3d   : > { %v3431_v18 = vpop.f32.mrf.mxu1 }
 0xa3e   : > { %v3512_v33 = vmul.f32 %v5038_v3, %v3431_v18  ;;  %v3526_v44 = vpack.c.bf16 %v3514_v52, %v3513_v37  ;;  %v3692_v37 = vld [vmem:[%s5257_s15 + $0x30] sm:$0xff] }
 0xa3f   : > { %v4590_v10 = vpop.f32.mrf.mxu1 }
 0xa40   : > { %v3525_v28 = vpack.c.bf16 %v3512_v33, %v3511_v47  ;;  %v3517_v21 = vmul.f32 %v5052_v11, %v4590_v10 }
 0xa41   : > { %v3444_v40 = vpop.f32.mrf.mxu1 }
 0xa42   : > { %4604 = vmatprep.mubr.msk.bf16.mxu1 %vm1213_vm0, %v3525_v28  ;;  %v3515_v26 = vmul.f32 %v5050_v34, %v3444_v40  ;;  %v3690_v40 = vld [vmem:[%s5257_s15 + $0x20] sm:$0xff]  ;;  %v3693_v34 = vld [vmem:[%s5257_s15 + $0x38] sm:$0xff] }
 0xa43   : > { %v4591_v62 = vpop.f32.mrf.mxu1  ;;  %4605 = vmatmul.mubr.msk.bf16.gmra.mxu1 %vm1213_vm0, %v3526_v44 }
 0xa44   : > { %v3518_v59 = vmul.f32 %v5048_v27, %v4591_v62 }
 0xa45   : > { %v3447_v20 = vpop.f32.mrf.mxu1 }
 0xa46   : > { %v3516_v5 = vmul.f32 %v5046_v42, %v3447_v20  ;;  %v3528_v14 = vpack.c.bf16 %v3518_v59, %v3517_v21 }
 0xa47   : > { %v4594_v32 = vpop.f32.mrf.mxu1 }
 0xa48   : > { %v3527_v35 = vpack.c.bf16 %v3516_v5, %v3515_v26  ;;  %v3521_v48 = vmul.f32 %v5060_v4, %v4594_v32  ;;  %v3691_v26 = vld [vmem:[%s5257_s15 + $0x28] sm:$0xff] }
 0xa49   : > { %v3460_v46 = vpop.f32.mrf.mxu1 }
 0xa4a   : > { %4608 = vmatprep.mubr.msk.bf16.mxu1 %vm1213_vm0, %v3527_v35  ;;  %v3519_v25 = vmul.f32 %v5054_v57, %v3460_v46  ;;  %v3696_v35 = vld [vmem:[%s5257_s15 + $0x50] sm:$0xff] }
 0xa4b   : > { %v4595_v39 = vpop.f32.mrf.mxu1  ;;  %4609 = vmatmul.mubr.msk.bf16.gmra.mxu1 %vm1213_vm0, %v3528_v14 }
 0xa4c   : > { %v3522_v56 = vmul.f32 %v5056_v15, %v4595_v39  ;;  %v3694_v39 = vld [vmem:[%s5257_s15 + $0x40] sm:$0xff] }
 0xa4d   : > { %v3463_v30 = vpop.f32.mrf.mxu1 }
 0xa4e   : > { %v3520_v22 = vmul.f32 %v5058_v49, %v3463_v30  ;;  %v3530_v36 = vpack.c.bf16 %v3522_v56, %v3521_v48  ;;  %v3697_v30 = vld [vmem:[%s5257_s15 + $0x58] sm:$0xff]  ;;  %v3695_v48 = vld [vmem:[%s5257_s15 + $0x48] sm:$0xff] }
 0xa50   : > { %v3529_v2 = vpack.c.bf16 %v3520_v22, %v3519_v25 }
 0xa52   : > { %4612 = vmatprep.mubr.msk.bf16.mxu1 %vm1213_vm0, %v3529_v2 }
 0xa53   : > { %4613 = vmatmul.mubr.msk.bf16.gmra.mxu1 %vm1213_vm0, %v3530_v36 }
 0xafb   : > { %v4602_v1 = vpop.f32.mrf.mxu1 }
 0xafc   : > { %v3671_v9 = vadd.f32 %v4602_v1, %v6499_v8 }
 0xafd   : > { %v3606_v16 = vpop.f32.mrf.mxu1 }
 0xafe   : > { %v3704_v3 = vadd.f32 %v3688_v13, %v3671_v9  ;;  %v3669_v24 = vadd.f32 %v3606_v16, %v6503_v29  ;;  %v3700_v13 = vld [vmem:[%s5257_s15 + $0x70] sm:$0xff] }
 0xaff   : > { %v4603_v54 = vpop.f32.mrf.mxu1 }
 0xb00   : > { %v3727_v61 = vadd.f32 %v6573_v53, %v3704_v3  ;;  %v3702_v52 = vadd.f32 %v3686_v7, %v3669_v24  ;;  %v3672_v18 = vadd.f32 %v4603_v54, %v6507_v58  ;;  %v3698_v3 = vld [vmem:[%s5257_s15 + $0x60] sm:$0xff]  ;;  %v6759_v54 = vld [vmem:[#allocation19_spill] sm:$0xff] }
 0xb01   : > { %v3609_v8 = vpop.f32.mrf.mxu1  ;;  %v6758_v24 = vld [vmem:[#allocation14_spill] sm:$0xff] }
 0xb02   : > { %3743 = vst [vmem:[%s6581_s12 + $0x10] sm:$0xff] %v3727_v61  ;;  %v3725_v63 = vadd.f32 %v6573_v53, %v3702_v52  ;;  %v3705_v29 = vadd.f32 %v3689_v17, %v3672_v18  ;;  %v3670_v47 = vadd.f32 %v3609_v8, %v6511_v6  ;;  %v2418_v17 = vadd.f32 %v6759_v54, %v6758_v24  ;;  %v3701_v8 = vld [vmem:[%s5257_s15 + $0x78] sm:$0xff] }
 0xb03   : > { %v4606_v33 = vpop.f32.mrf.mxu1 }
 0xb04   : > { %3741 = vst [vmem:[%s6581_s12] sm:$0xff] %v3725_v63  ;;  %v3728_v58 = vadd.f32 %v6573_v53, %v3705_v29  ;;  %v3703_v10 = vadd.f32 %v3687_v0, %v3670_v47  ;;  %v3675_v28 = vadd.f32 %v4606_v33, %v6515_v41  ;;  %v3699_v33 = vld [vmem:[%s5257_s15 + $0x68] sm:$0xff]  ;;  %s5077_s15 = scalar_lea.vmem %s6645_s14, 2048 }
 0xb05   : > { %v3622_v44 = vpop.f32.mrf.mxu1  ;;  %p5078_p12 = scmp.ne.s32.totalorder %s6645_s14, %s5077_s15  ;;  %p5085_p2 = scmp.lt.s32.totalorder %s5083_s27, %s5077_s15 }
 0xb06   : > { %3744 = vst [vmem:[%s6581_s12 + $0x18] sm:$0xff] %v3728_v58  ;;  %v3726_v42 = vadd.f32 %v6573_v53, %v3703_v10  ;;  %v3708_v62 = vadd.f32 %v3692_v37, %v3675_v28  ;;  %v3673_v6 = vadd.f32 %v3622_v44, %v6519_v38 }
 0xb07   : > { %v4607_v27 = vpop.f32.mrf.mxu1  ;;  %p5079_p13 = pnand %p5078_p12, %p5237_p4  ;;  %p5086_p3 = por %p5085_p2, %p5084_p1 }
 0xb08   : > { %3742 = vst [vmem:[%s6581_s12 + $0x8] sm:$0xff] %v3726_v42  ;;  %v3731_v59 = vadd.f32 %v6573_v53, %v3708_v62  ;;  %v3706_v20 = vadd.f32 %v3690_v40, %v3673_v6  ;;  %v3676_v41 = vadd.f32 %v4607_v27, %v6523_v51 }
 0xb09   : > { %v3625_v11 = vpop.f32.mrf.mxu1  ;;  %p5080_p0 = pneg %p5079_p13 }
 0xb0a   : > { %3747 = vst [vmem:[%s6581_s12 + $0x30] sm:$0xff] %v3731_v59  ;;  %v3729_v5 = vadd.f32 %v6573_v53, %v3706_v20  ;;  %v3709_v21 = vadd.f32 %v3693_v34, %v3676_v41  ;;  %v3674_v38 = vadd.f32 %v3625_v11, %v6527_v50 }
 0xb0b   : > { %v4610_v32 = vpop.f32.mrf.mxu1  ;;  %p5087_p5 = pnand %p5086_p3, %p5080_p0 }
 0xb0c   : > { %3745 = vst [vmem:[%s6581_s12 + $0x20] sm:$0xff] %v3729_v5  ;;  %v3732_v14 = vadd.f32 %v6573_v53, %v3709_v21  ;;  %v3707_v46 = vadd.f32 %v3691_v26, %v3674_v38  ;;  %v3679_v51 = vadd.f32 %v4610_v32, %v6531_v19 }
 0xb0d   : > { %v3638_v57 = vpop.f32.mrf.mxu1 }
 0xb0e   : > { %3748 = vst [vmem:[%s6581_s12 + $0x38] sm:$0xff] %v3732_v14  ;;  %v3730_v15 = vadd.f32 %v6573_v53, %v3707_v46  ;;  %v3712_v49 = vadd.f32 %v3696_v35, %v3679_v51  ;;  %v3677_v50 = vadd.f32 %v3638_v57, %v6535_v23 }
 0xb0f   : > { %v4611_v56 = vpop.f32.mrf.mxu1 }
 0xb10   : > { %3746 = vst [vmem:[%s6581_s12 + $0x28] sm:$0xff] %v3730_v15  ;;  %v3735_v4 = vadd.f32 %v6573_v53, %v3712_v49  ;;  %v3710_v25 = vadd.f32 %v3694_v39, %v3677_v50  ;;  %v3680_v22 = vadd.f32 %v4611_v56, %v6539_v12 }
 0xb11   : > { %v3641_v19 = vpop.f32.mrf.mxu1 }
 0xb12   : > { %3751 = vst [vmem:[%s6581_s12 + $0x50] sm:$0xff] %v3735_v4  ;;  %v3733_v2 = vadd.f32 %v6573_v53, %v3710_v25  ;;  %v3713_v36 = vadd.f32 %v3697_v30, %v3680_v22  ;;  %v3678_v1 = vadd.f32 %v3641_v19, %v6543_v55 }
 0xb13   : > { %v4614_v23 = vpop.f32.mrf.mxu1 }
 0xb14   : > { %3749 = vst [vmem:[%s6581_s12 + $0x40] sm:$0xff] %v3733_v2  ;;  %v3736_v9 = vadd.f32 %v6573_v53, %v3713_v36  ;;  %v3711_v16 = vadd.f32 %v3695_v48, %v3678_v1  ;;  %v3683_v7 = vadd.f32 %v4614_v23, %v6547_v45  ;;  %v3054_v45 = vadd.f32 %v6555_v60, %v2418_v17 }
 0xb15   : > { %v3654_v12 = vpop.f32.mrf.mxu1 }
 0xb16   : > { %3752 = vst [vmem:[%s6581_s12 + $0x58] sm:$0xff] %v3736_v9  ;;  %v3734_v61 = vadd.f32 %v6573_v53, %v3711_v16  ;;  %v3716_v55 = vadd.f32 %v3700_v13, %v3683_v7  ;;  %v3681_v52 = vadd.f32 %v3654_v12, %v6551_v31 }
 0xb17   : > { %v4615_v18 = vpop.f32.mrf.mxu1 }
 0xb18   : > { %3750 = vst [vmem:[%s6581_s12 + $0x48] sm:$0xff] %v3734_v61  ;;  %v3739_v0 = vadd.f32 %v6573_v53, %v3716_v55  ;;  %v3714_v63 = vadd.f32 %v3698_v3, %v3681_v52  ;;  %v3684_v29 = vadd.f32 %v4615_v18, %v6553_v43 }
 0xb19   : > { %v3657_v47 = vpop.f32.mrf.mxu1 }
 0xb1a   : > { %3755 = vst [vmem:[%s6581_s12 + $0x70] sm:$0xff] %v3739_v0  ;;  %v3737_v37 = vadd.f32 %v6573_v53, %v3714_v63  ;;  %v3717_v31 = vadd.f32 %v3701_v8, %v3684_v29  ;;  %v3682_v58 = vadd.f32 %v3657_v47, %v3054_v45 }
 0xb1c   : > { %3753 = vst [vmem:[%s6581_s12 + $0x60] sm:$0xff] %v3737_v37  ;;  %v3740_v60 = vadd.f32 %v6573_v53, %v3717_v31  ;;  %v3715_v10 = vadd.f32 %v3699_v33, %v3682_v58 }
 0xb1e   : > { %3756 = vst [vmem:[%s6581_s12 + $0x78] sm:$0xff] %v3740_v60  ;;  %v3738_v43 = vadd.f32 %v6573_v53, %v3715_v10 }
 0xb20   : > { %3754 = vst [vmem:[%s6581_s12 + $0x68] sm:$0xff] %v3738_v43 }
 0xb21   : > { %5090 = shalt.err (!%p5087_p5)
}
 0xb22   : > { %s5091_s28 = scalar_lea.hbm %s6643_s18, 2048  ;;  %s5095_s11 = scalar_lea.hbm %s6703_s6, 4096 }
 0xb23   : > { %p5092_p6 = scmp.ne.s32.totalorder %s6643_s18, %s5091_s28  ;;  %p5096_p10 = scmp.lt.s32.totalorder %s6643_s18, %s6703_s6 }
 0xb24   : > { %p5097_p11 = scmp.lt.s32.totalorder %s5095_s11, %s5091_s28 }
 0xb25   : > { %p5093_p7 = pnand %p5092_p6, %p5237_p4 }
 0xb26   : > { %p5098_p12 = por %p5097_p11, %p5096_p10 }
 0xb27   : > { %p5094_p9 = pneg %p5093_p7 }
 0xb29   : > { %p5099_p13 = pnand %p5098_p12, %p5094_p9 }
 0xb2b   : > { %5102 = shalt.err (!%p5099_p13)
}
 0xb2c   : > { %s5160_s16 = smov 128   ;;  %s5161_s17 = smov 8  }
 0xb2d   : > { %4648 = dma.vmem_to_hbm [thread:$0]  (%p5237_p4), %s6645_s14, 2048, %s6643_s18, %s6652_s24, %s5160_s16, %s5160_s16, %s5161_s17  }
 0xb2e PF: > { %p4654_p0 = scmp.ge.s32.totalorder %s5153_s26, 2  ;;  %s3788_s15 = sand.u32 1, %s5133_s21  }
 0xb2f   : > { %s3789_s19 = scalar_lea.sflag [#allocation4], %s3788_s15 }
 0xb30   : > { %p4651_p1 = pnand %p4654_p0, %p5244_p8 }
 0xb32   : > { %p4652_p2 = pneg %p4651_p1 }
 0xb34   : > { %5128 = dma.done.wait (%p4652_p2), %s3789_s19, 2048  }
 0xb35   : > { %5130 = vsyncadd (%p4652_p2), %s3789_s19, 4294965248  ;;  %s19_s26 = sadd.s32 1, %s5153_s26   ;;  %s6760_s21 = smov %s5137_s22 }
 0xb36   : > { %p16_p3 = scmp.ge.s32.totalorder %s19_s26, 4   ;;  %s6761_s22 = smov %s5141_s23 }
 0xb37   : > { %s6762_s23 = smov %s5250_s10  ;;  %s6763_s24 = smov %s5149_s25 }
 0xb38   : > { %s6764_s25 = smov %s6766_s29  ;;  %18 = sbr.rel (!%p16_p3) target bundleno = 4 (0x4), region = 88 }
 0xb3d   :  { %3794 = vsyncpa [#allocation4], 1 }
 0xb3e   :  { %3796 = vsyncpa [#allocation4 + $0x1], 1 }

</bundles_post_ra>
